<compile_context>
chip_gen: v6e
topology: v6e:2x2x1
jax: 0.10.0
libtpu: 0.0.40
codegen_flags: <defaults>
</compile_context>

<pallas_src>
import jax
import jax.numpy as jnp
from jax import lax
from jax.experimental import pallas as pl
from jax.experimental.pallas import tpu as pltpu

# ---- small, module-consistent dims (d_model=768, nhead=8, ... scaled down) ----
B = 2          # batch
T = 16         # time_frames (seq len)
D = 128        # d_model (freq_bins)
H = 4          # nhead
HD = D // H    # head dim
F = 256        # d_ffn
L = 2          # num_encoder_layers
EPS = 1e-5
BT = B * T     # folded batch*time rows fed to every weight matmul


def _layer_norm(x, g, b):
    mu = jnp.mean(x, axis=-1, keepdims=True)
    var = jnp.mean((x - mu) ** 2, axis=-1, keepdims=True)
    return (x - mu) * lax.rsqrt(var + EPS) * g + b


def fused_transformer_kernel(x_ref,
                             ln1g_ref, ln1b_ref, wqkv_ref, bqkv_ref, wo_ref, bo_ref,
                             ln2g_ref, ln2b_ref, w1_ref, b1_ref, w2_ref, b2_ref,
                             fg_ref, fb_ref, o_ref, ctx_ref):
    x = x_ref[...]                                    # (BT, D) f32 residual stream

    for l in range(L):                                # static unroll over layers
        # ---------------- pre-norm + multi-head self attention ----------------
        xn = _layer_norm(x, ln1g_ref[l], ln1b_ref[l])
        qkv = jnp.dot(xn.astype(jnp.bfloat16), wqkv_ref[l],
                      preferred_element_type=jnp.float32) + bqkv_ref[l]   # (BT, 3D)
        # 1/sqrt(HD) is already folded into the Q columns / Q bias on the host.
        q = qkv[:, 0 * D:1 * D]
        k = qkv[:, 1 * D:2 * D]
        v = qkv[:, 2 * D:3 * D]

        for b in range(B):                            # static unroll: per-sequence attention
            r0 = b * T
            for h in range(H):                        # static unroll over heads
                c0 = h * HD
                qh = q[r0:r0 + T, c0:c0 + HD]
                kh = k[r0:r0 + T, c0:c0 + HD]
                vh = v[r0:r0 + T, c0:c0 + HD]
                # q @ k^T without an explicit in-kernel transpose (contract minor dims)
                s = lax.dot_general(qh, kh, (((1,), (1,)), ((), ())),
                                    preferred_element_type=jnp.float32)   # (T, T) f32
                s = s - jnp.max(s, axis=-1, keepdims=True)
                p = jnp.exp(s)
                p = p * pl.reciprocal(jnp.sum(p, axis=-1, keepdims=True), approx=True)
                # stage this head's context at lane offset h*HD -> one merged Wo matmul
                ctx_ref[r0:r0 + T, c0:c0 + HD] = jnp.dot(
                    p.astype(jnp.bfloat16), vh.astype(jnp.bfloat16),
                    preferred_element_type=jnp.float32)

        attn = jnp.dot(ctx_ref[...].astype(jnp.bfloat16), wo_ref[l],
                       preferred_element_type=jnp.float32)                # single K=128 matmul
        x = x + attn + bo_ref[l]

        # ---------------- pre-norm + position-wise FFN ----------------
        xn = _layer_norm(x, ln2g_ref[l], ln2b_ref[l])
        hdn = jnp.dot(xn.astype(jnp.bfloat16), w1_ref[l],
                      preferred_element_type=jnp.float32) + b1_ref[l]
        hdn = jnp.maximum(hdn, 0.0)                   # ReLU
        x = x + jnp.dot(hdn.astype(jnp.bfloat16), w2_ref[l],
                        preferred_element_type=jnp.float32) + b2_ref[l]

    # ---------------- final LayerNorm ----------------
    o_ref[...] = _layer_norm(x, fg_ref[...], fb_ref[...])


def audio_transformer_forward(x, layer_params, final_g, final_b):
    """x: (B, T, D) float32.  Host side only does layout / precision plumbing."""
    scale = 1.0 / (HD ** 0.5)

    def stack(idx, transpose=False, dtype=None):
        w = jnp.stack([p[idx].T if transpose else p[idx] for p in layer_params], axis=0)
        return w if dtype is None else w.astype(dtype)

    # Wqkv pre-transposed to (D, 3D); fold the softmax scale into its Q columns
    # (and into bqkv's Q slice) before the bf16 cast.
    wqkv = stack(2, transpose=True)
    wqkv = wqkv.at[:, :, :D].multiply(scale).astype(jnp.bfloat16)    # (L, D, 3D) bf16
    bqkv = stack(3).at[:, :, :D].multiply(scale)                     # (L, 1, 3D) f32

    weights = (
        stack(0), stack(1),                          # ln1 gamma/beta     (L, 1, D) f32
        wqkv, bqkv,                                  # Wqkv bf16, bqkv f32
        stack(4, True, jnp.bfloat16), stack(5),      # Wo (L, D, D) bf16, bo (L, 1, D) f32
        stack(6), stack(7),                          # ln2 gamma/beta     (L, 1, D) f32
        stack(8, True, jnp.bfloat16), stack(9),      # W1 (L, D, F) bf16, b1 (L, 1, F) f32
        stack(10, True, jnp.bfloat16), stack(11),    # W2 (L, F, D) bf16, b2 (L, 1, D) f32
        final_g, final_b,                            # final LN           (1, D) f32
    )

    vmem = lambda: pl.BlockSpec(memory_space=pltpu.MemorySpace.VMEM)
    out = pl.pallas_call(
        fused_transformer_kernel,
        out_shape=jax.ShapeDtypeStruct((BT, D), jnp.float32),
        in_specs=[vmem() for _ in range(1 + len(weights))],
        out_specs=vmem(),
        scratch_shapes=[pltpu.VMEM((BT, D), jnp.float32)],   # per-layer ctx staging
        compiler_params=pltpu.CompilerParams(vmem_limit_bytes=32 * 1024 * 1024),
    )(x.reshape(BT, D), *weights)
    return out.reshape(B, T, D)


# ------------------------- pure-JAX reference -------------------------
def _ref_ln(x, g, b):
    mu = jnp.mean(x, axis=-1, keepdims=True)
    var = jnp.mean((x - mu) ** 2, axis=-1, keepdims=True)
    return (x - mu) * lax.rsqrt(var + EPS) * g[0] + b[0]


def ref_forward(x, layer_params, final_g, final_b, wdt=jnp.float32):
    """wdt=float32 -> exact module math; wdt=bfloat16 -> mirrors the kernel's
    mixed precision (bf16 weights + matmul LHS, f32 accumulation/LN/softmax)."""
    c = lambda a: a.astype(wdt)
    for (ln1g, ln1b, wqkv, bqkv, wo, bo, ln2g, ln2b, w1, b1, w2, b2) in layer_params:
        xn = _ref_ln(x, ln1g, ln1b)
        qkv = jnp.einsum('btd,ed->bte', c(xn), c(wqkv),
                         preferred_element_type=jnp.float32) + bqkv[0]
        q, k, v = qkv[..., :D], qkv[..., D:2 * D], qkv[..., 2 * D:]
        q = q.reshape(B, T, H, HD)
        k = k.reshape(B, T, H, HD)
        v = v.reshape(B, T, H, HD)
        s = jnp.einsum('bqhd,bkhd->bhqk', q, k,
                       preferred_element_type=jnp.float32) / (HD ** 0.5)
        p = jax.nn.softmax(s, axis=-1)
        ctx = jnp.einsum('bhqk,bkhd->bqhd', c(p), c(v),
                         preferred_element_type=jnp.float32).reshape(B, T, D)
        x = x + jnp.einsum('btd,ed->bte', c(ctx), c(wo),
                           preferred_element_type=jnp.float32) + bo[0]
        xn = _ref_ln(x, ln2g, ln2b)
        hdn = jax.nn.relu(jnp.einsum('btd,fd->btf', c(xn), c(w1),
                                     preferred_element_type=jnp.float32) + b1[0])
        x = x + jnp.einsum('btf,df->btd', c(hdn), c(w2),
                           preferred_element_type=jnp.float32) + b2[0]
    return _ref_ln(x, final_g, final_b)


# ------------------------- deterministic init -------------------------
def init_params(key):
    layer_params = []
    for _ in range(L):
        keys = jax.random.split(key, 7)
        key = keys[-1]
        ln1g = jnp.ones((1, D), jnp.float32)
        ln1b = jnp.zeros((1, D), jnp.float32)
        wqkv = 0.02 * jax.random.normal(keys[0], (3 * D, D), jnp.float32)
        bqkv = 0.02 * jax.random.normal(keys[1], (1, 3 * D), jnp.float32)
        wo = 0.02 * jax.random.normal(keys[2], (D, D), jnp.float32)
        bo = jnp.zeros((1, D), jnp.float32)
        ln2g = jnp.ones((1, D), jnp.float32)
        ln2b = jnp.zeros((1, D), jnp.float32)
        w1 = 0.02 * jax.random.normal(keys[3], (F, D), jnp.float32)
        b1 = 0.02 * jax.random.normal(keys[4], (1, F), jnp.float32)
        w2 = 0.02 * jax.random.normal(keys[5], (D, F), jnp.float32)
        b2 = jnp.zeros((1, D), jnp.float32)
        layer_params.append((ln1g, ln1b, wqkv, bqkv, wo, bo,
                             ln2g, ln2b, w1, b1, w2, b2))
    final_g = jnp.ones((1, D), jnp.float32)
    final_b = jnp.zeros((1, D), jnp.float32)
    return layer_params, final_g, final_b


if __name__ == "__main__":
    key = jax.random.PRNGKey(0)
    k_x, k_p = jax.random.split(key)
    audio_input = jax.random.normal(k_x, (B, T, D), jnp.float32)
    layer_params, final_g, final_b = init_params(k_p)

    out = audio_transformer_forward(audio_input, layer_params, final_g, final_b)
    out = jax.block_until_ready(out)
    assert out.shape == (B, T, D)

    # Tight check vs a precision-matched (bf16 weights / LHS) reference.
    ref_mixed = ref_forward(audio_input, layer_params, final_g, final_b, wdt=jnp.bfloat16)
    err_mixed = float(jnp.max(jnp.abs(out - ref_mixed)))
    assert err_mixed < 3e-3, f"mismatch vs precision-matched reference: {err_mixed}"

    # Loose check vs the exact f32 module semantics (bounds the bf16 weight error).
    ref_f32 = ref_forward(audio_input, layer_params, final_g, final_b)
    err_f32 = float(jnp.max(jnp.abs(out - ref_f32)))
    assert err_f32 < 5e-2, f"mismatch vs f32 reference: {err_f32}"

    print("KERNEL_OK")
</pallas_src>

<mosaic_0001>
module attributes {stable_mosaic.version = 11 : i64} {
  func.func @fused_transformer_kernel(%arg0: memref<32x128xf32, #tpu.memory_space<vmem>>, %arg1: memref<2x1x128xf32, #tpu.memory_space<vmem>>, %arg2: memref<2x1x128xf32, #tpu.memory_space<vmem>>, %arg3: memref<2x128x384xbf16, #tpu.memory_space<vmem>>, %arg4: memref<2x1x384xf32, #tpu.memory_space<vmem>>, %arg5: memref<2x128x128xbf16, #tpu.memory_space<vmem>>, %arg6: memref<2x1x128xf32, #tpu.memory_space<vmem>>, %arg7: memref<2x1x128xf32, #tpu.memory_space<vmem>>, %arg8: memref<2x1x128xf32, #tpu.memory_space<vmem>>, %arg9: memref<2x128x256xbf16, #tpu.memory_space<vmem>>, %arg10: memref<2x1x256xf32, #tpu.memory_space<vmem>>, %arg11: memref<2x256x128xbf16, #tpu.memory_space<vmem>>, %arg12: memref<2x1x128xf32, #tpu.memory_space<vmem>>, %arg13: memref<1x128xf32, #tpu.memory_space<vmem>>, %arg14: memref<1x128xf32, #tpu.memory_space<vmem>>, %arg15: memref<32x128xf32, #tpu.memory_space<vmem>>, %arg16: memref<32x128xf32, #tpu.memory_space<vmem>>) attributes {dimension_semantics = [], scalar_prefetch = 0 : i64, scratch_operands = 1 : i64, tpu.core_type = #tpu.core_type<tc>} {
    %c0 = arith.constant 0 : index
    %c0_0 = arith.constant 0 : index
    %0 = vector.load %arg0[%c0, %c0_0] : memref<32x128xf32, #tpu.memory_space<vmem>>, vector<32x128xf32>
    %c0_1 = arith.constant 0 : index
    %c0_2 = arith.constant 0 : index
    %c0_3 = arith.constant 0 : index
    %1 = vector.load %arg1[%c0_1, %c0_2, %c0_3] : memref<2x1x128xf32, #tpu.memory_space<vmem>>, vector<1x1x128xf32>
    %2 = vector.shape_cast %1 : vector<1x1x128xf32> to vector<1x128xf32>
    %c0_4 = arith.constant 0 : index
    %c0_5 = arith.constant 0 : index
    %c0_6 = arith.constant 0 : index
    %3 = vector.load %arg2[%c0_4, %c0_5, %c0_6] : memref<2x1x128xf32, #tpu.memory_space<vmem>>, vector<1x1x128xf32>
    %4 = vector.shape_cast %3 : vector<1x1x128xf32> to vector<1x128xf32>
    %cst = arith.constant dense<0.000000e+00> : vector<32xf32>
    %5 = vector.multi_reduction <add>, %0, %cst [1] : vector<32x128xf32> to vector<32xf32>
    %6 = vector.shape_cast %5 : vector<32xf32> to vector<32x1xf32>
    %cst_7 = arith.constant 1.280000e+02 : f32
    %7 = vector.broadcast %cst_7 : f32 to vector<32x1xf32>
    %8 = arith.divf %6, %7 : vector<32x1xf32>
    %9 = vector.broadcast %8 : vector<32x1xf32> to vector<32x128xf32>
    %10 = arith.subf %0, %9 : vector<32x128xf32>
    %11 = arith.mulf %10, %10 : vector<32x128xf32>
    %cst_8 = arith.constant dense<0.000000e+00> : vector<32xf32>
    %12 = vector.multi_reduction <add>, %11, %cst_8 [1] : vector<32x128xf32> to vector<32xf32>
    %13 = vector.shape_cast %12 : vector<32xf32> to vector<32x1xf32>
    %cst_9 = arith.constant 1.280000e+02 : f32
    %14 = vector.broadcast %cst_9 : f32 to vector<32x1xf32>
    %15 = arith.divf %13, %14 : vector<32x1xf32>
    %16 = vector.broadcast %8 : vector<32x1xf32> to vector<32x128xf32>
    %17 = arith.subf %0, %16 : vector<32x128xf32>
    %cst_10 = arith.constant 9.99999974E-6 : f32
    %18 = vector.broadcast %cst_10 : f32 to vector<32x1xf32>
    %19 = arith.addf %15, %18 : vector<32x1xf32>
    %20 = math.rsqrt %19 : vector<32x1xf32>
    %21 = vector.broadcast %20 : vector<32x1xf32> to vector<32x128xf32>
    %22 = arith.mulf %17, %21 : vector<32x128xf32>
    %23 = vector.broadcast %2 : vector<1x128xf32> to vector<32x128xf32>
    %24 = arith.mulf %22, %23 : vector<32x128xf32>
    %25 = vector.broadcast %4 : vector<1x128xf32> to vector<32x128xf32>
    %26 = arith.addf %24, %25 : vector<32x128xf32>
    %27 = arith.truncf %26 : vector<32x128xf32> to vector<32x128xbf16>
    %c0_11 = arith.constant 0 : index
    %c0_12 = arith.constant 0 : index
    %c0_13 = arith.constant 0 : index
    %28 = vector.load %arg3[%c0_11, %c0_12, %c0_13] : memref<2x128x384xbf16, #tpu.memory_space<vmem>>, vector<1x128x384xbf16>
    %29 = vector.shape_cast %28 : vector<1x128x384xbf16> to vector<128x384xbf16>
    %cst_14 = arith.constant dense<0.000000e+00> : vector<32x384xf32>
    %30 = tpu.matmul %27, %29, %cst_14 {dimension_numbers = #tpu.dot_dimension_numbers<[1], [0], [0], [1], [0, 0, 1, 1], [], []>} : vector<32x128xbf16>, vector<128x384xbf16>, vector<32x384xf32> -> vector<32x384xf32>
    %c0_15 = arith.constant 0 : index
    %c0_16 = arith.constant 0 : index
    %c0_17 = arith.constant 0 : index
    %31 = vector.load %arg4[%c0_15, %c0_16, %c0_17] : memref<2x1x384xf32, #tpu.memory_space<vmem>>, vector<1x1x384xf32>
    %32 = vector.shape_cast %31 : vector<1x1x384xf32> to vector<1x384xf32>
    %33 = vector.broadcast %32 : vector<1x384xf32> to vector<32x384xf32>
    %34 = arith.addf %30, %33 : vector<32x384xf32>
    %35 = vector.extract_strided_slice %34 {offsets = [0, 0], sizes = [32, 128], strides = [1, 1]} : vector<32x384xf32> to vector<32x128xf32>
    %36 = vector.extract_strided_slice %34 {offsets = [0, 128], sizes = [32, 128], strides = [1, 1]} : vector<32x384xf32> to vector<32x128xf32>
    %37 = vector.extract_strided_slice %34 {offsets = [0, 256], sizes = [32, 128], strides = [1, 1]} : vector<32x384xf32> to vector<32x128xf32>
    %38 = vector.extract_strided_slice %35 {offsets = [0, 0], sizes = [16, 32], strides = [1, 1]} : vector<32x128xf32> to vector<16x32xf32>
    %39 = vector.extract_strided_slice %36 {offsets = [0, 0], sizes = [16, 32], strides = [1, 1]} : vector<32x128xf32> to vector<16x32xf32>
    %40 = vector.extract_strided_slice %37 {offsets = [0, 0], sizes = [16, 32], strides = [1, 1]} : vector<32x128xf32> to vector<16x32xf32>
    %cst_18 = arith.constant dense<0.000000e+00> : vector<16x16xf32>
    %41 = tpu.matmul %38, %39, %cst_18 {dimension_numbers = #tpu.dot_dimension_numbers<[1], [1], [0], [0], [0, 0, 1, 0], [], []>} : vector<16x32xf32>, vector<16x32xf32>, vector<16x16xf32> -> vector<16x16xf32>
    %cst_19 = arith.constant dense<0xFF800000> : vector<16xf32>
    %42 = vector.multi_reduction <maximumf>, %41, %cst_19 [1] : vector<16x16xf32> to vector<16xf32>
    %43 = vector.shape_cast %42 : vector<16xf32> to vector<16x1xf32>
    %44 = vector.broadcast %43 : vector<16x1xf32> to vector<16x16xf32>
    %45 = arith.subf %41, %44 : vector<16x16xf32>
    %46 = math.exp %45 : vector<16x16xf32>
    %cst_20 = arith.constant dense<0.000000e+00> : vector<16xf32>
    %47 = vector.multi_reduction <add>, %46, %cst_20 [1] : vector<16x16xf32> to vector<16xf32>
    %48 = vector.shape_cast %47 : vector<16xf32> to vector<16x1xf32>
    %49 = tpu.reciprocal %48 {approx = true} : vector<16x1xf32> -> vector<16x1xf32>
    %50 = vector.broadcast %49 : vector<16x1xf32> to vector<16x16xf32>
    %51 = arith.mulf %46, %50 : vector<16x16xf32>
    %52 = arith.truncf %51 : vector<16x16xf32> to vector<16x16xbf16>
    %53 = arith.truncf %40 : vector<16x32xf32> to vector<16x32xbf16>
    %cst_21 = arith.constant dense<0.000000e+00> : vector<16x32xf32>
    %54 = tpu.matmul %52, %53, %cst_21 {dimension_numbers = #tpu.dot_dimension_numbers<[1], [0], [0], [1], [0, 0, 1, 1], [], []>} : vector<16x16xbf16>, vector<16x32xbf16>, vector<16x32xf32> -> vector<16x32xf32>
    %c0_22 = arith.constant 0 : index
    %c0_23 = arith.constant 0 : index
    %55 = vector.load %arg16[%c0_22, %c0_23] : memref<32x128xf32, #tpu.memory_space<vmem>>, vector<16x32xf32>
    tpu.vector_store %arg16[%c0_22, %c0_23], %54 {strides = array<i32>} : memref<32x128xf32, #tpu.memory_space<vmem>>, vector<16x32xf32>,
    %56 = vector.extract_strided_slice %35 {offsets = [0, 32], sizes = [16, 32], strides = [1, 1]} : vector<32x128xf32> to vector<16x32xf32>
    %57 = vector.extract_strided_slice %36 {offsets = [0, 32], sizes = [16, 32], strides = [1, 1]} : vector<32x128xf32> to vector<16x32xf32>
    %58 = vector.extract_strided_slice %37 {offsets = [0, 32], sizes = [16, 32], strides = [1, 1]} : vector<32x128xf32> to vector<16x32xf32>
    %cst_24 = arith.constant dense<0.000000e+00> : vector<16x16xf32>
    %59 = tpu.matmul %56, %57, %cst_24 {dimension_numbers = #tpu.dot_dimension_numbers<[1], [1], [0], [0], [0, 0, 1, 0], [], []>} : vector<16x32xf32>, vector<16x32xf32>, vector<16x16xf32> -> vector<16x16xf32>
    %cst_25 = arith.constant dense<0xFF800000> : vector<16xf32>
    %60 = vector.multi_reduction <maximumf>, %59, %cst_25 [1] : vector<16x16xf32> to vector<16xf32>
    %61 = vector.shape_cast %60 : vector<16xf32> to vector<16x1xf32>
    %62 = vector.broadcast %61 : vector<16x1xf32> to vector<16x16xf32>
    %63 = arith.subf %59, %62 : vector<16x16xf32>
    %64 = math.exp %63 : vector<16x16xf32>
    %cst_26 = arith.constant dense<0.000000e+00> : vector<16xf32>
    %65 = vector.multi_reduction <add>, %64, %cst_26 [1] : vector<16x16xf32> to vector<16xf32>
    %66 = vector.shape_cast %65 : vector<16xf32> to vector<16x1xf32>
    %67 = tpu.reciprocal %66 {approx = true} : vector<16x1xf32> -> vector<16x1xf32>
    %68 = vector.broadcast %67 : vector<16x1xf32> to vector<16x16xf32>
    %69 = arith.mulf %64, %68 : vector<16x16xf32>
    %70 = arith.truncf %69 : vector<16x16xf32> to vector<16x16xbf16>
    %71 = arith.truncf %58 : vector<16x32xf32> to vector<16x32xbf16>
    %cst_27 = arith.constant dense<0.000000e+00> : vector<16x32xf32>
    %72 = tpu.matmul %70, %71, %cst_27 {dimension_numbers = #tpu.dot_dimension_numbers<[1], [0], [0], [1], [0, 0, 1, 1], [], []>} : vector<16x16xbf16>, vector<16x32xbf16>, vector<16x32xf32> -> vector<16x32xf32>
    %c0_28 = arith.constant 0 : index
    %c32 = arith.constant 32 : index
    %73 = vector.load %arg16[%c0_28, %c32] : memref<32x128xf32, #tpu.memory_space<vmem>>, vector<16x32xf32>
    tpu.vector_store %arg16[%c0_28, %c32], %72 {strides = array<i32>} : memref<32x128xf32, #tpu.memory_space<vmem>>, vector<16x32xf32>,
    %74 = vector.extract_strided_slice %35 {offsets = [0, 64], sizes = [16, 32], strides = [1, 1]} : vector<32x128xf32> to vector<16x32xf32>
    %75 = vector.extract_strided_slice %36 {offsets = [0, 64], sizes = [16, 32], strides = [1, 1]} : vector<32x128xf32> to vector<16x32xf32>
    %76 = vector.extract_strided_slice %37 {offsets = [0, 64], sizes = [16, 32], strides = [1, 1]} : vector<32x128xf32> to vector<16x32xf32>
    %cst_29 = arith.constant dense<0.000000e+00> : vector<16x16xf32>
    %77 = tpu.matmul %74, %75, %cst_29 {dimension_numbers = #tpu.dot_dimension_numbers<[1], [1], [0], [0], [0, 0, 1, 0], [], []>} : vector<16x32xf32>, vector<16x32xf32>, vector<16x16xf32> -> vector<16x16xf32>
    %cst_30 = arith.constant dense<0xFF800000> : vector<16xf32>
    %78 = vector.multi_reduction <maximumf>, %77, %cst_30 [1] : vector<16x16xf32> to vector<16xf32>
    %79 = vector.shape_cast %78 : vector<16xf32> to vector<16x1xf32>
    %80 = vector.broadcast %79 : vector<16x1xf32> to vector<16x16xf32>
    %81 = arith.subf %77, %80 : vector<16x16xf32>
    %82 = math.exp %81 : vector<16x16xf32>
    %cst_31 = arith.constant dense<0.000000e+00> : vector<16xf32>
    %83 = vector.multi_reduction <add>, %82, %cst_31 [1] : vector<16x16xf32> to vector<16xf32>
    %84 = vector.shape_cast %83 : vector<16xf32> to vector<16x1xf32>
    %85 = tpu.reciprocal %84 {approx = true} : vector<16x1xf32> -> vector<16x1xf32>
    %86 = vector.broadcast %85 : vector<16x1xf32> to vector<16x16xf32>
    %87 = arith.mulf %82, %86 : vector<16x16xf32>
    %88 = arith.truncf %87 : vector<16x16xf32> to vector<16x16xbf16>
    %89 = arith.truncf %76 : vector<16x32xf32> to vector<16x32xbf16>
    %cst_32 = arith.constant dense<0.000000e+00> : vector<16x32xf32>
    %90 = tpu.matmul %88, %89, %cst_32 {dimension_numbers = #tpu.dot_dimension_numbers<[1], [0], [0], [1], [0, 0, 1, 1], [], []>} : vector<16x16xbf16>, vector<16x32xbf16>, vector<16x32xf32> -> vector<16x32xf32>
    %c0_33 = arith.constant 0 : index
    %c64 = arith.constant 64 : index
    %91 = vector.load %arg16[%c0_33, %c64] : memref<32x128xf32, #tpu.memory_space<vmem>>, vector<16x32xf32>
    tpu.vector_store %arg16[%c0_33, %c64], %90 {strides = array<i32>} : memref<32x128xf32, #tpu.memory_space<vmem>>, vector<16x32xf32>,
    %92 = vector.extract_strided_slice %35 {offsets = [0, 96], sizes = [16, 32], strides = [1, 1]} : vector<32x128xf32> to vector<16x32xf32>
    %93 = vector.extract_strided_slice %36 {offsets = [0, 96], sizes = [16, 32], strides = [1, 1]} : vector<32x128xf32> to vector<16x32xf32>
    %94 = vector.extract_strided_slice %37 {offsets = [0, 96], sizes = [16, 32], strides = [1, 1]} : vector<32x128xf32> to vector<16x32xf32>
    %cst_34 = arith.constant dense<0.000000e+00> : vector<16x16xf32>
    %95 = tpu.matmul %92, %93, %cst_34 {dimension_numbers = #tpu.dot_dimension_numbers<[1], [1], [0], [0], [0, 0, 1, 0], [], []>} : vector<16x32xf32>, vector<16x32xf32>, vector<16x16xf32> -> vector<16x16xf32>
    %cst_35 = arith.constant dense<0xFF800000> : vector<16xf32>
    %96 = vector.multi_reduction <maximumf>, %95, %cst_35 [1] : vector<16x16xf32> to vector<16xf32>
    %97 = vector.shape_cast %96 : vector<16xf32> to vector<16x1xf32>
    %98 = vector.broadcast %97 : vector<16x1xf32> to vector<16x16xf32>
    %99 = arith.subf %95, %98 : vector<16x16xf32>
    %100 = math.exp %99 : vector<16x16xf32>
    %cst_36 = arith.constant dense<0.000000e+00> : vector<16xf32>
    %101 = vector.multi_reduction <add>, %100, %cst_36 [1] : vector<16x16xf32> to vector<16xf32>
    %102 = vector.shape_cast %101 : vector<16xf32> to vector<16x1xf32>
    %103 = tpu.reciprocal %102 {approx = true} : vector<16x1xf32> -> vector<16x1xf32>
    %104 = vector.broadcast %103 : vector<16x1xf32> to vector<16x16xf32>
    %105 = arith.mulf %100, %104 : vector<16x16xf32>
    %106 = arith.truncf %105 : vector<16x16xf32> to vector<16x16xbf16>
    %107 = arith.truncf %94 : vector<16x32xf32> to vector<16x32xbf16>
    %cst_37 = arith.constant dense<0.000000e+00> : vector<16x32xf32>
    %108 = tpu.matmul %106, %107, %cst_37 {dimension_numbers = #tpu.dot_dimension_numbers<[1], [0], [0], [1], [0, 0, 1, 1], [], []>} : vector<16x16xbf16>, vector<16x32xbf16>, vector<16x32xf32> -> vector<16x32xf32>
    %c0_38 = arith.constant 0 : index
    %c96 = arith.constant 96 : index
    %109 = vector.load %arg16[%c0_38, %c96] : memref<32x128xf32, #tpu.memory_space<vmem>>, vector<16x32xf32>
    tpu.vector_store %arg16[%c0_38, %c96], %108 {strides = array<i32>} : memref<32x128xf32, #tpu.memory_space<vmem>>, vector<16x32xf32>,
    %110 = vector.extract_strided_slice %35 {offsets = [16, 0], sizes = [16, 32], strides = [1, 1]} : vector<32x128xf32> to vector<16x32xf32>
    %111 = vector.extract_strided_slice %36 {offsets = [16, 0], sizes = [16, 32], strides = [1, 1]} : vector<32x128xf32> to vector<16x32xf32>
    %112 = vector.extract_strided_slice %37 {offsets = [16, 0], sizes = [16, 32], strides = [1, 1]} : vector<32x128xf32> to vector<16x32xf32>
    %cst_39 = arith.constant dense<0.000000e+00> : vector<16x16xf32>
    %113 = tpu.matmul %110, %111, %cst_39 {dimension_numbers = #tpu.dot_dimension_numbers<[1], [1], [0], [0], [0, 0, 1, 0], [], []>} : vector<16x32xf32>, vector<16x32xf32>, vector<16x16xf32> -> vector<16x16xf32>
    %cst_40 = arith.constant dense<0xFF800000> : vector<16xf32>
    %114 = vector.multi_reduction <maximumf>, %113, %cst_40 [1] : vector<16x16xf32> to vector<16xf32>
    %115 = vector.shape_cast %114 : vector<16xf32> to vector<16x1xf32>
    %116 = vector.broadcast %115 : vector<16x1xf32> to vector<16x16xf32>
    %117 = arith.subf %113, %116 : vector<16x16xf32>
    %118 = math.exp %117 : vector<16x16xf32>
    %cst_41 = arith.constant dense<0.000000e+00> : vector<16xf32>
    %119 = vector.multi_reduction <add>, %118, %cst_41 [1] : vector<16x16xf32> to vector<16xf32>
    %120 = vector.shape_cast %119 : vector<16xf32> to vector<16x1xf32>
    %121 = tpu.reciprocal %120 {approx = true} : vector<16x1xf32> -> vector<16x1xf32>
    %122 = vector.broadcast %121 : vector<16x1xf32> to vector<16x16xf32>
    %123 = arith.mulf %118, %122 : vector<16x16xf32>
    %124 = arith.truncf %123 : vector<16x16xf32> to vector<16x16xbf16>
    %125 = arith.truncf %112 : vector<16x32xf32> to vector<16x32xbf16>
    %cst_42 = arith.constant dense<0.000000e+00> : vector<16x32xf32>
    %126 = tpu.matmul %124, %125, %cst_42 {dimension_numbers = #tpu.dot_dimension_numbers<[1], [0], [0], [1], [0, 0, 1, 1], [], []>} : vector<16x16xbf16>, vector<16x32xbf16>, vector<16x32xf32> -> vector<16x32xf32>
    %c16 = arith.constant 16 : index
    %c0_43 = arith.constant 0 : index
    %127 = vector.load %arg16[%c16, %c0_43] : memref<32x128xf32, #tpu.memory_space<vmem>>, vector<16x32xf32>
    tpu.vector_store %arg16[%c16, %c0_43], %126 {strides = array<i32>} : memref<32x128xf32, #tpu.memory_space<vmem>>, vector<16x32xf32>,
    %128 = vector.extract_strided_slice %35 {offsets = [16, 32], sizes = [16, 32], strides = [1, 1]} : vector<32x128xf32> to vector<16x32xf32>
    %129 = vector.extract_strided_slice %36 {offsets = [16, 32], sizes = [16, 32], strides = [1, 1]} : vector<32x128xf32> to vector<16x32xf32>
    %130 = vector.extract_strided_slice %37 {offsets = [16, 32], sizes = [16, 32], strides = [1, 1]} : vector<32x128xf32> to vector<16x32xf32>
    %cst_44 = arith.constant dense<0.000000e+00> : vector<16x16xf32>
    %131 = tpu.matmul %128, %129, %cst_44 {dimension_numbers = #tpu.dot_dimension_numbers<[1], [1], [0], [0], [0, 0, 1, 0], [], []>} : vector<16x32xf32>, vector<16x32xf32>, vector<16x16xf32> -> vector<16x16xf32>
    %cst_45 = arith.constant dense<0xFF800000> : vector<16xf32>
    %132 = vector.multi_reduction <maximumf>, %131, %cst_45 [1] : vector<16x16xf32> to vector<16xf32>
    %133 = vector.shape_cast %132 : vector<16xf32> to vector<16x1xf32>
    %134 = vector.broadcast %133 : vector<16x1xf32> to vector<16x16xf32>
    %135 = arith.subf %131, %134 : vector<16x16xf32>
    %136 = math.exp %135 : vector<16x16xf32>
    %cst_46 = arith.constant dense<0.000000e+00> : vector<16xf32>
    %137 = vector.multi_reduction <add>, %136, %cst_46 [1] : vector<16x16xf32> to vector<16xf32>
    %138 = vector.shape_cast %137 : vector<16xf32> to vector<16x1xf32>
    %139 = tpu.reciprocal %138 {approx = true} : vector<16x1xf32> -> vector<16x1xf32>
    %140 = vector.broadcast %139 : vector<16x1xf32> to vector<16x16xf32>
    %141 = arith.mulf %136, %140 : vector<16x16xf32>
    %142 = arith.truncf %141 : vector<16x16xf32> to vector<16x16xbf16>
    %143 = arith.truncf %130 : vector<16x32xf32> to vector<16x32xbf16>
    %cst_47 = arith.constant dense<0.000000e+00> : vector<16x32xf32>
    %144 = tpu.matmul %142, %143, %cst_47 {dimension_numbers = #tpu.dot_dimension_numbers<[1], [0], [0], [1], [0, 0, 1, 1], [], []>} : vector<16x16xbf16>, vector<16x32xbf16>, vector<16x32xf32> -> vector<16x32xf32>
    %c16_48 = arith.constant 16 : index
    %c32_49 = arith.constant 32 : index
    %145 = vector.load %arg16[%c16_48, %c32_49] : memref<32x128xf32, #tpu.memory_space<vmem>>, vector<16x32xf32>
    tpu.vector_store %arg16[%c16_48, %c32_49], %144 {strides = array<i32>} : memref<32x128xf32, #tpu.memory_space<vmem>>, vector<16x32xf32>,
    %146 = vector.extract_strided_slice %35 {offsets = [16, 64], sizes = [16, 32], strides = [1, 1]} : vector<32x128xf32> to vector<16x32xf32>
    %147 = vector.extract_strided_slice %36 {offsets = [16, 64], sizes = [16, 32], strides = [1, 1]} : vector<32x128xf32> to vector<16x32xf32>
    %148 = vector.extract_strided_slice %37 {offsets = [16, 64], sizes = [16, 32], strides = [1, 1]} : vector<32x128xf32> to vector<16x32xf32>
    %cst_50 = arith.constant dense<0.000000e+00> : vector<16x16xf32>
    %149 = tpu.matmul %146, %147, %cst_50 {dimension_numbers = #tpu.dot_dimension_numbers<[1], [1], [0], [0], [0, 0, 1, 0], [], []>} : vector<16x32xf32>, vector<16x32xf32>, vector<16x16xf32> -> vector<16x16xf32>
    %cst_51 = arith.constant dense<0xFF800000> : vector<16xf32>
    %150 = vector.multi_reduction <maximumf>, %149, %cst_51 [1] : vector<16x16xf32> to vector<16xf32>
    %151 = vector.shape_cast %150 : vector<16xf32> to vector<16x1xf32>
    %152 = vector.broadcast %151 : vector<16x1xf32> to vector<16x16xf32>
    %153 = arith.subf %149, %152 : vector<16x16xf32>
    %154 = math.exp %153 : vector<16x16xf32>
    %cst_52 = arith.constant dense<0.000000e+00> : vector<16xf32>
    %155 = vector.multi_reduction <add>, %154, %cst_52 [1] : vector<16x16xf32> to vector<16xf32>
    %156 = vector.shape_cast %155 : vector<16xf32> to vector<16x1xf32>
    %157 = tpu.reciprocal %156 {approx = true} : vector<16x1xf32> -> vector<16x1xf32>
    %158 = vector.broadcast %157 : vector<16x1xf32> to vector<16x16xf32>
    %159 = arith.mulf %154, %158 : vector<16x16xf32>
    %160 = arith.truncf %159 : vector<16x16xf32> to vector<16x16xbf16>
    %161 = arith.truncf %148 : vector<16x32xf32> to vector<16x32xbf16>
    %cst_53 = arith.constant dense<0.000000e+00> : vector<16x32xf32>
    %162 = tpu.matmul %160, %161, %cst_53 {dimension_numbers = #tpu.dot_dimension_numbers<[1], [0], [0], [1], [0, 0, 1, 1], [], []>} : vector<16x16xbf16>, vector<16x32xbf16>, vector<16x32xf32> -> vector<16x32xf32>
    %c16_54 = arith.constant 16 : index
    %c64_55 = arith.constant 64 : index
    %163 = vector.load %arg16[%c16_54, %c64_55] : memref<32x128xf32, #tpu.memory_space<vmem>>, vector<16x32xf32>
    tpu.vector_store %arg16[%c16_54, %c64_55], %162 {strides = array<i32>} : memref<32x128xf32, #tpu.memory_space<vmem>>, vector<16x32xf32>,
    %164 = vector.extract_strided_slice %35 {offsets = [16, 96], sizes = [16, 32], strides = [1, 1]} : vector<32x128xf32> to vector<16x32xf32>
    %165 = vector.extract_strided_slice %36 {offsets = [16, 96], sizes = [16, 32], strides = [1, 1]} : vector<32x128xf32> to vector<16x32xf32>
    %166 = vector.extract_strided_slice %37 {offsets = [16, 96], sizes = [16, 32], strides = [1, 1]} : vector<32x128xf32> to vector<16x32xf32>
    %cst_56 = arith.constant dense<0.000000e+00> : vector<16x16xf32>
    %167 = tpu.matmul %164, %165, %cst_56 {dimension_numbers = #tpu.dot_dimension_numbers<[1], [1], [0], [0], [0, 0, 1, 0], [], []>} : vector<16x32xf32>, vector<16x32xf32>, vector<16x16xf32> -> vector<16x16xf32>
    %cst_57 = arith.constant dense<0xFF800000> : vector<16xf32>
    %168 = vector.multi_reduction <maximumf>, %167, %cst_57 [1] : vector<16x16xf32> to vector<16xf32>
    %169 = vector.shape_cast %168 : vector<16xf32> to vector<16x1xf32>
    %170 = vector.broadcast %169 : vector<16x1xf32> to vector<16x16xf32>
    %171 = arith.subf %167, %170 : vector<16x16xf32>
    %172 = math.exp %171 : vector<16x16xf32>
    %cst_58 = arith.constant dense<0.000000e+00> : vector<16xf32>
    %173 = vector.multi_reduction <add>, %172, %cst_58 [1] : vector<16x16xf32> to vector<16xf32>
    %174 = vector.shape_cast %173 : vector<16xf32> to vector<16x1xf32>
    %175 = tpu.reciprocal %174 {approx = true} : vector<16x1xf32> -> vector<16x1xf32>
    %176 = vector.broadcast %175 : vector<16x1xf32> to vector<16x16xf32>
    %177 = arith.mulf %172, %176 : vector<16x16xf32>
    %178 = arith.truncf %177 : vector<16x16xf32> to vector<16x16xbf16>
    %179 = arith.truncf %166 : vector<16x32xf32> to vector<16x32xbf16>
    %cst_59 = arith.constant dense<0.000000e+00> : vector<16x32xf32>
    %180 = tpu.matmul %178, %179, %cst_59 {dimension_numbers = #tpu.dot_dimension_numbers<[1], [0], [0], [1], [0, 0, 1, 1], [], []>} : vector<16x16xbf16>, vector<16x32xbf16>, vector<16x32xf32> -> vector<16x32xf32>
    %c16_60 = arith.constant 16 : index
    %c96_61 = arith.constant 96 : index
    %181 = vector.load %arg16[%c16_60, %c96_61] : memref<32x128xf32, #tpu.memory_space<vmem>>, vector<16x32xf32>
    tpu.vector_store %arg16[%c16_60, %c96_61], %180 {strides = array<i32>} : memref<32x128xf32, #tpu.memory_space<vmem>>, vector<16x32xf32>,
    %c0_62 = arith.constant 0 : index
    %c0_63 = arith.constant 0 : index
    %182 = vector.load %arg16[%c0_62, %c0_63] : memref<32x128xf32, #tpu.memory_space<vmem>>, vector<32x128xf32>
    %183 = arith.truncf %182 : vector<32x128xf32> to vector<32x128xbf16>
    %c0_64 = arith.constant 0 : index
    %c0_65 = arith.constant 0 : index
    %c0_66 = arith.constant 0 : index
    %184 = vector.load %arg5[%c0_64, %c0_65, %c0_66] : memref<2x128x128xbf16, #tpu.memory_space<vmem>>, vector<1x128x128xbf16>
    %185 = vector.shape_cast %184 : vector<1x128x128xbf16> to vector<128x128xbf16>
    %cst_67 = arith.constant dense<0.000000e+00> : vector<32x128xf32>
    %186 = tpu.matmul %183, %185, %cst_67 {dimension_numbers = #tpu.dot_dimension_numbers<[1], [0], [0], [1], [0, 0, 1, 1], [], []>} : vector<32x128xbf16>, vector<128x128xbf16>, vector<32x128xf32> -> vector<32x128xf32>
    %187 = arith.addf %0, %186 : vector<32x128xf32>
    %c0_68 = arith.constant 0 : index
    %c0_69 = arith.constant 0 : index
    %c0_70 = arith.constant 0 : index
    %188 = vector.load %arg6[%c0_68, %c0_69, %c0_70] : memref<2x1x128xf32, #tpu.memory_space<vmem>>, vector<1x1x128xf32>
    %189 = vector.shape_cast %188 : vector<1x1x128xf32> to vector<1x128xf32>
    %190 = vector.broadcast %189 : vector<1x128xf32> to vector<32x128xf32>
    %191 = arith.addf %187, %190 : vector<32x128xf32>
    %c0_71 = arith.constant 0 : index
    %c0_72 = arith.constant 0 : index
    %c0_73 = arith.constant 0 : index
    %192 = vector.load %arg7[%c0_71, %c0_72, %c0_73] : memref<2x1x128xf32, #tpu.memory_space<vmem>>, vector<1x1x128xf32>
    %193 = vector.shape_cast %192 : vector<1x1x128xf32> to vector<1x128xf32>
    %c0_74 = arith.constant 0 : index
    %c0_75 = arith.constant 0 : index
    %c0_76 = arith.constant 0 : index
    %194 = vector.load %arg8[%c0_74, %c0_75, %c0_76] : memref<2x1x128xf32, #tpu.memory_space<vmem>>, vector<1x1x128xf32>
    %195 = vector.shape_cast %194 : vector<1x1x128xf32> to vector<1x128xf32>
    %cst_77 = arith.constant dense<0.000000e+00> : vector<32xf32>
    %196 = vector.multi_reduction <add>, %191, %cst_77 [1] : vector<32x128xf32> to vector<32xf32>
    %197 = vector.shape_cast %196 : vector<32xf32> to vector<32x1xf32>
    %cst_78 = arith.constant 1.280000e+02 : f32
    %198 = vector.broadcast %cst_78 : f32 to vector<32x1xf32>
    %199 = arith.divf %197, %198 : vector<32x1xf32>
    %200 = vector.broadcast %199 : vector<32x1xf32> to vector<32x128xf32>
    %201 = arith.subf %191, %200 : vector<32x128xf32>
    %202 = arith.mulf %201, %201 : vector<32x128xf32>
    %cst_79 = arith.constant dense<0.000000e+00> : vector<32xf32>
    %203 = vector.multi_reduction <add>, %202, %cst_79 [1] : vector<32x128xf32> to vector<32xf32>
    %204 = vector.shape_cast %203 : vector<32xf32> to vector<32x1xf32>
    %cst_80 = arith.constant 1.280000e+02 : f32
    %205 = vector.broadcast %cst_80 : f32 to vector<32x1xf32>
    %206 = arith.divf %204, %205 : vector<32x1xf32>
    %207 = vector.broadcast %199 : vector<32x1xf32> to vector<32x128xf32>
    %208 = arith.subf %191, %207 : vector<32x128xf32>
    %cst_81 = arith.constant 9.99999974E-6 : f32
    %209 = vector.broadcast %cst_81 : f32 to vector<32x1xf32>
    %210 = arith.addf %206, %209 : vector<32x1xf32>
    %211 = math.rsqrt %210 : vector<32x1xf32>
    %212 = vector.broadcast %211 : vector<32x1xf32> to vector<32x128xf32>
    %213 = arith.mulf %208, %212 : vector<32x128xf32>
    %214 = vector.broadcast %193 : vector<1x128xf32> to vector<32x128xf32>
    %215 = arith.mulf %213, %214 : vector<32x128xf32>
    %216 = vector.broadcast %195 : vector<1x128xf32> to vector<32x128xf32>
    %217 = arith.addf %215, %216 : vector<32x128xf32>
    %218 = arith.truncf %217 : vector<32x128xf32> to vector<32x128xbf16>
    %c0_82 = arith.constant 0 : index
    %c0_83 = arith.constant 0 : index
    %c0_84 = arith.constant 0 : index
    %219 = vector.load %arg9[%c0_82, %c0_83, %c0_84] : memref<2x128x256xbf16, #tpu.memory_space<vmem>>, vector<1x128x256xbf16>
    %220 = vector.shape_cast %219 : vector<1x128x256xbf16> to vector<128x256xbf16>
    %cst_85 = arith.constant dense<0.000000e+00> : vector<32x256xf32>
    %221 = tpu.matmul %218, %220, %cst_85 {dimension_numbers = #tpu.dot_dimension_numbers<[1], [0], [0], [1], [0, 0, 1, 1], [], []>} : vector<32x128xbf16>, vector<128x256xbf16>, vector<32x256xf32> -> vector<32x256xf32>
    %c0_86 = arith.constant 0 : index
    %c0_87 = arith.constant 0 : index
    %c0_88 = arith.constant 0 : index
    %222 = vector.load %arg10[%c0_86, %c0_87, %c0_88] : memref<2x1x256xf32, #tpu.memory_space<vmem>>, vector<1x1x256xf32>
    %223 = vector.shape_cast %222 : vector<1x1x256xf32> to vector<1x256xf32>
    %224 = vector.broadcast %223 : vector<1x256xf32> to vector<32x256xf32>
    %225 = arith.addf %221, %224 : vector<32x256xf32>
    %cst_89 = arith.constant 0.000000e+00 : f32
    %226 = vector.broadcast %cst_89 : f32 to vector<32x256xf32>
    %227 = arith.maximumf %225, %226 : vector<32x256xf32>
    %228 = arith.truncf %227 : vector<32x256xf32> to vector<32x256xbf16>
    %c0_90 = arith.constant 0 : index
    %c0_91 = arith.constant 0 : index
    %c0_92 = arith.constant 0 : index
    %229 = vector.load %arg11[%c0_90, %c0_91, %c0_92] : memref<2x256x128xbf16, #tpu.memory_space<vmem>>, vector<1x256x128xbf16>
    %230 = vector.shape_cast %229 : vector<1x256x128xbf16> to vector<256x128xbf16>
    %cst_93 = arith.constant dense<0.000000e+00> : vector<32x128xf32>
    %231 = tpu.matmul %228, %230, %cst_93 {dimension_numbers = #tpu.dot_dimension_numbers<[1], [0], [0], [1], [0, 0, 1, 1], [], []>} : vector<32x256xbf16>, vector<256x128xbf16>, vector<32x128xf32> -> vector<32x128xf32>
    %232 = arith.addf %191, %231 : vector<32x128xf32>
    %c0_94 = arith.constant 0 : index
    %c0_95 = arith.constant 0 : index
    %c0_96 = arith.constant 0 : index
    %233 = vector.load %arg12[%c0_94, %c0_95, %c0_96] : memref<2x1x128xf32, #tpu.memory_space<vmem>>, vector<1x1x128xf32>
    %234 = vector.shape_cast %233 : vector<1x1x128xf32> to vector<1x128xf32>
    %235 = vector.broadcast %234 : vector<1x128xf32> to vector<32x128xf32>
    %236 = arith.addf %232, %235 : vector<32x128xf32>
    %c1 = arith.constant 1 : index
    %c0_97 = arith.constant 0 : index
    %c0_98 = arith.constant 0 : index
    %237 = vector.load %arg1[%c1, %c0_97, %c0_98] : memref<2x1x128xf32, #tpu.memory_space<vmem>>, vector<1x1x128xf32>
    %238 = vector.shape_cast %237 : vector<1x1x128xf32> to vector<1x128xf32>
    %c1_99 = arith.constant 1 : index
    %c0_100 = arith.constant 0 : index
    %c0_101 = arith.constant 0 : index
    %239 = vector.load %arg2[%c1_99, %c0_100, %c0_101] : memref<2x1x128xf32, #tpu.memory_space<vmem>>, vector<1x1x128xf32>
    %240 = vector.shape_cast %239 : vector<1x1x128xf32> to vector<1x128xf32>
    %cst_102 = arith.constant dense<0.000000e+00> : vector<32xf32>
    %241 = vector.multi_reduction <add>, %236, %cst_102 [1] : vector<32x128xf32> to vector<32xf32>
    %242 = vector.shape_cast %241 : vector<32xf32> to vector<32x1xf32>
    %cst_103 = arith.constant 1.280000e+02 : f32
    %243 = vector.broadcast %cst_103 : f32 to vector<32x1xf32>
    %244 = arith.divf %242, %243 : vector<32x1xf32>
    %245 = vector.broadcast %244 : vector<32x1xf32> to vector<32x128xf32>
    %246 = arith.subf %236, %245 : vector<32x128xf32>
    %247 = arith.mulf %246, %246 : vector<32x128xf32>
    %cst_104 = arith.constant dense<0.000000e+00> : vector<32xf32>
    %248 = vector.multi_reduction <add>, %247, %cst_104 [1] : vector<32x128xf32> to vector<32xf32>
    %249 = vector.shape_cast %248 : vector<32xf32> to vector<32x1xf32>
    %cst_105 = arith.constant 1.280000e+02 : f32
    %250 = vector.broadcast %cst_105 : f32 to vector<32x1xf32>
    %251 = arith.divf %249, %250 : vector<32x1xf32>
    %252 = vector.broadcast %244 : vector<32x1xf32> to vector<32x128xf32>
    %253 = arith.subf %236, %252 : vector<32x128xf32>
    %cst_106 = arith.constant 9.99999974E-6 : f32
    %254 = vector.broadcast %cst_106 : f32 to vector<32x1xf32>
    %255 = arith.addf %251, %254 : vector<32x1xf32>
    %256 = math.rsqrt %255 : vector<32x1xf32>
    %257 = vector.broadcast %256 : vector<32x1xf32> to vector<32x128xf32>
    %258 = arith.mulf %253, %257 : vector<32x128xf32>
    %259 = vector.broadcast %238 : vector<1x128xf32> to vector<32x128xf32>
    %260 = arith.mulf %258, %259 : vector<32x128xf32>
    %261 = vector.broadcast %240 : vector<1x128xf32> to vector<32x128xf32>
    %262 = arith.addf %260, %261 : vector<32x128xf32>
    %263 = arith.truncf %262 : vector<32x128xf32> to vector<32x128xbf16>
    %c1_107 = arith.constant 1 : index
    %c0_108 = arith.constant 0 : index
    %c0_109 = arith.constant 0 : index
    %264 = vector.load %arg3[%c1_107, %c0_108, %c0_109] : memref<2x128x384xbf16, #tpu.memory_space<vmem>>, vector<1x128x384xbf16>
    %265 = vector.shape_cast %264 : vector<1x128x384xbf16> to vector<128x384xbf16>
    %cst_110 = arith.constant dense<0.000000e+00> : vector<32x384xf32>
    %266 = tpu.matmul %263, %265, %cst_110 {dimension_numbers = #tpu.dot_dimension_numbers<[1], [0], [0], [1], [0, 0, 1, 1], [], []>} : vector<32x128xbf16>, vector<128x384xbf16>, vector<32x384xf32> -> vector<32x384xf32>
    %c1_111 = arith.constant 1 : index
    %c0_112 = arith.constant 0 : index
    %c0_113 = arith.constant 0 : index
    %267 = vector.load %arg4[%c1_111, %c0_112, %c0_113] : memref<2x1x384xf32, #tpu.memory_space<vmem>>, vector<1x1x384xf32>
    %268 = vector.shape_cast %267 : vector<1x1x384xf32> to vector<1x384xf32>
    %269 = vector.broadcast %268 : vector<1x384xf32> to vector<32x384xf32>
    %270 = arith.addf %266, %269 : vector<32x384xf32>
    %271 = vector.extract_strided_slice %270 {offsets = [0, 0], sizes = [32, 128], strides = [1, 1]} : vector<32x384xf32> to vector<32x128xf32>
    %272 = vector.extract_strided_slice %270 {offsets = [0, 128], sizes = [32, 128], strides = [1, 1]} : vector<32x384xf32> to vector<32x128xf32>
    %273 = vector.extract_strided_slice %270 {offsets = [0, 256], sizes = [32, 128], strides = [1, 1]} : vector<32x384xf32> to vector<32x128xf32>
    %274 = vector.extract_strided_slice %271 {offsets = [0, 0], sizes = [16, 32], strides = [1, 1]} : vector<32x128xf32> to vector<16x32xf32>
    %275 = vector.extract_strided_slice %272 {offsets = [0, 0], sizes = [16, 32], strides = [1, 1]} : vector<32x128xf32> to vector<16x32xf32>
    %276 = vector.extract_strided_slice %273 {offsets = [0, 0], sizes = [16, 32], strides = [1, 1]} : vector<32x128xf32> to vector<16x32xf32>
    %cst_114 = arith.constant dense<0.000000e+00> : vector<16x16xf32>
    %277 = tpu.matmul %274, %275, %cst_114 {dimension_numbers = #tpu.dot_dimension_numbers<[1], [1], [0], [0], [0, 0, 1, 0], [], []>} : vector<16x32xf32>, vector<16x32xf32>, vector<16x16xf32> -> vector<16x16xf32>
    %cst_115 = arith.constant dense<0xFF800000> : vector<16xf32>
    %278 = vector.multi_reduction <maximumf>, %277, %cst_115 [1] : vector<16x16xf32> to vector<16xf32>
    %279 = vector.shape_cast %278 : vector<16xf32> to vector<16x1xf32>
    %280 = vector.broadcast %279 : vector<16x1xf32> to vector<16x16xf32>
    %281 = arith.subf %277, %280 : vector<16x16xf32>
    %282 = math.exp %281 : vector<16x16xf32>
    %cst_116 = arith.constant dense<0.000000e+00> : vector<16xf32>
    %283 = vector.multi_reduction <add>, %282, %cst_116 [1] : vector<16x16xf32> to vector<16xf32>
    %284 = vector.shape_cast %283 : vector<16xf32> to vector<16x1xf32>
    %285 = tpu.reciprocal %284 {approx = true} : vector<16x1xf32> -> vector<16x1xf32>
    %286 = vector.broadcast %285 : vector<16x1xf32> to vector<16x16xf32>
    %287 = arith.mulf %282, %286 : vector<16x16xf32>
    %288 = arith.truncf %287 : vector<16x16xf32> to vector<16x16xbf16>
    %289 = arith.truncf %276 : vector<16x32xf32> to vector<16x32xbf16>
    %cst_117 = arith.constant dense<0.000000e+00> : vector<16x32xf32>
    %290 = tpu.matmul %288, %289, %cst_117 {dimension_numbers = #tpu.dot_dimension_numbers<[1], [0], [0], [1], [0, 0, 1, 1], [], []>} : vector<16x16xbf16>, vector<16x32xbf16>, vector<16x32xf32> -> vector<16x32xf32>
    %c0_118 = arith.constant 0 : index
    %c0_119 = arith.constant 0 : index
    %291 = vector.load %arg16[%c0_118, %c0_119] : memref<32x128xf32, #tpu.memory_space<vmem>>, vector<16x32xf32>
    tpu.vector_store %arg16[%c0_118, %c0_119], %290 {strides = array<i32>} : memref<32x128xf32, #tpu.memory_space<vmem>>, vector<16x32xf32>,
    %292 = vector.extract_strided_slice %271 {offsets = [0, 32], sizes = [16, 32], strides = [1, 1]} : vector<32x128xf32> to vector<16x32xf32>
    %293 = vector.extract_strided_slice %272 {offsets = [0, 32], sizes = [16, 32], strides = [1, 1]} : vector<32x128xf32> to vector<16x32xf32>
    %294 = vector.extract_strided_slice %273 {offsets = [0, 32], sizes = [16, 32], strides = [1, 1]} : vector<32x128xf32> to vector<16x32xf32>
    %cst_120 = arith.constant dense<0.000000e+00> : vector<16x16xf32>
    %295 = tpu.matmul %292, %293, %cst_120 {dimension_numbers = #tpu.dot_dimension_numbers<[1], [1], [0], [0], [0, 0, 1, 0], [], []>} : vector<16x32xf32>, vector<16x32xf32>, vector<16x16xf32> -> vector<16x16xf32>
    %cst_121 = arith.constant dense<0xFF800000> : vector<16xf32>
    %296 = vector.multi_reduction <maximumf>, %295, %cst_121 [1] : vector<16x16xf32> to vector<16xf32>
    %297 = vector.shape_cast %296 : vector<16xf32> to vector<16x1xf32>
    %298 = vector.broadcast %297 : vector<16x1xf32> to vector<16x16xf32>
    %299 = arith.subf %295, %298 : vector<16x16xf32>
    %300 = math.exp %299 : vector<16x16xf32>
    %cst_122 = arith.constant dense<0.000000e+00> : vector<16xf32>
    %301 = vector.multi_reduction <add>, %300, %cst_122 [1] : vector<16x16xf32> to vector<16xf32>
    %302 = vector.shape_cast %301 : vector<16xf32> to vector<16x1xf32>
    %303 = tpu.reciprocal %302 {approx = true} : vector<16x1xf32> -> vector<16x1xf32>
    %304 = vector.broadcast %303 : vector<16x1xf32> to vector<16x16xf32>
    %305 = arith.mulf %300, %304 : vector<16x16xf32>
    %306 = arith.truncf %305 : vector<16x16xf32> to vector<16x16xbf16>
    %307 = arith.truncf %294 : vector<16x32xf32> to vector<16x32xbf16>
    %cst_123 = arith.constant dense<0.000000e+00> : vector<16x32xf32>
    %308 = tpu.matmul %306, %307, %cst_123 {dimension_numbers = #tpu.dot_dimension_numbers<[1], [0], [0], [1], [0, 0, 1, 1], [], []>} : vector<16x16xbf16>, vector<16x32xbf16>, vector<16x32xf32> -> vector<16x32xf32>
    %c0_124 = arith.constant 0 : index
    %c32_125 = arith.constant 32 : index
    %309 = vector.load %arg16[%c0_124, %c32_125] : memref<32x128xf32, #tpu.memory_space<vmem>>, vector<16x32xf32>
    tpu.vector_store %arg16[%c0_124, %c32_125], %308 {strides = array<i32>} : memref<32x128xf32, #tpu.memory_space<vmem>>, vector<16x32xf32>,
    %310 = vector.extract_strided_slice %271 {offsets = [0, 64], sizes = [16, 32], strides = [1, 1]} : vector<32x128xf32> to vector<16x32xf32>
    %311 = vector.extract_strided_slice %272 {offsets = [0, 64], sizes = [16, 32], strides = [1, 1]} : vector<32x128xf32> to vector<16x32xf32>
    %312 = vector.extract_strided_slice %273 {offsets = [0, 64], sizes = [16, 32], strides = [1, 1]} : vector<32x128xf32> to vector<16x32xf32>
    %cst_126 = arith.constant dense<0.000000e+00> : vector<16x16xf32>
    %313 = tpu.matmul %310, %311, %cst_126 {dimension_numbers = #tpu.dot_dimension_numbers<[1], [1], [0], [0], [0, 0, 1, 0], [], []>} : vector<16x32xf32>, vector<16x32xf32>, vector<16x16xf32> -> vector<16x16xf32>
    %cst_127 = arith.constant dense<0xFF800000> : vector<16xf32>
    %314 = vector.multi_reduction <maximumf>, %313, %cst_127 [1] : vector<16x16xf32> to vector<16xf32>
    %315 = vector.shape_cast %314 : vector<16xf32> to vector<16x1xf32>
    %316 = vector.broadcast %315 : vector<16x1xf32> to vector<16x16xf32>
    %317 = arith.subf %313, %316 : vector<16x16xf32>
    %318 = math.exp %317 : vector<16x16xf32>
    %cst_128 = arith.constant dense<0.000000e+00> : vector<16xf32>
    %319 = vector.multi_reduction <add>, %318, %cst_128 [1] : vector<16x16xf32> to vector<16xf32>
    %320 = vector.shape_cast %319 : vector<16xf32> to vector<16x1xf32>
    %321 = tpu.reciprocal %320 {approx = true} : vector<16x1xf32> -> vector<16x1xf32>
    %322 = vector.broadcast %321 : vector<16x1xf32> to vector<16x16xf32>
    %323 = arith.mulf %318, %322 : vector<16x16xf32>
    %324 = arith.truncf %323 : vector<16x16xf32> to vector<16x16xbf16>
    %325 = arith.truncf %312 : vector<16x32xf32> to vector<16x32xbf16>
    %cst_129 = arith.constant dense<0.000000e+00> : vector<16x32xf32>
    %326 = tpu.matmul %324, %325, %cst_129 {dimension_numbers = #tpu.dot_dimension_numbers<[1], [0], [0], [1], [0, 0, 1, 1], [], []>} : vector<16x16xbf16>, vector<16x32xbf16>, vector<16x32xf32> -> vector<16x32xf32>
    %c0_130 = arith.constant 0 : index
    %c64_131 = arith.constant 64 : index
    %327 = vector.load %arg16[%c0_130, %c64_131] : memref<32x128xf32, #tpu.memory_space<vmem>>, vector<16x32xf32>
    tpu.vector_store %arg16[%c0_130, %c64_131], %326 {strides = array<i32>} : memref<32x128xf32, #tpu.memory_space<vmem>>, vector<16x32xf32>,
    %328 = vector.extract_strided_slice %271 {offsets = [0, 96], sizes = [16, 32], strides = [1, 1]} : vector<32x128xf32> to vector<16x32xf32>
    %329 = vector.extract_strided_slice %272 {offsets = [0, 96], sizes = [16, 32], strides = [1, 1]} : vector<32x128xf32> to vector<16x32xf32>
    %330 = vector.extract_strided_slice %273 {offsets = [0, 96], sizes = [16, 32], strides = [1, 1]} : vector<32x128xf32> to vector<16x32xf32>
    %cst_132 = arith.constant dense<0.000000e+00> : vector<16x16xf32>
    %331 = tpu.matmul %328, %329, %cst_132 {dimension_numbers = #tpu.dot_dimension_numbers<[1], [1], [0], [0], [0, 0, 1, 0], [], []>} : vector<16x32xf32>, vector<16x32xf32>, vector<16x16xf32> -> vector<16x16xf32>
    %cst_133 = arith.constant dense<0xFF800000> : vector<16xf32>
    %332 = vector.multi_reduction <maximumf>, %331, %cst_133 [1] : vector<16x16xf32> to vector<16xf32>
    %333 = vector.shape_cast %332 : vector<16xf32> to vector<16x1xf32>
    %334 = vector.broadcast %333 : vector<16x1xf32> to vector<16x16xf32>
    %335 = arith.subf %331, %334 : vector<16x16xf32>
    %336 = math.exp %335 : vector<16x16xf32>
    %cst_134 = arith.constant dense<0.000000e+00> : vector<16xf32>
    %337 = vector.multi_reduction <add>, %336, %cst_134 [1] : vector<16x16xf32> to vector<16xf32>
    %338 = vector.shape_cast %337 : vector<16xf32> to vector<16x1xf32>
    %339 = tpu.reciprocal %338 {approx = true} : vector<16x1xf32> -> vector<16x1xf32>
    %340 = vector.broadcast %339 : vector<16x1xf32> to vector<16x16xf32>
    %341 = arith.mulf %336, %340 : vector<16x16xf32>
    %342 = arith.truncf %341 : vector<16x16xf32> to vector<16x16xbf16>
    %343 = arith.truncf %330 : vector<16x32xf32> to vector<16x32xbf16>
    %cst_135 = arith.constant dense<0.000000e+00> : vector<16x32xf32>
    %344 = tpu.matmul %342, %343, %cst_135 {dimension_numbers = #tpu.dot_dimension_numbers<[1], [0], [0], [1], [0, 0, 1, 1], [], []>} : vector<16x16xbf16>, vector<16x32xbf16>, vector<16x32xf32> -> vector<16x32xf32>
    %c0_136 = arith.constant 0 : index
    %c96_137 = arith.constant 96 : index
    %345 = vector.load %arg16[%c0_136, %c96_137] : memref<32x128xf32, #tpu.memory_space<vmem>>, vector<16x32xf32>
    tpu.vector_store %arg16[%c0_136, %c96_137], %344 {strides = array<i32>} : memref<32x128xf32, #tpu.memory_space<vmem>>, vector<16x32xf32>,
    %346 = vector.extract_strided_slice %271 {offsets = [16, 0], sizes = [16, 32], strides = [1, 1]} : vector<32x128xf32> to vector<16x32xf32>
    %347 = vector.extract_strided_slice %272 {offsets = [16, 0], sizes = [16, 32], strides = [1, 1]} : vector<32x128xf32> to vector<16x32xf32>
    %348 = vector.extract_strided_slice %273 {offsets = [16, 0], sizes = [16, 32], strides = [1, 1]} : vector<32x128xf32> to vector<16x32xf32>
    %cst_138 = arith.constant dense<0.000000e+00> : vector<16x16xf32>
    %349 = tpu.matmul %346, %347, %cst_138 {dimension_numbers = #tpu.dot_dimension_numbers<[1], [1], [0], [0], [0, 0, 1, 0], [], []>} : vector<16x32xf32>, vector<16x32xf32>, vector<16x16xf32> -> vector<16x16xf32>
    %cst_139 = arith.constant dense<0xFF800000> : vector<16xf32>
    %350 = vector.multi_reduction <maximumf>, %349, %cst_139 [1] : vector<16x16xf32> to vector<16xf32>
    %351 = vector.shape_cast %350 : vector<16xf32> to vector<16x1xf32>
    %352 = vector.broadcast %351 : vector<16x1xf32> to vector<16x16xf32>
    %353 = arith.subf %349, %352 : vector<16x16xf32>
    %354 = math.exp %353 : vector<16x16xf32>
    %cst_140 = arith.constant dense<0.000000e+00> : vector<16xf32>
    %355 = vector.multi_reduction <add>, %354, %cst_140 [1] : vector<16x16xf32> to vector<16xf32>
    %356 = vector.shape_cast %355 : vector<16xf32> to vector<16x1xf32>
    %357 = tpu.reciprocal %356 {approx = true} : vector<16x1xf32> -> vector<16x1xf32>
    %358 = vector.broadcast %357 : vector<16x1xf32> to vector<16x16xf32>
    %359 = arith.mulf %354, %358 : vector<16x16xf32>
    %360 = arith.truncf %359 : vector<16x16xf32> to vector<16x16xbf16>
    %361 = arith.truncf %348 : vector<16x32xf32> to vector<16x32xbf16>
    %cst_141 = arith.constant dense<0.000000e+00> : vector<16x32xf32>
    %362 = tpu.matmul %360, %361, %cst_141 {dimension_numbers = #tpu.dot_dimension_numbers<[1], [0], [0], [1], [0, 0, 1, 1], [], []>} : vector<16x16xbf16>, vector<16x32xbf16>, vector<16x32xf32> -> vector<16x32xf32>
    %c16_142 = arith.constant 16 : index
    %c0_143 = arith.constant 0 : index
    %363 = vector.load %arg16[%c16_142, %c0_143] : memref<32x128xf32, #tpu.memory_space<vmem>>, vector<16x32xf32>
    tpu.vector_store %arg16[%c16_142, %c0_143], %362 {strides = array<i32>} : memref<32x128xf32, #tpu.memory_space<vmem>>, vector<16x32xf32>,
    %364 = vector.extract_strided_slice %271 {offsets = [16, 32], sizes = [16, 32], strides = [1, 1]} : vector<32x128xf32> to vector<16x32xf32>
    %365 = vector.extract_strided_slice %272 {offsets = [16, 32], sizes = [16, 32], strides = [1, 1]} : vector<32x128xf32> to vector<16x32xf32>
    %366 = vector.extract_strided_slice %273 {offsets = [16, 32], sizes = [16, 32], strides = [1, 1]} : vector<32x128xf32> to vector<16x32xf32>
    %cst_144 = arith.constant dense<0.000000e+00> : vector<16x16xf32>
    %367 = tpu.matmul %364, %365, %cst_144 {dimension_numbers = #tpu.dot_dimension_numbers<[1], [1], [0], [0], [0, 0, 1, 0], [], []>} : vector<16x32xf32>, vector<16x32xf32>, vector<16x16xf32> -> vector<16x16xf32>
    %cst_145 = arith.constant dense<0xFF800000> : vector<16xf32>
    %368 = vector.multi_reduction <maximumf>, %367, %cst_145 [1] : vector<16x16xf32> to vector<16xf32>
    %369 = vector.shape_cast %368 : vector<16xf32> to vector<16x1xf32>
    %370 = vector.broadcast %369 : vector<16x1xf32> to vector<16x16xf32>
    %371 = arith.subf %367, %370 : vector<16x16xf32>
    %372 = math.exp %371 : vector<16x16xf32>
    %cst_146 = arith.constant dense<0.000000e+00> : vector<16xf32>
    %373 = vector.multi_reduction <add>, %372, %cst_146 [1] : vector<16x16xf32> to vector<16xf32>
    %374 = vector.shape_cast %373 : vector<16xf32> to vector<16x1xf32>
    %375 = tpu.reciprocal %374 {approx = true} : vector<16x1xf32> -> vector<16x1xf32>
    %376 = vector.broadcast %375 : vector<16x1xf32> to vector<16x16xf32>
    %377 = arith.mulf %372, %376 : vector<16x16xf32>
    %378 = arith.truncf %377 : vector<16x16xf32> to vector<16x16xbf16>
    %379 = arith.truncf %366 : vector<16x32xf32> to vector<16x32xbf16>
    %cst_147 = arith.constant dense<0.000000e+00> : vector<16x32xf32>
    %380 = tpu.matmul %378, %379, %cst_147 {dimension_numbers = #tpu.dot_dimension_numbers<[1], [0], [0], [1], [0, 0, 1, 1], [], []>} : vector<16x16xbf16>, vector<16x32xbf16>, vector<16x32xf32> -> vector<16x32xf32>
    %c16_148 = arith.constant 16 : index
    %c32_149 = arith.constant 32 : index
    %381 = vector.load %arg16[%c16_148, %c32_149] : memref<32x128xf32, #tpu.memory_space<vmem>>, vector<16x32xf32>
    tpu.vector_store %arg16[%c16_148, %c32_149], %380 {strides = array<i32>} : memref<32x128xf32, #tpu.memory_space<vmem>>, vector<16x32xf32>,
    %382 = vector.extract_strided_slice %271 {offsets = [16, 64], sizes = [16, 32], strides = [1, 1]} : vector<32x128xf32> to vector<16x32xf32>
    %383 = vector.extract_strided_slice %272 {offsets = [16, 64], sizes = [16, 32], strides = [1, 1]} : vector<32x128xf32> to vector<16x32xf32>
    %384 = vector.extract_strided_slice %273 {offsets = [16, 64], sizes = [16, 32], strides = [1, 1]} : vector<32x128xf32> to vector<16x32xf32>
    %cst_150 = arith.constant dense<0.000000e+00> : vector<16x16xf32>
    %385 = tpu.matmul %382, %383, %cst_150 {dimension_numbers = #tpu.dot_dimension_numbers<[1], [1], [0], [0], [0, 0, 1, 0], [], []>} : vector<16x32xf32>, vector<16x32xf32>, vector<16x16xf32> -> vector<16x16xf32>
    %cst_151 = arith.constant dense<0xFF800000> : vector<16xf32>
    %386 = vector.multi_reduction <maximumf>, %385, %cst_151 [1] : vector<16x16xf32> to vector<16xf32>
    %387 = vector.shape_cast %386 : vector<16xf32> to vector<16x1xf32>
    %388 = vector.broadcast %387 : vector<16x1xf32> to vector<16x16xf32>
    %389 = arith.subf %385, %388 : vector<16x16xf32>
    %390 = math.exp %389 : vector<16x16xf32>
    %cst_152 = arith.constant dense<0.000000e+00> : vector<16xf32>
    %391 = vector.multi_reduction <add>, %390, %cst_152 [1] : vector<16x16xf32> to vector<16xf32>
    %392 = vector.shape_cast %391 : vector<16xf32> to vector<16x1xf32>
    %393 = tpu.reciprocal %392 {approx = true} : vector<16x1xf32> -> vector<16x1xf32>
    %394 = vector.broadcast %393 : vector<16x1xf32> to vector<16x16xf32>
    %395 = arith.mulf %390, %394 : vector<16x16xf32>
    %396 = arith.truncf %395 : vector<16x16xf32> to vector<16x16xbf16>
    %397 = arith.truncf %384 : vector<16x32xf32> to vector<16x32xbf16>
    %cst_153 = arith.constant dense<0.000000e+00> : vector<16x32xf32>
    %398 = tpu.matmul %396, %397, %cst_153 {dimension_numbers = #tpu.dot_dimension_numbers<[1], [0], [0], [1], [0, 0, 1, 1], [], []>} : vector<16x16xbf16>, vector<16x32xbf16>, vector<16x32xf32> -> vector<16x32xf32>
    %c16_154 = arith.constant 16 : index
    %c64_155 = arith.constant 64 : index
    %399 = vector.load %arg16[%c16_154, %c64_155] : memref<32x128xf32, #tpu.memory_space<vmem>>, vector<16x32xf32>
    tpu.vector_store %arg16[%c16_154, %c64_155], %398 {strides = array<i32>} : memref<32x128xf32, #tpu.memory_space<vmem>>, vector<16x32xf32>,
    %400 = vector.extract_strided_slice %271 {offsets = [16, 96], sizes = [16, 32], strides = [1, 1]} : vector<32x128xf32> to vector<16x32xf32>
    %401 = vector.extract_strided_slice %272 {offsets = [16, 96], sizes = [16, 32], strides = [1, 1]} : vector<32x128xf32> to vector<16x32xf32>
    %402 = vector.extract_strided_slice %273 {offsets = [16, 96], sizes = [16, 32], strides = [1, 1]} : vector<32x128xf32> to vector<16x32xf32>
    %cst_156 = arith.constant dense<0.000000e+00> : vector<16x16xf32>
    %403 = tpu.matmul %400, %401, %cst_156 {dimension_numbers = #tpu.dot_dimension_numbers<[1], [1], [0], [0], [0, 0, 1, 0], [], []>} : vector<16x32xf32>, vector<16x32xf32>, vector<16x16xf32> -> vector<16x16xf32>
    %cst_157 = arith.constant dense<0xFF800000> : vector<16xf32>
    %404 = vector.multi_reduction <maximumf>, %403, %cst_157 [1] : vector<16x16xf32> to vector<16xf32>
    %405 = vector.shape_cast %404 : vector<16xf32> to vector<16x1xf32>
    %406 = vector.broadcast %405 : vector<16x1xf32> to vector<16x16xf32>
    %407 = arith.subf %403, %406 : vector<16x16xf32>
    %408 = math.exp %407 : vector<16x16xf32>
    %cst_158 = arith.constant dense<0.000000e+00> : vector<16xf32>
    %409 = vector.multi_reduction <add>, %408, %cst_158 [1] : vector<16x16xf32> to vector<16xf32>
    %410 = vector.shape_cast %409 : vector<16xf32> to vector<16x1xf32>
    %411 = tpu.reciprocal %410 {approx = true} : vector<16x1xf32> -> vector<16x1xf32>
    %412 = vector.broadcast %411 : vector<16x1xf32> to vector<16x16xf32>
    %413 = arith.mulf %408, %412 : vector<16x16xf32>
    %414 = arith.truncf %413 : vector<16x16xf32> to vector<16x16xbf16>
    %415 = arith.truncf %402 : vector<16x32xf32> to vector<16x32xbf16>
    %cst_159 = arith.constant dense<0.000000e+00> : vector<16x32xf32>
    %416 = tpu.matmul %414, %415, %cst_159 {dimension_numbers = #tpu.dot_dimension_numbers<[1], [0], [0], [1], [0, 0, 1, 1], [], []>} : vector<16x16xbf16>, vector<16x32xbf16>, vector<16x32xf32> -> vector<16x32xf32>
    %c16_160 = arith.constant 16 : index
    %c96_161 = arith.constant 96 : index
    %417 = vector.load %arg16[%c16_160, %c96_161] : memref<32x128xf32, #tpu.memory_space<vmem>>, vector<16x32xf32>
    tpu.vector_store %arg16[%c16_160, %c96_161], %416 {strides = array<i32>} : memref<32x128xf32, #tpu.memory_space<vmem>>, vector<16x32xf32>,
    %c0_162 = arith.constant 0 : index
    %c0_163 = arith.constant 0 : index
    %418 = vector.load %arg16[%c0_162, %c0_163] : memref<32x128xf32, #tpu.memory_space<vmem>>, vector<32x128xf32>
    %419 = arith.truncf %418 : vector<32x128xf32> to vector<32x128xbf16>
    %c1_164 = arith.constant 1 : index
    %c0_165 = arith.constant 0 : index
    %c0_166 = arith.constant 0 : index
    %420 = vector.load %arg5[%c1_164, %c0_165, %c0_166] : memref<2x128x128xbf16, #tpu.memory_space<vmem>>, vector<1x128x128xbf16>
    %421 = vector.shape_cast %420 : vector<1x128x128xbf16> to vector<128x128xbf16>
    %cst_167 = arith.constant dense<0.000000e+00> : vector<32x128xf32>
    %422 = tpu.matmul %419, %421, %cst_167 {dimension_numbers = #tpu.dot_dimension_numbers<[1], [0], [0], [1], [0, 0, 1, 1], [], []>} : vector<32x128xbf16>, vector<128x128xbf16>, vector<32x128xf32> -> vector<32x128xf32>
    %423 = arith.addf %236, %422 : vector<32x128xf32>
    %c1_168 = arith.constant 1 : index
    %c0_169 = arith.constant 0 : index
    %c0_170 = arith.constant 0 : index
    %424 = vector.load %arg6[%c1_168, %c0_169, %c0_170] : memref<2x1x128xf32, #tpu.memory_space<vmem>>, vector<1x1x128xf32>
    %425 = vector.shape_cast %424 : vector<1x1x128xf32> to vector<1x128xf32>
    %426 = vector.broadcast %425 : vector<1x128xf32> to vector<32x128xf32>
    %427 = arith.addf %423, %426 : vector<32x128xf32>
    %c1_171 = arith.constant 1 : index
    %c0_172 = arith.constant 0 : index
    %c0_173 = arith.constant 0 : index
    %428 = vector.load %arg7[%c1_171, %c0_172, %c0_173] : memref<2x1x128xf32, #tpu.memory_space<vmem>>, vector<1x1x128xf32>
    %429 = vector.shape_cast %428 : vector<1x1x128xf32> to vector<1x128xf32>
    %c1_174 = arith.constant 1 : index
    %c0_175 = arith.constant 0 : index
    %c0_176 = arith.constant 0 : index
    %430 = vector.load %arg8[%c1_174, %c0_175, %c0_176] : memref<2x1x128xf32, #tpu.memory_space<vmem>>, vector<1x1x128xf32>
    %431 = vector.shape_cast %430 : vector<1x1x128xf32> to vector<1x128xf32>
    %cst_177 = arith.constant dense<0.000000e+00> : vector<32xf32>
    %432 = vector.multi_reduction <add>, %427, %cst_177 [1] : vector<32x128xf32> to vector<32xf32>
    %433 = vector.shape_cast %432 : vector<32xf32> to vector<32x1xf32>
    %cst_178 = arith.constant 1.280000e+02 : f32
    %434 = vector.broadcast %cst_178 : f32 to vector<32x1xf32>
    %435 = arith.divf %433, %434 : vector<32x1xf32>
    %436 = vector.broadcast %435 : vector<32x1xf32> to vector<32x128xf32>
    %437 = arith.subf %427, %436 : vector<32x128xf32>
    %438 = arith.mulf %437, %437 : vector<32x128xf32>
    %cst_179 = arith.constant dense<0.000000e+00> : vector<32xf32>
    %439 = vector.multi_reduction <add>, %438, %cst_179 [1] : vector<32x128xf32> to vector<32xf32>
    %440 = vector.shape_cast %439 : vector<32xf32> to vector<32x1xf32>
    %cst_180 = arith.constant 1.280000e+02 : f32
    %441 = vector.broadcast %cst_180 : f32 to vector<32x1xf32>
    %442 = arith.divf %440, %441 : vector<32x1xf32>
    %443 = vector.broadcast %435 : vector<32x1xf32> to vector<32x128xf32>
    %444 = arith.subf %427, %443 : vector<32x128xf32>
    %cst_181 = arith.constant 9.99999974E-6 : f32
    %445 = vector.broadcast %cst_181 : f32 to vector<32x1xf32>
    %446 = arith.addf %442, %445 : vector<32x1xf32>
    %447 = math.rsqrt %446 : vector<32x1xf32>
    %448 = vector.broadcast %447 : vector<32x1xf32> to vector<32x128xf32>
    %449 = arith.mulf %444, %448 : vector<32x128xf32>
    %450 = vector.broadcast %429 : vector<1x128xf32> to vector<32x128xf32>
    %451 = arith.mulf %449, %450 : vector<32x128xf32>
    %452 = vector.broadcast %431 : vector<1x128xf32> to vector<32x128xf32>
    %453 = arith.addf %451, %452 : vector<32x128xf32>
    %454 = arith.truncf %453 : vector<32x128xf32> to vector<32x128xbf16>
    %c1_182 = arith.constant 1 : index
    %c0_183 = arith.constant 0 : index
    %c0_184 = arith.constant 0 : index
    %455 = vector.load %arg9[%c1_182, %c0_183, %c0_184] : memref<2x128x256xbf16, #tpu.memory_space<vmem>>, vector<1x128x256xbf16>
    %456 = vector.shape_cast %455 : vector<1x128x256xbf16> to vector<128x256xbf16>
    %cst_185 = arith.constant dense<0.000000e+00> : vector<32x256xf32>
    %457 = tpu.matmul %454, %456, %cst_185 {dimension_numbers = #tpu.dot_dimension_numbers<[1], [0], [0], [1], [0, 0, 1, 1], [], []>} : vector<32x128xbf16>, vector<128x256xbf16>, vector<32x256xf32> -> vector<32x256xf32>
    %c1_186 = arith.constant 1 : index
    %c0_187 = arith.constant 0 : index
    %c0_188 = arith.constant 0 : index
    %458 = vector.load %arg10[%c1_186, %c0_187, %c0_188] : memref<2x1x256xf32, #tpu.memory_space<vmem>>, vector<1x1x256xf32>
    %459 = vector.shape_cast %458 : vector<1x1x256xf32> to vector<1x256xf32>
    %460 = vector.broadcast %459 : vector<1x256xf32> to vector<32x256xf32>
    %461 = arith.addf %457, %460 : vector<32x256xf32>
    %cst_189 = arith.constant 0.000000e+00 : f32
    %462 = vector.broadcast %cst_189 : f32 to vector<32x256xf32>
    %463 = arith.maximumf %461, %462 : vector<32x256xf32>
    %464 = arith.truncf %463 : vector<32x256xf32> to vector<32x256xbf16>
    %c1_190 = arith.constant 1 : index
    %c0_191 = arith.constant 0 : index
    %c0_192 = arith.constant 0 : index
    %465 = vector.load %arg11[%c1_190, %c0_191, %c0_192] : memref<2x256x128xbf16, #tpu.memory_space<vmem>>, vector<1x256x128xbf16>
    %466 = vector.shape_cast %465 : vector<1x256x128xbf16> to vector<256x128xbf16>
    %cst_193 = arith.constant dense<0.000000e+00> : vector<32x128xf32>
    %467 = tpu.matmul %464, %466, %cst_193 {dimension_numbers = #tpu.dot_dimension_numbers<[1], [0], [0], [1], [0, 0, 1, 1], [], []>} : vector<32x256xbf16>, vector<256x128xbf16>, vector<32x128xf32> -> vector<32x128xf32>
    %468 = arith.addf %427, %467 : vector<32x128xf32>
    %c1_194 = arith.constant 1 : index
    %c0_195 = arith.constant 0 : index
    %c0_196 = arith.constant 0 : index
    %469 = vector.load %arg12[%c1_194, %c0_195, %c0_196] : memref<2x1x128xf32, #tpu.memory_space<vmem>>, vector<1x1x128xf32>
    %470 = vector.shape_cast %469 : vector<1x1x128xf32> to vector<1x128xf32>
    %471 = vector.broadcast %470 : vector<1x128xf32> to vector<32x128xf32>
    %472 = arith.addf %468, %471 : vector<32x128xf32>
    %c0_197 = arith.constant 0 : index
    %c0_198 = arith.constant 0 : index
    %473 = vector.load %arg13[%c0_197, %c0_198] : memref<1x128xf32, #tpu.memory_space<vmem>>, vector<1x128xf32>
    %c0_199 = arith.constant 0 : index
    %c0_200 = arith.constant 0 : index
    %474 = vector.load %arg14[%c0_199, %c0_200] : memref<1x128xf32, #tpu.memory_space<vmem>>, vector<1x128xf32>
    %cst_201 = arith.constant dense<0.000000e+00> : vector<32xf32>
    %475 = vector.multi_reduction <add>, %472, %cst_201 [1] : vector<32x128xf32> to vector<32xf32>
    %476 = vector.shape_cast %475 : vector<32xf32> to vector<32x1xf32>
    %cst_202 = arith.constant 1.280000e+02 : f32
    %477 = vector.broadcast %cst_202 : f32 to vector<32x1xf32>
    %478 = arith.divf %476, %477 : vector<32x1xf32>
    %479 = vector.broadcast %478 : vector<32x1xf32> to vector<32x128xf32>
    %480 = arith.subf %472, %479 : vector<32x128xf32>
    %481 = arith.mulf %480, %480 : vector<32x128xf32>
    %cst_203 = arith.constant dense<0.000000e+00> : vector<32xf32>
    %482 = vector.multi_reduction <add>, %481, %cst_203 [1] : vector<32x128xf32> to vector<32xf32>
    %483 = vector.shape_cast %482 : vector<32xf32> to vector<32x1xf32>
    %cst_204 = arith.constant 1.280000e+02 : f32
    %484 = vector.broadcast %cst_204 : f32 to vector<32x1xf32>
    %485 = arith.divf %483, %484 : vector<32x1xf32>
    %486 = vector.broadcast %478 : vector<32x1xf32> to vector<32x128xf32>
    %487 = arith.subf %472, %486 : vector<32x128xf32>
    %cst_205 = arith.constant 9.99999974E-6 : f32
    %488 = vector.broadcast %cst_205 : f32 to vector<32x1xf32>
    %489 = arith.addf %485, %488 : vector<32x1xf32>
    %490 = math.rsqrt %489 : vector<32x1xf32>
    %491 = vector.broadcast %490 : vector<32x1xf32> to vector<32x128xf32>
    %492 = arith.mulf %487, %491 : vector<32x128xf32>
    %493 = vector.broadcast %473 : vector<1x128xf32> to vector<32x128xf32>
    %494 = arith.mulf %492, %493 : vector<32x128xf32>
    %495 = vector.broadcast %474 : vector<1x128xf32> to vector<32x128xf32>
    %496 = arith.addf %494, %495 : vector<32x128xf32>
    %c0_206 = arith.constant 0 : index
    %c0_207 = arith.constant 0 : index
    %497 = vector.load %arg15[%c0_206, %c0_207] : memref<32x128xf32, #tpu.memory_space<vmem>>, vector<32x128xf32>
    tpu.vector_store %arg15[%c0_206, %c0_207], %496 {strides = array<i32>} : memref<32x128xf32, #tpu.memory_space<vmem>>, vector<32x128xf32>,
    return
  }
}

</mosaic_0001>

<bundles_post_ra>
// kernel: tpu_custom_call.1
= control target key start
LH: loop header
LB: loop body
LE: loop exit
PB: predicated region body
PF: predicated region fallthrough
CT: control target
= control target key end

     0   :  { %20 = vsyncpa [#allocation4], 0  ;;  %s6917_s0 = inlined_call_operand.hbm [shape: f32[32,128], index: 0, kind: input, shape index: {}]   ;;  %s6918_s1 = inlined_call_operand.hbm [shape: f32[2,1,128], index: 1, kind: input, shape index: {}]   ;;  %s6919_s2 = inlined_call_operand.hbm [shape: f32[2,1,128], index: 2, kind: input, shape index: {}]   ;;  %s6920_s3 = inlined_call_operand.hbm [shape: bf16[2,128,384], index: 3, kind: input, shape index: {}]   ;;  %s6921_s4 = inlined_call_operand.vmem [shape: f32[2,1,384], index: 4, kind: input, shape index: {}]   ;;  %s6922_s5 = inlined_call_operand.hbm [shape: bf16[2,128,128], index: 5, kind: input, shape index: {}]   ;;  %s6923_s6 = inlined_call_operand.hbm [shape: f32[2,1,128], index: 6, kind: input, shape index: {}]   ;;  %s6924_s7 = inlined_call_operand.vmem [shape: f32[2,1,128], index: 7, kind: input, shape index: {}]   ;;  %s6925_s8 = inlined_call_operand.vmem [shape: f32[2,1,128], index: 8, kind: input, shape index: {}]   ;;  %s6926_s9 = inlined_call_operand.hbm [shape: bf16[2,128,256], index: 9, kind: input, shape index: {}]   ;;  %s6927_s10 = inlined_call_operand.vmem [shape: f32[2,1,256], index: 10, kind: input, shape index: {}]   ;;  %s6928_s11 = inlined_call_operand.hbm [shape: bf16[2,256,128], index: 11, kind: input, shape index: {}]   ;;  %s6929_s12 = inlined_call_operand.vmem [shape: f32[2,1,128], index: 12, kind: input, shape index: {}]   ;;  %s6930_s13 = inlined_call_operand.vmem [shape: f32[1,128], index: 13, kind: input, shape index: {}]   ;;  %s6931_s14 = inlined_call_operand.vmem [shape: f32[1,128], index: 14, kind: input, shape index: {}]   ;;  %s6932_s15 = inlined_call_operand.hbm [shape: f32[32,128], index: 15, kind: output, shape index: {}]  }
   0x1   :  { %21 = vsyncpa [#allocation7], 0 }
   0x2   :  { %22 = vsyncpa [#allocation10], 0 }
   0x3   :  { %23 = vsyncpa [#allocation13], 0 }
   0x4   :  { %24 = vsyncpa [#allocation16], 0 }
   0x5   :  { %25 = vsyncpa [#allocation5], 0  ;;  %s6039_s18 = smov [#allocation6]  }
   0x6   :  { %s43_s19 = sshll.u32 %s6039_s18, 4  ;;  %s44_s19 = int_to_ptr.vmem [resolvable:$true] %s43_s19 }
   0x7   :  { %s5855_s20 = scalar_lea.vmem %s44_s19, 32  ;;  %p5860_p1 = scmp.lt.s32.totalorder %s44_s19, %s44_s19 }
   0x8   :  { %p5856_p0 = scmp.ne.s32.totalorder %s44_s19, %s5855_s20  ;;  %p5861_p2 = scmp.lt.s32.totalorder %s5855_s20, %s5855_s20 }
   0xa   :  { %p5862_p3 = por %p5861_p2, %p5860_p1 }
   0xc   :  { %p5863_p4 = pnand %p5862_p3, %p5856_p0 }
   0xe   :  { %5866 = shalt.err (!%p5863_p4)
}
   0xf   :  { %s6040_s21 = smov 16   ;;  %s6041_s22 = smov 1  }
  0x10   :  { %49 = dma.hbm_to_vmem [thread:$0]  %s6918_s1, 32, %s44_s19, [#allocation7], %s6040_s21, %s6040_s21, %s6041_s22  }
  0x11   :  { %s6042_s25 = smov [#allocation9]  }
  0x12   :  { %s67_s26 = sshll.u32 %s6042_s25, 4  ;;  %s68_s26 = int_to_ptr.vmem [resolvable:$true] %s67_s26 }
  0x13   :  { %s5875_s27 = scalar_lea.vmem %s68_s26, 6144  ;;  %p5880_p6 = scmp.lt.s32.totalorder %s68_s26, %s68_s26 }
  0x14   :  { %p5876_p5 = scmp.ne.s32.totalorder %s68_s26, %s5875_s27  ;;  %p5881_p7 = scmp.lt.s32.totalorder %s5875_s27, %s5875_s27 }
  0x16   :  { %p5882_p8 = por %p5881_p7, %p5880_p6 }
  0x18   :  { %p5883_p9 = pnand %p5882_p8, %p5876_p5 }
  0x1a   :  { %5886 = shalt.err (!%p5883_p9)
}
  0x1b   :  { %s6043_s28 = smov 192   ;;  %s6044_s29 = smov 12  }
  0x1c   :  { %73 = dma.hbm_to_vmem [thread:$0]  %s6920_s3, 6144, %s68_s26, [#allocation10], %s6043_s28, %s6043_s28, %s6044_s29  }
  0x1d   :  { %s6045_s17 = smov [#allocation12]   ;;  %s6046_s20 = smov [#allocation3]  }
  0x1e   :  { %s93_s18 = sshll.u32 %s6045_s17, 4  ;;  %s31_s1 = sshll.u32 %s6046_s20, 4  ;;  %s94_s18 = int_to_ptr.vmem [resolvable:$true] %s93_s18  ;;  %s32_s1 = int_to_ptr.vmem [resolvable:$true] %s31_s1 }
  0x1f   :  { %s5895_s19 = scalar_lea.vmem %s94_s18, 32  ;;  %p5900_p11 = scmp.lt.s32.totalorder %s94_s18, %s94_s18 }
  0x20   :  { %p5896_p10 = scmp.ne.s32.totalorder %s94_s18, %s5895_s19  ;;  %p5901_p12 = scmp.lt.s32.totalorder %s5895_s19, %s5895_s19 }
  0x22   :  { %p5902_p13 = por %p5901_p12, %p5900_p11 }
  0x24   :  { %p5903_p0 = pnand %p5902_p13, %p5896_p10 }
  0x26   :  { %5906 = shalt.err (!%p5903_p0)
}
  0x27   :  { %99 = dma.hbm_to_vmem [thread:$0]  %s6923_s6, 32, %s94_s18, [#allocation13], %s6040_s21, %s6040_s21, %s6041_s22  }
  0x28   :  { %s5915_s3 = scalar_lea.vmem %s32_s1, 512  ;;  %p5920_p2 = scmp.lt.s32.totalorder %s32_s1, %s32_s1 }
  0x29   :  { %p5916_p1 = scmp.ne.s32.totalorder %s32_s1, %s5915_s3  ;;  %p5921_p3 = scmp.lt.s32.totalorder %s5915_s3, %s5915_s3 }
  0x2b   :  { %p5922_p4 = por %p5921_p3, %p5920_p2 }
  0x2d   :  { %p5923_p5 = pnand %p5922_p4, %p5916_p1 }
  0x2f   :  { %5926 = shalt.err (!%p5923_p5)
}
  0x30   :  { %s6047_s25 = smov 128   ;;  %s6048_s26 = smov 8  }
  0x31   :  { %37 = dma.hbm_to_vmem [thread:$0]  %s6917_s0, 512, %s32_s1, [#allocation4], %s6047_s25, %s6047_s25, %s6048_s26  }
  0x32   :  { %s6049_s29 = smov [#allocation8]   ;;  %s6050_s16 = smov [#allocation11]  }
  0x33   :  { %s55_s30 = sshll.u32 %s6049_s29, 4  ;;  %s81_s6 = sshll.u32 %s6050_s16, 4  ;;  %s56_s30 = int_to_ptr.vmem [resolvable:$true] %s55_s30  ;;  %s82_s6 = int_to_ptr.vmem [resolvable:$true] %s81_s6 }
  0x34   :  { %s5935_s17 = scalar_lea.vmem %s56_s30, 32  ;;  %p5940_p7 = scmp.lt.s32.totalorder %s56_s30, %s56_s30 }
  0x35   :  { %p5936_p6 = scmp.ne.s32.totalorder %s56_s30, %s5935_s17  ;;  %p5941_p8 = scmp.lt.s32.totalorder %s5935_s17, %s5935_s17 }
  0x37   :  { %p5942_p9 = por %p5941_p8, %p5940_p7 }
  0x39   :  { %p5943_p10 = pnand %p5942_p9, %p5936_p6 }
  0x3b   :  { %5946 = shalt.err (!%p5943_p10)
}
  0x3c   :  { %61 = dma.hbm_to_vmem [thread:$0]  %s6919_s2, 32, %s56_s30, [#allocation7], %s6040_s21, %s6040_s21, %s6041_s22  }
  0x3d   :  { %s5955_s0 = scalar_lea.vmem %s82_s6, 2048  ;;  %p5960_p12 = scmp.lt.s32.totalorder %s82_s6, %s82_s6 }
  0x3e   :  { %p5956_p11 = scmp.ne.s32.totalorder %s82_s6, %s5955_s0  ;;  %p5961_p13 = scmp.lt.s32.totalorder %s5955_s0, %s5955_s0 }
  0x40   :  { %p5962_p0 = por %p5961_p13, %p5960_p12 }
  0x42   :  { %p5963_p1 = pnand %p5962_p0, %p5956_p11 }
  0x44   :  { %5966 = shalt.err (!%p5963_p1)
}
  0x45   :  { %s6051_s1 = smov 64   ;;  %s6052_s19 = smov 4  }
  0x46   :  { %87 = dma.hbm_to_vmem [thread:$0]  %s6922_s5, 2048, %s82_s6, [#allocation10], %s6051_s1, %s6051_s1, %s6052_s19  }
  0x47   :  { %s6053_s3 = smov [#allocation14]   ;;  %s6054_s28 = smov [#allocation15]  }
  0x48   :  { %s109_s27 = sshll.u32 %s6053_s3, 4  ;;  %s123_s29 = sshll.u32 %s6054_s28, 4  ;;  %s110_s27 = int_to_ptr.vmem [resolvable:$true] %s109_s27  ;;  %s124_s29 = int_to_ptr.vmem [resolvable:$true] %s123_s29 }
  0x49   :  { %s5975_s2 = scalar_lea.vmem %s110_s27, 4096  ;;  %p5980_p3 = scmp.lt.s32.totalorder %s110_s27, %s110_s27 }
  0x4a   :  { %p5976_p2 = scmp.ne.s32.totalorder %s110_s27, %s5975_s2  ;;  %p5981_p4 = scmp.lt.s32.totalorder %s5975_s2, %s5975_s2 }
  0x4c   :  { %p5982_p5 = por %p5981_p4, %p5980_p3 }
  0x4e   :  { %p5983_p6 = pnand %p5982_p5, %p5976_p2 }
  0x50   :  { %5986 = shalt.err (!%p5983_p6)
}
  0x51   :  { %115 = dma.hbm_to_vmem [thread:$0]  %s6926_s9, 4096, %s110_s27, [#allocation13], %s6047_s25, %s6047_s25, %s6048_s26  }
  0x52   :  { %s5995_s5 = scalar_lea.vmem %s124_s29, 4096  ;;  %p6000_p8 = scmp.lt.s32.totalorder %s124_s29, %s124_s29 }
  0x53   :  { %p5996_p7 = scmp.ne.s32.totalorder %s124_s29, %s5995_s5  ;;  %p6001_p9 = scmp.lt.s32.totalorder %s5995_s5, %s5995_s5 }
  0x55   :  { %p6002_p10 = por %p6001_p9, %p6000_p8 }
  0x57   :  { %p6003_p11 = pnand %p6002_p10, %p5996_p7 }
  0x59   :  { %6006 = shalt.err (!%p6003_p11)
}
  0x5a   :  { %129 = dma.hbm_to_vmem [thread:$0]  %s6928_s11, 4096, %s124_s29, [#allocation16], %s6051_s1, %s6051_s1, %s6052_s19  }
  0x5b   :  { %6027 = dma.done.wait [#allocation4], 512  }
  0x5c   :  { %6028 = vsyncadd [#allocation4], 4294966784 }
  0x5d   :  { %6029 = dma.done.wait [#allocation7], 64  }
  0x5e   :  { %6030 = vsyncadd [#allocation7], 4294967232 }
  0x5f   :  { %6031 = dma.done.wait [#allocation10], 8192  }
  0x60   :  { %6032 = vsyncadd [#allocation10], 4294959104 }
  0x61   :  { %6033 = dma.done.wait [#allocation13], 4128  }
  0x62   :  { %6034 = vsyncadd [#allocation13], 4294963168 }
  0x63   :  { %6035 = dma.done.wait [#allocation16], 4096  }
  0x64   :  { %6036 = vsyncadd [#allocation16], 4294963200  ;;  %v161_v0 = vld [vmem:[#allocation3] sm:$0xff]  ;;  %v162_v1 = vld [vmem:[#allocation3 + $0x8] sm:$0xff]  ;;  %v6055_v29 = vmov 0   ;;  %vm513_vm0 = vcmask 261120  }
  0x65   :  { %167 = vadd.xlane.f32.xlu0 %v161_v0  ;;  %v163_v2 = vld [vmem:[#allocation3 + $0x10] sm:$0xff]  ;;  %v5517_v4 = vld [vmem:[#allocation9 + $0xa8] ss:$12 sps:$4 sm:$0xff]   ;;  %v5523_v21 = vld [vmem:[#allocation9 + $0x78] ss:$12 sps:$4 sm:$0xff]   ;;  %443 = vmatprep.mubr.bf16.mxu0 %v6055_v29  ;;  %vm601_vm1 = vcmask 130048  }
  0x66   :  { %v5515_v3 = vld [vmem:[#allocation9 + $0xac] ss:$12 sps:$4 sm:$0xff]   ;;  %v5518_v18 = vld [vmem:[#allocation9 + $0x94] ss:$12 sps:$4 sm:$0xff]   ;;  %v5520_v19 = vld [vmem:[#allocation9 + $0x90] ss:$12 sps:$4 sm:$0xff]  }
  0x67   :  { %411 = vmatprep.subr.bf16.mxu0 %v5515_v3  ;;  %v164_v16 = vld [vmem:[#allocation3 + $0x18] sm:$0xff]  ;;  %v5521_v20 = vld [vmem:[#allocation9 + $0x7c] ss:$12 sps:$4 sm:$0xff]   ;;  %v5524_v22 = vld [vmem:[#allocation9 + $0x64] ss:$12 sps:$4 sm:$0xff]   ;;  %s6057_s6 = smov 96  }
  0x68   :  { %412 = vmatpush1.bf16.msra.mxu0 %v5517_v4  ;;  %v5526_v23 = vld [vmem:[#allocation9 + $0x60] ss:$12 sps:$4 sm:$0xff]   ;;  %v5529_v25 = vld [vmem:[#allocation9 + $0x48] ss:$12 sps:$4 sm:$0xff]   ;;  %v5532_v27 = vld [vmem:[#allocation9 + $0x30] ss:$12 sps:$4 sm:$0xff]  }
  0x69   :  { %169 = vadd.xlane.f32.xlu0 %v162_v1  ;;  %413 = vmatprep.subr.bf16.mxu0 %v5518_v18  ;;  %v5527_v24 = vld [vmem:[#allocation9 + $0x4c] ss:$12 sps:$4 sm:$0xff]   ;;  %v5530_v26 = vld [vmem:[#allocation9 + $0x34] ss:$12 sps:$4 sm:$0xff]   ;;  %v5533_v28 = vld [vmem:[#allocation9 + $0x1c] ss:$12 sps:$4 sm:$0xff]  }
  0x6a   :  { %v5535_v30 = vld [vmem:[#allocation9 + $0x18] ss:$12 sps:$4 sm:$0xff]   ;;  %v5538_v32 = vld [vmem:[#allocation9] ss:$12 sps:$4 sm:$0xff]   ;;  %v5539_v33 = vld [vmem:[#allocation9 + $0xb0] ss:$12 sps:$4 sm:$0xff]  }
  0x6b   :  { %v5536_v31 = vld [vmem:[#allocation9 + $0x4] ss:$12 sps:$4 sm:$0xff]   ;;  %5205 = vmatprep.subr.bf16.mxu1 %v5539_v33  ;;  %v4786_v47 = vld [vmem:[#allocation6] ss:$0 sm:$0xff]  ;;  %v4787_v51 = vld [vmem:[#allocation8] ss:$0 sm:$0xff] }
  0x6c   :  { %414 = vmatpush1.bf16.msra.mxu0 %v5520_v19  ;;  %v5540_v34 = vld [vmem:[#allocation9 + $0x98] ss:$12 sps:$4 sm:$0xff]   ;;  %5206 = vmatpush3.bf16.msra.mxu1 %v5539_v33  ;;  %v5541_v53 = vld [vmem:[#allocation9 + $0x80] ss:$12 sps:$4 sm:$0xff]   ;;  %v5542_v57 = vld [vmem:[#allocation9 + $0x68] ss:$12 sps:$4 sm:$0xff]  }
  0x6d   :  { %171 = vadd.xlane.f32.xlu0 %v163_v2  ;;  %415 = vmatprep.subr.bf16.mxu0 %v5521_v20  ;;  %v5543_v58 = vld [vmem:[#allocation9 + $0x50] ss:$12 sps:$4 sm:$0xff]   ;;  %v5544_v59 = vld [vmem:[#allocation9 + $0x38] ss:$12 sps:$4 sm:$0xff]   ;;  %v5545_v60 = vld [vmem:[#allocation9 + $0x20] ss:$12 sps:$4 sm:$0xff]  }
  0x6e   :  { %5207 = vmatprep.subr.bf16.mxu1 %v5540_v34  ;;  %v5546_v61 = vld [vmem:[#allocation9 + $0x8] ss:$12 sps:$4 sm:$0xff]   ;;  %vm6058_vm2 = vmmov 0   ;;  %s6059_s17 = smov 32   ;;  %vm842_vm3 = vcmask 523520   ;;  %vm1014_vm4 = vcmask 785920  }
  0x6f   :  { %vm1186_vm5 = vcmask 1048320  }
  0x70   :  { %416 = vmatpush1.bf16.msra.mxu0 %v5523_v21  ;;  %5208 = vmatpush3.bf16.msra.mxu1 %v5540_v34 }
  0x71   :  { %417 = vmatprep.subr.bf16.mxu0 %v5524_v22  ;;  %5209 = vmatprep.subr.bf16.mxu1 %v5541_v53 }
  0x74   :  { %418 = vmatpush1.bf16.msra.mxu0 %v5526_v23  ;;  %5210 = vmatpush3.bf16.msra.mxu1 %v5541_v53 }
  0x75   :  { %419 = vmatprep.subr.bf16.mxu0 %v5527_v24  ;;  %5211 = vmatprep.subr.bf16.mxu1 %v5542_v57 }
  0x78   :  { %420 = vmatpush1.bf16.msra.mxu0 %v5529_v25  ;;  %5212 = vmatpush3.bf16.msra.mxu1 %v5542_v57 }
  0x79   :  { %421 = vmatprep.subr.bf16.mxu0 %v5530_v26  ;;  %5213 = vmatprep.subr.bf16.mxu1 %v5543_v58 }
  0x7c   :  { %422 = vmatpush1.bf16.msra.mxu0 %v5532_v27  ;;  %5214 = vmatpush3.bf16.msra.mxu1 %v5543_v58 }
  0x7d   :  { %423 = vmatprep.subr.bf16.mxu0 %v5533_v28  ;;  %5215 = vmatprep.subr.bf16.mxu1 %v5544_v59  ;;  %v6056_v28 = vmov 0.0  }
  0x80   :  { %424 = vmatpush1.bf16.msra.mxu0 %v5535_v30  ;;  %5216 = vmatpush3.bf16.msra.mxu1 %v5544_v59 }
  0x81   :  { %425 = vmatprep.subr.bf16.mxu0 %v5536_v31  ;;  %5217 = vmatprep.subr.bf16.mxu1 %v5545_v60 }
  0x84   :  { %426 = vmatpush1.bf16.msra.mxu0 %v5538_v32  ;;  %5218 = vmatpush3.bf16.msra.mxu1 %v5545_v60 }
  0x85   :  { %5219 = vmatprep.subr.bf16.mxu1 %v5546_v61 }
  0x88   :  { %5220 = vmatpush3.bf16.msra.mxu1 %v5546_v61 }
  0xee   :  { %v168_v5 = vpop.xlane.xlu0 %167 }
  0xef   :  { %v176_v6 = vmul.f32 0.0078125, %v168_v5 }
  0xf1   :  { %v6184_v7 = vsub.f32 %v161_v0, %v176_v6 }
  0xf2   :  { %v170_v8 = vpop.xlane.xlu0 %169 }
  0xf3   :  { %v177_v9 = vmul.f32 0.0078125, %v170_v8  ;;  %v184_v10 = vmul.f32 %v6184_v7, %v6184_v7 }
  0xf5   :  { %188 = vadd.xlane.f32.xlu1 %v184_v10  ;;  %v6188_v11 = vsub.f32 %v162_v1, %v177_v9 }
  0xf6   :  { %v172_v12 = vpop.xlane.xlu0 %171 }
  0xf7   :  { %v185_v13 = vmul.f32 %v6188_v11, %v6188_v11  ;;  %v178_v14 = vmul.f32 0.0078125, %v172_v12 }
  0xf9   :  { %190 = vadd.xlane.f32.xlu1 %v185_v13  ;;  %v6192_v15 = vsub.f32 %v163_v2, %v178_v14  ;;  %v268_v13 = vlaneseq }
  0xfb   :  { %v186_v17 = vmul.f32 %v6192_v15, %v6192_v15  ;;  %v6201_v14 = vshrl.u32 %v268_v13, 7 }
  0xfd   :  { %173 = vadd.xlane.f32.xlu1 %v164_v16  ;;  %192 = vadd.xlane.f32.xlu0 %v186_v17  ;;  %v266_v17 = vld [vmem:[%s6921_s4] sm:$0x7]  ;;  %v6216_v20 = vsub.s32 1, %v6201_v14  ;;  %v278_v30 = vsub.s32 2, %v6201_v14 }
  0xff   :  { %v6221_v23 = vrot.slane %v266_v17, %v6216_v20  ;;  %v279_v31 = vrot.slane %v266_v17, %v278_v30 }
 0x17e   :  { %v189_v35 = vpop.xlane.xlu1 %188 }
 0x17f   :  { %v196_v36 = vmul.f32 0.0078125, %v189_v35 }
 0x181   :  { %v200_v37 = vadd.f32 1e-05, %v196_v36 }
 0x182   :  { %v191_v38 = vpop.xlane.xlu1 %190 }
 0x183   :  { %5675 = vrsqrt.f32 %v200_v37  ;;  %v197_v39 = vmul.f32 0.0078125, %v191_v38 }
 0x185   :  { %v201_v40 = vadd.f32 1e-05, %v197_v39 }
 0x186   :  { %v174_v41 = vpop.xlane.xlu1 %173  ;;  %v193_v62 = vpop.xlane.xlu0 %192 }
 0x187   :  { %5677 = vrsqrt.f32 %v201_v40  ;;  %v179_v42 = vmul.f32 0.0078125, %v174_v41  ;;  %v198_v63 = vmul.f32 0.0078125, %v193_v62 }
 0x189   :  { %v183_v43 = vsub.f32 %v164_v16, %v179_v42  ;;  %v202_v0 = vadd.f32 1e-05, %v198_v63  ;;  %v6204_v16 = vsub.s32 0, %v6201_v14 }
 0x18b   :  { %v187_v44 = vmul.f32 %v183_v43, %v183_v43  ;;  %5679 = vrsqrt.f32 %v202_v0 }
 0x18d   :  { %194 = vadd.xlane.f32.xlu1 %v187_v44 }
 0x190   :  { %v5676_v45 = vpop.eup %5675 }
 0x191   :  { %v208_v46 = vmul.f32 %v5676_v45, %v6184_v7 }
 0x193   :  { %v218_v50 = vmul.f32 %v4786_v47, %v208_v46 }
 0x194   :  { %v5678_v48 = vpop.eup %5677 }
 0x195   :  { %v209_v49 = vmul.f32 %v5678_v48, %v6188_v11  ;;  %v228_v54 = vadd.f32 %v4787_v51, %v218_v50 }
 0x197   :  { %v219_v52 = vmul.f32 %v4786_v47, %v209_v49 }
 0x198   :  { %v5680_v4 = vpop.eup %5679 }
 0x199   :  { %v229_v55 = vadd.f32 %v4787_v51, %v219_v52  ;;  %v210_v5 = vmul.f32 %v5680_v4, %v6192_v15  ;;  %v6210_v15 = vrot.slane %v266_v17, %v6204_v16 }
 0x19b   :  { %v232_v56 = vpack.c.bf16 %v229_v55, %v228_v54  ;;  %v220_v8 = vmul.f32 %v4786_v47, %v210_v5 }
 0x19d   :  { %444 = vmatmul.mubr.bf16.vlgmr.msra.gmra.mxu0 %v232_v56  ;;  %5221 = vmatprep.mubr.bf16.mxu1 %v232_v56  ;;  %v230_v10 = vadd.f32 %v4787_v51, %v220_v8 }
 0x19e   :  { %453 = vmatprep.mubr.bf16.mxu0 %v6055_v29 }
 0x216   :  { %v195_v1 = vpop.xlane.xlu1 %194 }
 0x217   :  { %v199_v2 = vmul.f32 0.0078125, %v195_v1 }
 0x219   :  { %v203_v3 = vadd.f32 1e-05, %v199_v2 }
 0x21b   :  { %5681 = vrsqrt.f32 %v203_v3 }
 0x228   :  { %v5682_v6 = vpop.eup %5681 }
 0x229   :  { %v211_v7 = vmul.f32 %v5682_v6, %v183_v43 }
 0x22b   :  { %v221_v9 = vmul.f32 %v4786_v47, %v211_v7 }
 0x22d   :  { %v231_v11 = vadd.f32 %v4787_v51, %v221_v9 }
 0x22f   :  { %v233_v12 = vpack.c.bf16 %v231_v11, %v230_v10 }
 0x231   :  { %454 = vmatmul.mubr.bf16.gmra.mxu0 %v233_v12  ;;  %5222 = vmatmul.mubr.bf16.vlgmr.msra.gmra.mxu1 %v233_v12 }
 0x25d   :  { %v445_v18 = vpop.f32.mrf.mxu0 }
 0x25e   :  { %v6213_v19 = vadd.f32 %v445_v18, %v6210_v15 }
 0x25f   :  { %v447_v21 = vpop.f32.mrf.mxu0 }
 0x260   :  { %5229 = vmatprep.mubr.msk.f32.mxu0 %vm513_vm0, %v6213_v19  ;;  %v6227_v26 = vadd.f32 %v447_v21, %v6221_v23 }
 0x261   :  { %v449_v22 = vpop.f32.mrf.mxu0 }
 0x262   :  { %v6238_v27 = vadd.f32 %v449_v22, %v6210_v15 }
 0x263   :  { %v451_v24 = vpop.f32.mrf.mxu0 }
 0x264   :  { %v6224_v25 = vadd.f32 %v451_v24, %v6221_v23 }
 0x266   :  { %5225 = vmatprep.subr.msk.mxu0 %vm513_vm0, %v6224_v25 }
 0x267   :  { %5226 = vmatpush3.xpose.msk.msra.mxu0 %vm513_vm0, %v6224_v25 }
 0x268   :  { %5227 = vmatprep.subr.msk.mxu0 %vm513_vm0, %v6227_v26 }
 0x26b   :  { %5228 = vmatpush3.xpose.msk.msra.mxu0 %vm513_vm0, %v6227_v26 }
 0x26c   :  { %5232 = vmatprep.subr.bf16.mxu0 %v6056_v28 }
 0x26e   :  { %5230 = vmatmul.mubr.msk.f32.vlgmr.msra.gmra.mxu0 %vm513_vm0, %v6238_v27 }
 0x26f   :  { %5234 = vmatprep.mubr.msk.bf16.mxu0 %vm6058_vm2, %v6056_v28 }
 0x2f1   :  { %v5223_v32 = vpop.f32.mrf.mxu1  ;;  %v6251_v42 = vpop.f32.mrf.mxu0 }
 0x2f2   :  { %v507_v33 = vadd.f32 %v5223_v32, %v279_v31 }
 0x2f3   :  { %v498_v34 = vpop.f32.mrf.mxu1  ;;  %v6253_v43 = vpop.f32.mrf.mxu0 }
 0x2f4   :  { %v499_v38 = vadd.f32 %v498_v34, %v279_v31 }
 0x2f5   :  { %v5224_v35 = vpop.f32.mrf.mxu1  ;;  %v6255_v44 = vpop.f32.mrf.mxu0 }
 0x2f6   :  { %v510_v36 = vadd.f32 %v5224_v35, %v279_v31 }
 0x2f7   :  { %v501_v37 = vpop.f32.mrf.mxu1  ;;  %v6257_v45 = vpop.f32.mrf.mxu0 }
 0x2f8   :  { %v6246_v39 = vpack.c.bf16 %v510_v36, %v507_v33  ;;  %v502_v40 = vadd.f32 %v501_v37, %v279_v31 }
 0x2fa   :  { %v6248_v41 = vpack.c.bf16 %v502_v40, %v499_v38 }
 0x2fc   :  { %5233 = vmatpush3.bf16.msra.mxu0 %v6248_v41 }
 0x32e   :  { %v5231_v46 = vpop.f32.mrf.mxu0 }
 0x32f   :  { %v605_v47 = vsel %vm601_vm1, %v5231_v46, -inf }
 0x330   :  { %606 = vmax.xlane.f32.xlu1 %v605_v47  ;;  %v592_v48 = vpop.f32.mrf.mxu0 }
 0x331   :  { %v602_v49 = vsel %vm601_vm1, %v592_v48, -inf }
 0x332   :  { %603 = vmax.xlane.f32.xlu0 %v602_v49 }
 0x3b9   :  { %v607_v50 = vpop.xlane.xlu1 %606 }
 0x3ba   :  { %v609_v51 = vsub.f32 %v5231_v46, %v607_v50 }
 0x3bb   :  { %v604_v52 = vpop.xlane.xlu0 %603 }
 0x3bc   :  { %v612_v53 = vmul.f32 1.442695, %v609_v51  ;;  %v608_v54 = vsub.f32 %v592_v48, %v604_v52 }
 0x3be   :  { %5683 = vpow2.f32 %v612_v53  ;;  %v610_v55 = vmul.f32 1.442695, %v608_v54 }
 0x3c0   :  { %5685 = vpow2.f32 %v610_v55 }
 0x3cb   :  { %v5684_v56 = vpop.eup %5683 }
 0x3cc   :  { %v617_v57 = vsel %vm601_vm1, %v5684_v56, 0.0 }
 0x3cd   :  { %v5686_v58 = vpop.eup %5685  ;;  %618 = vadd.xlane.f32.xlu1 %v617_v57 }
 0x3ce   :  { %v614_v59 = vsel %vm601_vm1, %v5686_v58, 0.0 }
 0x3cf   :  { %615 = vadd.xlane.f32.xlu0 %v614_v59 }
 0x3de   :  { %676 = vrot.lane.b32.xlu1 %v6227_v26, %s6057_s6 }
 0x3e2   :  { %672 = vrot.lane.b32.xlu1 %v6213_v19, %s6057_s6 }
 0x3e5   :  { %678 = vrot.lane.b32.xlu0 %v6224_v25, %s6057_s6 }
 0x3e6   :  { %674 = vrot.lane.b32.xlu1 %v6238_v27, %s6057_s6 }
 0x456   :  { %v619_v60 = vpop.xlane.xlu1 %618 }
 0x457   :  { %5687 = vrcp.f32 %v619_v60 }
 0x458   :  { %v616_v61 = vpop.xlane.xlu0 %615 }
 0x459   :  { %5689 = vrcp.f32 %v616_v61 }
 0x45a   :  { %v677_v0 = vpop.permute.xlu1 %676 }
 0x45c   :  { %v679_v62 = vpop.permute.xlu0 %678 }
 0x45d   :  { %5238 = vmatprep.subr.msk.mxu0 %vm513_vm0, %v679_v62 }
 0x45e   :  { %v673_v5 = vpop.permute.xlu1 %672 }
 0x462   :  { %v675_v6 = vpop.permute.xlu1 %674 }
 0x464   :  { %v5688_v63 = vpop.eup %5687 }
 0x465   :  { %v623_v3 = vmul.f32 %v5688_v63, %v5684_v56 }
 0x466   :  { %v5690_v1 = vpop.eup %5689 }
 0x467   :  { %v622_v2 = vmul.f32 %v5690_v1, %v5686_v58 }
 0x469   :  { %v624_v4 = vpack.c.bf16 %v623_v3, %v622_v2 }
 0x46b   :  { %5235 = vmatmul.mubr.msk.bf16.vlgmr.msra.gmra.mxu0 %vm601_vm1, %v624_v4 }
 0x46c   :  { %5239 = vmatpush3.xpose.msk.msra.mxu0 %vm513_vm0, %v679_v62  ;;  %5242 = vmatprep.mubr.msk.f32.mxu0 %vm513_vm0, %v673_v5 }
 0x46d   :  { %5240 = vmatprep.subr.msk.mxu0 %vm513_vm0, %v677_v0 }
 0x470   :  { %5241 = vmatpush3.xpose.msk.msra.mxu0 %vm513_vm0, %v677_v0 }
 0x471   :  { %5245 = vmatprep.subr.bf16.mxu0 %v6056_v28 }
 0x473   :  { %5243 = vmatmul.mubr.msk.f32.vlgmr.msra.gmra.mxu0 %vm513_vm0, %v675_v6 }
 0x474   :  { %5247 = vmatprep.mubr.msk.bf16.mxu0 %vm6058_vm2, %v6056_v28 }
 0x52b   :  { %v663_v7 = vpop.f32.mrf.mxu0 }
 0x52c   :  { %670 = vst.msk [vmem:[#allocation2] sm:$0xff] %vm513_vm0, %v663_v7 }
 0x52d   :  { %v5236_v8 = vpop.f32.mrf.mxu0 }
 0x52f   :  { %v666_v9 = vpop.f32.mrf.mxu0 }
 0x530   :  { %671 = vst.msk [vmem:[#allocation2 + $0x8] sm:$0xff] %vm513_vm0, %v666_v9 }
 0x531   :  { %v5237_v10 = vpop.f32.mrf.mxu0 }
 0x533   :  { %v5244_v11 = vpop.f32.mrf.mxu0 }
 0x534   :  { %v766_v12 = vsel %vm601_vm1, %v5244_v11, -inf }
 0x535   :  { %767 = vmax.xlane.f32.xlu1 %v766_v12  ;;  %v754_v13 = vpop.f32.mrf.mxu0 }
 0x536   :  { %v763_v17 = vsel %vm601_vm1, %v754_v13, -inf }
 0x537   :  { %764 = vmax.xlane.f32.xlu0 %v763_v17 }
 0x546   :  { %851 = vrot.lane.b32.xlu1 %v6224_v25, %s6051_s1 }
 0x54a   :  { %1023 = vrot.lane.b32.xlu1 %v6224_v25, %s6059_s17 }
 0x54d   :  { %787 = vrot.lane.b32.xlu0 %v6248_v41, %s6057_s6 }
 0x54e   :  { %849 = vrot.lane.b32.xlu1 %v6227_v26, %s6051_s1 }
 0x552   :  { %845 = vrot.lane.b32.xlu1 %v6213_v19, %s6051_s1 }
 0x556   :  { %1017 = vrot.lane.b32.xlu1 %v6213_v19, %s6059_s17 }
 0x5be   :  { %v768_v18 = vpop.xlane.xlu1 %767 }
 0x5bf   :  { %v770_v21 = vsub.f32 %v5244_v11, %v768_v18 }
 0x5c0   :  { %v765_v22 = vpop.xlane.xlu0 %764 }
 0x5c1   :  { %v773_v24 = vmul.f32 1.442695, %v770_v21  ;;  %v769_v31 = vsub.f32 %v754_v13, %v765_v22  ;;  %v6340_v22 = vadd.f32 %v6257_v45, %v6221_v23 }
 0x5c2   :  { %v852_v32 = vpop.permute.xlu1 %851 }
 0x5c3   :  { %5691 = vpow2.f32 %v773_v24  ;;  %v771_v25 = vmul.f32 1.442695, %v769_v31  ;;  %5251 = vmatprep.subr.msk.mxu1 %vm513_vm0, %v852_v32 }
 0x5c4   :  { %5252 = vmatpush3.xpose.msk.msra.mxu1 %vm513_vm0, %v852_v32  ;;  %v788_v33 = vpop.permute.xlu0 %787 }
 0x5c5   :  { %5693 = vpow2.f32 %v771_v25  ;;  %5246 = vmatpush3.bf16.msra.mxu0 %v788_v33  ;;  %v6349_v33 = vadd.f32 %v6255_v44, %v6210_v15 }
 0x5c6   :  { %v1024_v34 = vpop.permute.xlu1 %1023 }
 0x5c7   :  { %5264 = vmatprep.subr.msk.mxu0 %vm513_vm0, %v1024_v34 }
 0x5ca   :  { %v850_v35 = vpop.permute.xlu1 %849 }
 0x5cb   :  { %5253 = vmatprep.subr.msk.mxu1 %vm513_vm0, %v850_v35 }
 0x5cc   :  { %5254 = vmatpush3.xpose.msk.msra.mxu1 %vm513_vm0, %v850_v35  ;;  %v6356_v35 = vadd.f32 %v6253_v43, %v6221_v23 }
 0x5cd   :  { %5258 = vmatprep.subr.bf16.mxu1 %v6056_v28 }
 0x5ce   :  { %v846_v19 = vpop.permute.xlu1 %845 }
 0x5cf   :  { %5255 = vmatprep.mubr.msk.f32.mxu1 %vm513_vm0, %v846_v19 }
 0x5d0   :  { %v5692_v36 = vpop.eup %5691 }
 0x5d1   :  { %v778_v37 = vsel %vm601_vm1, %v5692_v36, 0.0 }
 0x5d2   :  { %v5694_v38 = vpop.eup %5693  ;;  %779 = vadd.xlane.f32.xlu0 %v778_v37  ;;  %v1018_v54 = vpop.permute.xlu1 %1017 }
 0x5d3   :  { %v775_v40 = vsel %vm601_vm1, %v5694_v38, 0.0 }
 0x5d6   :  { %776 = vadd.xlane.f32.xlu0 %v775_v40 }
 0x5ec   :  { %1021 = vrot.lane.b32.xlu0 %v6227_v26, %s6059_s17 }
 0x5f0   :  { %847 = vrot.lane.b32.xlu0 %v6238_v27, %s6051_s1 }
 0x5f4   :  { %1019 = vrot.lane.b32.xlu0 %v6238_v27, %s6059_s17 }
 0x65b   :  { %v780_v46 = vpop.xlane.xlu0 %779 }
 0x65c   :  { %5695 = vrcp.f32 %v780_v46 }
 0x65f   :  { %v777_v47 = vpop.xlane.xlu0 %776 }
 0x660   :  { %5697 = vrcp.f32 %v777_v47 }
 0x663   :  { %v1022_v48 = vpop.permute.xlu0 %1021 }
 0x667   :  { %v848_v49 = vpop.permute.xlu0 %847 }
 0x668   :  { %5256 = vmatmul.mubr.msk.f32.vlgmr.msra.gmra.mxu1 %vm513_vm0, %v848_v49 }
 0x669   :  { %5260 = vmatprep.mubr.msk.bf16.mxu1 %vm6058_vm2, %v6056_v28  ;;  %v5696_v50 = vpop.eup %5695 }
 0x66a   :  { %v784_v52 = vmul.f32 %v5696_v50, %v5692_v36 }
 0x66b   :  { %v1020_v27 = vpop.permute.xlu0 %1019 }
 0x66d   :  { %v5698_v51 = vpop.eup %5697 }
 0x66e   :  { %v783_v26 = vmul.f32 %v5698_v51, %v5694_v38 }
 0x670   :  { %v785_v53 = vpack.c.bf16 %v784_v52, %v783_v26 }
 0x672   :  { %5248 = vmatmul.mubr.msk.bf16.vlgmr.msra.gmra.mxu0 %vm601_vm1, %v785_v53 }
 0x673   :  { %5265 = vmatpush3.xpose.msk.msra.mxu0 %vm513_vm0, %v1024_v34  ;;  %5268 = vmatprep.mubr.msk.f32.mxu0 %vm513_vm0, %v1018_v54 }
 0x674   :  { %5266 = vmatprep.subr.msk.mxu0 %vm513_vm0, %v1022_v48 }
 0x677   :  { %5267 = vmatpush3.xpose.msk.msra.mxu0 %vm513_vm0, %v1022_v48 }
 0x678   :  { %5271 = vmatprep.subr.bf16.mxu0 %v6056_v28 }
 0x67a   :  { %5269 = vmatmul.mubr.msk.f32.vlgmr.msra.gmra.mxu0 %vm513_vm0, %v1020_v27 }
 0x67b   :  { %5273 = vmatprep.mubr.msk.bf16.mxu0 %vm6058_vm2, %v6056_v28 }
 0x728   :  { %v5257_v55 = vpop.f32.mrf.mxu1 }
 0x729   :  { %v939_v56 = vsel %vm601_vm1, %v5257_v55, -inf }
 0x72a   :  { %940 = vmax.xlane.f32.xlu0 %v939_v56  ;;  %v927_v57 = vpop.f32.mrf.mxu1 }
 0x72b   :  { %v936_v58 = vsel %vm601_vm1, %v927_v57, -inf }
 0x72c   :  { %937 = vmax.xlane.f32.xlu1 %v936_v58 }
 0x732   :  { %v6328_v59 = vpop.f32.mrf.mxu0 }
 0x734   :  { %v5249_v60 = vpop.f32.mrf.mxu0 }
 0x736   :  { %v6330_v61 = vpop.f32.mrf.mxu0 }
 0x738   :  { %v5250_v62 = vpop.f32.mrf.mxu0 }
 0x73a   :  { %v5270_v63 = vpop.f32.mrf.mxu0 }
 0x73b   :  { %v1111_v2 = vsel %vm601_vm1, %v5270_v63, -inf }
 0x73c   :  { %v1099_v0 = vpop.f32.mrf.mxu0 }
 0x73d   :  { %v1108_v1 = vsel %vm601_vm1, %v1099_v0, -inf }
 0x73e   :  { %1109 = vmax.xlane.f32.xlu0 %v1108_v1 }
 0x742   :  { %1112 = vmax.xlane.f32.xlu0 %v1111_v2 }
 0x7b3   :  { %v941_v3 = vpop.xlane.xlu0 %940 }
 0x7b4   :  { %v943_v4 = vsub.f32 %v5257_v55, %v941_v3 }
 0x7b5   :  { %v938_v5 = vpop.xlane.xlu1 %937 }
 0x7b6   :  { %v946_v6 = vmul.f32 1.442695, %v943_v4  ;;  %v942_v7 = vsub.f32 %v927_v57, %v938_v5 }
 0x7b8   :  { %5699 = vpow2.f32 %v946_v6  ;;  %v944_v8 = vmul.f32 1.442695, %v942_v7 }
 0x7ba   :  { %5701 = vpow2.f32 %v944_v8 }
 0x7c5   :  { %v5700_v9 = vpop.eup %5699 }
 0x7c6   :  { %v951_v10 = vsel %vm601_vm1, %v5700_v9, 0.0 }
 0x7c7   :  { %v5702_v11 = vpop.eup %5701  ;;  %952 = vadd.xlane.f32.xlu0 %v951_v10  ;;  %v1110_v12 = vpop.xlane.xlu0 %1109 }
 0x7c8   :  { %v948_v13 = vsel %vm601_vm1, %v5702_v11, 0.0  ;;  %v1114_v32 = vsub.f32 %v1099_v0, %v1110_v12 }
 0x7c9   :  { %949 = vadd.xlane.f32.xlu1 %v948_v13 }
 0x7ca   :  { %v1116_v25 = vmul.f32 1.442695, %v1114_v32 }
 0x7cb   :  { %v1113_v17 = vpop.xlane.xlu0 %1112 }
 0x7cc   :  { %v1115_v18 = vsub.f32 %v5270_v63, %v1113_v17 }
 0x7ce   :  { %v1118_v21 = vmul.f32 1.442695, %v1115_v18 }
 0x7d0   :  { %5703 = vpow2.f32 %v1118_v21 }
 0x7d1   :  { %5705 = vpow2.f32 %v1116_v25 }
 0x7da   :  { %959 = vrot.lane.b32.xlu1 %v6248_v41, %s6051_s1 }
 0x7dd   :  { %v5704_v24 = vpop.eup %5703 }
 0x7de   :  { %1352 = vrot.lane.b32.xlu1 %v6340_v22, %s6057_s6  ;;  %v1123_v31 = vsel %vm601_vm1, %v5704_v24, 0.0  ;;  %v5706_v45 = vpop.eup %5705 }
 0x7df   :  { %1124 = vadd.xlane.f32.xlu0 %v1123_v31  ;;  %v1120_v34 = vsel %vm601_vm1, %v5706_v45, 0.0 }
 0x7f5   :  { %1131 = vrot.lane.b32.xlu0 %v6248_v41, %s6059_s17  ;;  %v6362_v41 = vadd.f32 %v6251_v42, %v6210_v15 }
 0x7f9   :  { %1348 = vrot.lane.b32.xlu0 %v6349_v33, %s6057_s6 }
 0x802   :  { %1121 = vadd.xlane.f32.xlu1 %v1120_v34 }
 0x813   :  { %1350 = vrot.lane.b32.xlu1 %v6356_v35, %s6057_s6 }
 0x817   :  { %1346 = vrot.lane.b32.xlu1 %v6362_v41, %s6057_s6 }
 0x850   :  { %v953_v44 = vpop.xlane.xlu0 %952 }
 0x851   :  { %5707 = vrcp.f32 %v953_v44 }
 0x852   :  { %v950_v19 = vpop.xlane.xlu1 %949 }
 0x853   :  { %5709 = vrcp.f32 %v950_v19 }
 0x856   :  { %v960_v36 = vpop.permute.xlu1 %959 }
 0x857   :  { %5259 = vmatpush3.bf16.msra.mxu1 %v960_v36 }
 0x858   :  { %5277 = vmatprep.subr.msk.mxu1 %vm513_vm0, %v6340_v22 }
 0x85a   :  { %v1353_v46 = vpop.permute.xlu1 %1352 }
 0x85e   :  { %v5708_v23 = vpop.eup %5707 }
 0x85f   :  { %v957_v38 = vmul.f32 %v5708_v23, %v5700_v9 }
 0x860   :  { %v5710_v43 = vpop.eup %5709 }
 0x861   :  { %v956_v37 = vmul.f32 %v5710_v43, %v5702_v11 }
 0x863   :  { %v958_v40 = vpack.c.bf16 %v957_v38, %v956_v37 }
 0x865   :  { %5261 = vmatmul.mubr.msk.bf16.vlgmr.msra.gmra.mxu1 %vm601_vm1, %v958_v40 }
 0x866   :  { %5278 = vmatpush3.xpose.msk.msra.mxu1 %vm513_vm0, %v6340_v22  ;;  %5281 = vmatprep.mubr.msk.f32.mxu1 %vm513_vm0, %v6362_v41 }
 0x867   :  { %5279 = vmatprep.subr.msk.mxu1 %vm513_vm0, %v6356_v35 }
 0x868   :  { %v1125_v15 = vpop.xlane.xlu0 %1124 }
 0x869   :  { %5711 = vrcp.f32 %v1125_v15 }
 0x86a   :  { %5280 = vmatpush3.xpose.msk.msra.mxu1 %vm513_vm0, %v6356_v35 }
 0x86b   :  { %5284 = vmatprep.subr.bf16.mxu1 %v6056_v28 }
 0x86c   :  { %v1132_v42 = vpop.permute.xlu0 %1131 }
 0x86d   :  { %5272 = vmatpush3.bf16.msra.mxu0 %v1132_v42  ;;  %5282 = vmatmul.mubr.msk.f32.vlgmr.msra.gmra.mxu1 %vm513_vm0, %v6349_v33 }
 0x86e   :  { %5285 = vmatpush3.bf16.msra.mxu1 %v6246_v39  ;;  %5290 = vmatprep.subr.msk.mxu0 %vm513_vm0, %v1353_v46 }
 0x86f   :  { %5286 = vmatprep.mubr.msk.bf16.mxu1 %vm6058_vm2, %v6056_v28 }
 0x870   :  { %v1349_v54 = vpop.permute.xlu0 %1348 }
 0x876   :  { %v5712_v48 = vpop.eup %5711 }
 0x877   :  { %v1129_v26 = vmul.f32 %v5712_v48, %v5704_v24 }
 0x88b   :  { %v1122_v47 = vpop.xlane.xlu1 %1121 }
 0x88c   :  { %5713 = vrcp.f32 %v1122_v47 }
 0x88f   :  { %v1351_v49 = vpop.permute.xlu1 %1350 }
 0x893   :  { %v1347_v53 = vpop.permute.xlu1 %1346 }
 0x899   :  { %v5714_v50 = vpop.eup %5713 }
 0x89a   :  { %v1128_v51 = vmul.f32 %v5714_v50, %v5706_v45 }
 0x89c   :  { %v1130_v52 = vpack.c.bf16 %v1129_v26, %v1128_v51 }
 0x89e   :  { %5274 = vmatmul.mubr.msk.bf16.vlgmr.msra.gmra.mxu0 %vm601_vm1, %v1130_v52 }
 0x89f   :  { %5291 = vmatpush3.xpose.msk.msra.mxu0 %vm513_vm0, %v1353_v46  ;;  %5294 = vmatprep.mubr.msk.f32.mxu0 %vm513_vm0, %v1347_v53 }
 0x8a0   :  { %5292 = vmatprep.subr.msk.mxu0 %vm513_vm0, %v1351_v49 }
 0x8a3   :  { %5293 = vmatpush3.xpose.msk.msra.mxu0 %vm513_vm0, %v1351_v49 }
 0x8a4   :  { %5297 = vmatprep.subr.bf16.mxu0 %v6056_v28 }
 0x8a6   :  { %5295 = vmatmul.mubr.msk.f32.vlgmr.msra.gmra.mxu0 %vm513_vm0, %v1349_v54 }
 0x8a7   :  { %5299 = vmatprep.mubr.msk.bf16.mxu0 %vm6058_vm2, %v6056_v28 }
 0x925   :  { %v6393_v27 = vpop.f32.mrf.mxu1 }
 0x927   :  { %v5262_v55 = vpop.f32.mrf.mxu1 }
 0x929   :  { %v6395_v56 = vpop.f32.mrf.mxu1 }
 0x92b   :  { %v5263_v57 = vpop.f32.mrf.mxu1 }
 0x92d   :  { %v5283_v58 = vpop.f32.mrf.mxu1 }
 0x92e   :  { %v1279_v60 = vsel %vm601_vm1, %v5283_v58, -inf }
 0x92f   :  { %1280 = vmax.xlane.f32.xlu0 %v1279_v60  ;;  %v1267_v62 = vpop.f32.mrf.mxu1 }
 0x930   :  { %v1276_v63 = vsel %vm601_vm1, %v1267_v62, -inf }
 0x931   :  { %1277 = vmax.xlane.f32.xlu1 %v1276_v63 }
 0x95e   :  { %v6399_v0 = vpop.f32.mrf.mxu0 }
 0x960   :  { %v5275_v1 = vpop.f32.mrf.mxu0 }
 0x962   :  { %v6401_v2 = vpop.f32.mrf.mxu0 }
 0x964   :  { %v5276_v3 = vpop.f32.mrf.mxu0 }
 0x966   :  { %v5296_v4 = vpop.f32.mrf.mxu0 }
 0x967   :  { %v1440_v7 = vsel %vm601_vm1, %v5296_v4, -inf }
 0x968   :  { %v1428_v5 = vpop.f32.mrf.mxu0 }
 0x969   :  { %v1437_v6 = vsel %vm601_vm1, %v1428_v5, -inf }
 0x96a   :  { %1438 = vmax.xlane.f32.xlu0 %v1437_v6 }
 0x96e   :  { %1441 = vmax.xlane.f32.xlu0 %v1440_v7 }
 0x9b8   :  { %v1281_v8 = vpop.xlane.xlu0 %1280 }
 0x9b9   :  { %v1283_v9 = vsub.f32 %v5283_v58, %v1281_v8 }
 0x9ba   :  { %v1278_v10 = vpop.xlane.xlu1 %1277 }
 0x9bb   :  { %v1286_v11 = vmul.f32 1.442695, %v1283_v9  ;;  %v1282_v12 = vsub.f32 %v1267_v62, %v1278_v10 }
 0x9bd   :  { %5715 = vpow2.f32 %v1286_v11  ;;  %v1284_v13 = vmul.f32 1.442695, %v1282_v12 }
 0x9bf   :  { %5717 = vpow2.f32 %v1284_v13 }
 0x9ca   :  { %v5716_v17 = vpop.eup %5715 }
 0x9cb   :  { %v1291_v18 = vsel %vm601_vm1, %v5716_v17, 0.0 }
 0x9cc   :  { %v5718_v21 = vpop.eup %5717  ;;  %1292 = vadd.xlane.f32.xlu0 %v1291_v18 }
 0x9cd   :  { %v1288_v24 = vsel %vm601_vm1, %v5718_v21, 0.0 }
 0x9ce   :  { %1289 = vadd.xlane.f32.xlu1 %v1288_v24 }
 0x9df   :  { %1461 = vrot.lane.b32.xlu1 %v6246_v39, %s6057_s6 }
 0x9e3   :  { %1695 = vrot.lane.b32.xlu1 %v6340_v22, %s6059_s17 }
 0x9e7   :  { %1522 = vrot.lane.b32.xlu1 %v6356_v35, %s6051_s1 }
 0x9eb   :  { %1693 = vrot.lane.b32.xlu1 %v6356_v35, %s6059_s17 }
 0x9f3   :  { %v1439_v31 = vpop.xlane.xlu0 %1438 }
 0x9f4   :  { %v1443_v32 = vsub.f32 %v1428_v5, %v1439_v31 }
 0x9f6   :  { %v1445_v34 = vmul.f32 1.442695, %v1443_v32 }
 0x9f7   :  { %v1442_v25 = vpop.xlane.xlu0 %1441 }
 0x9f8   :  { %v1444_v45 = vsub.f32 %v5296_v4, %v1442_v25 }
 0x9fa   :  { %v1447_v44 = vmul.f32 1.442695, %v1444_v45 }
 0x9fc   :  { %5719 = vpow2.f32 %v1447_v44 }
 0x9fd   :  { %5721 = vpow2.f32 %v1445_v34 }
 0xa09   :  { %v5720_v19 = vpop.eup %5719 }
 0xa0a   :  { %v1452_v36 = vsel %vm601_vm1, %v5720_v19, 0.0  ;;  %v5722_v23 = vpop.eup %5721 }
 0xa0b   :  { %1453 = vadd.xlane.f32.xlu0 %v1452_v36  ;;  %v1449_v43 = vsel %vm601_vm1, %v5722_v23, 0.0 }
 0xa0f   :  { %1450 = vadd.xlane.f32.xlu1 %v1449_v43 }
 0xa20   :  { %1520 = vrot.lane.b32.xlu1 %v6349_v33, %s6051_s1 }
 0xa21   :  { %1524 = vrot.lane.b32.xlu0 %v6340_v22, %s6051_s1 }
 0xa24   :  { %1691 = vrot.lane.b32.xlu1 %v6349_v33, %s6059_s17 }
 0xa25   :  { %1518 = vrot.lane.b32.xlu0 %v6362_v41, %s6051_s1 }
 0xa29   :  { %1689 = vrot.lane.b32.xlu0 %v6362_v41, %s6059_s17 }
 0xa55   :  { %v1293_v35 = vpop.xlane.xlu0 %1292 }
 0xa56   :  { %5723 = vrcp.f32 %v1293_v35 }
 0xa57   :  { %v1290_v37 = vpop.xlane.xlu1 %1289 }
 0xa58   :  { %5725 = vrcp.f32 %v1290_v37 }
 0xa5b   :  { %v1462_v38 = vpop.permute.xlu1 %1461 }
 0xa5c   :  { %5298 = vmatpush3.bf16.msra.mxu0 %v1462_v38 }
 0xa5f   :  { %v1696_v40 = vpop.permute.xlu1 %1695 }
 0xa60   :  { %5316 = vmatprep.subr.msk.mxu0 %vm513_vm0, %v1696_v40 }
 0xa63   :  { %v5724_v15 = vpop.eup %5723  ;;  %v1523_v47 = vpop.permute.xlu1 %1522 }
 0xa64   :  { %v1297_v46 = vmul.f32 %v5724_v15, %v5716_v17 }
 0xa65   :  { %v5726_v22 = vpop.eup %5725 }
 0xa66   :  { %v1296_v42 = vmul.f32 %v5726_v22, %v5718_v21 }
 0xa67   :  { %v1694_v48 = vpop.permute.xlu1 %1693 }
 0xa68   :  { %v1298_v33 = vpack.c.bf16 %v1297_v46, %v1296_v42 }
 0xa6a   :  { %5287 = vmatmul.mubr.msk.bf16.vlgmr.msra.gmra.mxu1 %vm601_vm1, %v1298_v33 }
 0xa94   :  { %v1454_v49 = vpop.xlane.xlu0 %1453 }
 0xa95   :  { %5727 = vrcp.f32 %v1454_v49 }
 0xa98   :  { %v1525_v41 = vpop.permute.xlu0 %1524  ;;  %v1451_v50 = vpop.xlane.xlu1 %1450 }
 0xa99   :  { %5729 = vrcp.f32 %v1451_v50  ;;  %5303 = vmatprep.subr.msk.mxu1 %vm513_vm0, %v1525_v41 }
 0xa9a   :  { %5304 = vmatpush3.xpose.msk.msra.mxu1 %vm513_vm0, %v1525_v41 }
 0xa9b   :  { %5305 = vmatprep.subr.msk.mxu1 %vm513_vm0, %v1523_v47 }
 0xa9c   :  { %v1519_v51 = vpop.permute.xlu0 %1518  ;;  %v1521_v26 = vpop.permute.xlu1 %1520 }
 0xa9d   :  { %5307 = vmatprep.mubr.msk.f32.mxu1 %vm513_vm0, %v1519_v51 }
 0xa9e   :  { %5306 = vmatpush3.xpose.msk.msra.mxu1 %vm513_vm0, %v1523_v47 }
 0xa9f   :  { %5310 = vmatprep.subr.bf16.mxu1 %v6056_v28 }
 0xaa0   :  { %v1690_v58 = vpop.permute.xlu0 %1689  ;;  %v1692_v60 = vpop.permute.xlu1 %1691 }
 0xaa1   :  { %5308 = vmatmul.mubr.msk.f32.vlgmr.msra.gmra.mxu1 %vm513_vm0, %v1521_v26 }
 0xaa2   :  { %5312 = vmatprep.mubr.msk.bf16.mxu1 %vm6058_vm2, %v6056_v28  ;;  %v5728_v52 = vpop.eup %5727 }
 0xaa3   :  { %v1458_v55 = vmul.f32 %v5728_v52, %v5720_v19 }
 0xaa6   :  { %v5730_v53 = vpop.eup %5729 }
 0xaa7   :  { %v1457_v54 = vmul.f32 %v5730_v53, %v5722_v23 }
 0xaa9   :  { %v1459_v57 = vpack.c.bf16 %v1458_v55, %v1457_v54 }
 0xaab   :  { %5300 = vmatmul.mubr.msk.bf16.vlgmr.msra.gmra.mxu0 %vm601_vm1, %v1459_v57 }
 0xaac   :  { %5317 = vmatpush3.xpose.msk.msra.mxu0 %vm513_vm0, %v1696_v40  ;;  %5320 = vmatprep.mubr.msk.f32.mxu0 %vm513_vm0, %v1690_v58 }
 0xaad   :  { %5318 = vmatprep.subr.msk.mxu0 %vm513_vm0, %v1694_v48 }
 0xab0   :  { %5319 = vmatpush3.xpose.msk.msra.mxu0 %vm513_vm0, %v1694_v48 }
 0xab1   :  { %5323 = vmatprep.subr.bf16.mxu0 %v6056_v28 }
 0xab3   :  { %5321 = vmatmul.mubr.msk.f32.vlgmr.msra.gmra.mxu0 %vm513_vm0, %v1692_v60 }
 0xab4   :  { %5325 = vmatprep.mubr.msk.bf16.mxu0 %vm6058_vm2, %v6056_v28 }
 0xb2a   :  { %v1337_v62 = vpop.f32.mrf.mxu1 }
 0xb2b   :  { %1344 = vst.msk [vmem:[#allocation2 + $0x10] sm:$0xff] %vm513_vm0, %v1337_v62 }
 0xb2c   :  { %v5288_v63 = vpop.f32.mrf.mxu1 }
 0xb2e   :  { %v1340_v1 = vpop.f32.mrf.mxu1 }
 0xb2f   :  { %1345 = vst.msk [vmem:[#allocation2 + $0x18] sm:$0xff] %vm513_vm0, %v1340_v1 }
 0xb30   :  { %v5289_v3 = vpop.f32.mrf.mxu1 }
 0xb61   :  { %v5309_v4 = vpop.f32.mrf.mxu1 }
 0xb62   :  { %v1612_v5 = vsel %vm601_vm1, %v5309_v4, -inf }
 0xb63   :  { %1613 = vmax.xlane.f32.xlu1 %v1612_v5  ;;  %v1600_v6 = vpop.f32.mrf.mxu1  ;;  %v5547_v5 = vld [vmem:[#allocation11 + $0x38] sm:$0xff]  }
 0xb64   :  { %v1609_v7 = vsel %vm601_vm1, %v1600_v6, -inf }
 0xb65   :  { %1610 = vmax.xlane.f32.xlu0 %v1609_v7  ;;  %v5549_v7 = vld [vmem:[#allocation11 + $0x28] sm:$0xff]  }
 0xb6b   :  { %v1501_v8 = vpop.f32.mrf.mxu0 }
 0xb6d   :  { %v5301_v9 = vpop.f32.mrf.mxu0 }
 0xb6e   :  { %v5551_v9 = vld [vmem:[#allocation11 + $0x18] sm:$0xff]  }
 0xb6f   :  { %v1504_v10 = vpop.f32.mrf.mxu0 }
 0xb71   :  { %v5302_v11 = vpop.f32.mrf.mxu0 }
 0xb73   :  { %v5322_v12 = vpop.f32.mrf.mxu0 }
 0xb74   :  { %v1783_v18 = vsel %vm601_vm1, %v5322_v12, -inf }
 0xb75   :  { %v1771_v13 = vpop.f32.mrf.mxu0 }
 0xb76   :  { %v1780_v17 = vsel %vm601_vm1, %v1771_v13, -inf }
 0xb77   :  { %1781 = vmax.xlane.f32.xlu0 %v1780_v17 }
 0xb7b   :  { %1784 = vmax.xlane.f32.xlu0 %v1783_v18  ;;  %v5553_v18 = vld [vmem:[#allocation11 + $0x8] sm:$0xff]  }
 0xbec   :  { %v1614_v21 = vpop.xlane.xlu1 %1613 }
 0xbed   :  { %v1616_v24 = vsub.f32 %v5309_v4, %v1614_v21  ;;  %v5554_v21 = vld [vmem:[#allocation11] sm:$0xff]  }
 0xbee   :  { %v1611_v31 = vpop.xlane.xlu0 %1610 }
 0xbef   :  { %v1619_v32 = vmul.f32 1.442695, %v1616_v24  ;;  %v1615_v25 = vsub.f32 %v1600_v6, %v1611_v31  ;;  %v5548_v6 = vld [vmem:[#allocation11 + $0x30] sm:$0xff]  }
 0xbf1   :  { %5731 = vpow2.f32 %v1619_v32  ;;  %v1617_v45 = vmul.f32 1.442695, %v1615_v25 }
 0xbf3   :  { %5733 = vpow2.f32 %v1617_v45 }
 0xbfe   :  { %v5732_v34 = vpop.eup %5731 }
 0xbff   :  { %v1624_v44 = vsel %vm601_vm1, %v5732_v34, 0.0 }
 0xc00   :  { %v5734_v19 = vpop.eup %5733  ;;  %v1782_v36 = vpop.xlane.xlu0 %1781  ;;  %1625 = vadd.xlane.f32.xlu1 %v1624_v44 }
 0xc01   :  { %v1786_v23 = vsub.f32 %v1771_v13, %v1782_v36  ;;  %v1621_v43 = vsel %vm601_vm1, %v5734_v19, 0.0 }
 0xc02   :  { %1622 = vadd.xlane.f32.xlu0 %v1621_v43 }
 0xc03   :  { %v1788_v35 = vmul.f32 1.442695, %v1786_v23 }
 0xc04   :  { %v1785_v37 = vpop.xlane.xlu0 %1784 }
 0xc05   :  { %5735 = vpow2.f32 %v1788_v35  ;;  %v1787_v38 = vsub.f32 %v5322_v12, %v1785_v37  ;;  %v5552_v12 = vld [vmem:[#allocation11 + $0x10] sm:$0xff]   ;;  %v4860_v37 = vld [vmem:[#allocation12] ss:$0 sm:$0xff] }
 0xc07   :  { %v1790_v40 = vmul.f32 1.442695, %v1787_v38  ;;  %v5843_v38 = vld [vmem:[#allocation3 + $0x10] sm:$0xff] }
 0xc09   :  { %5737 = vpow2.f32 %v1790_v40 }
 0xc12   :  { %v5736_v15 = vpop.eup %5735 }
 0xc13   :  { %v1792_v22 = vsel %vm601_vm1, %v5736_v15, 0.0 }
 0xc14   :  { %1793 = vadd.xlane.f32.xlu0 %v1792_v22 }
 0xc16   :  { %v5738_v42 = vpop.eup %5737 }
 0xc17   :  { %v1795_v46 = vsel %vm601_vm1, %v5738_v42, 0.0 }
 0xc18   :  { %1796 = vadd.xlane.f32.xlu1 %v1795_v46 }
 0xc29   :  { %1803 = vrot.lane.b32.xlu1 %v6246_v39, %s6059_s17 }
 0xc2a   :  { %1632 = vrot.lane.b32.xlu0 %v6246_v39, %s6051_s1 }
 0xc2d   :  { %836 = vrot.lane.b32.xlu1 %v6328_v59, %s6059_s17 }
 0xc2e   :  { %1008 = vrot.lane.b32.xlu0 %v6393_v27, %s6051_s1 }
 0xc31   :  { %838 = vrot.lane.b32.xlu1 %v6330_v61, %s6059_s17 }
 0xc32   :  { %1510 = vrot.lane.b32.xlu0 %v1501_v8, %s6059_s17  ;;  %v5550_v8 = vld [vmem:[#allocation11 + $0x20] sm:$0xff]  }
 0xc35   :  { %1010 = vrot.lane.b32.xlu1 %v6395_v56, %s6051_s1 }
 0xc36   :  { %1180 = vrot.lane.b32.xlu0 %v6399_v0, %s6057_s6 }
 0xc39   :  { %1512 = vrot.lane.b32.xlu1 %v1504_v10, %s6059_s17 }
 0xc3d   :  { %1182 = vrot.lane.b32.xlu1 %v6401_v2, %s6057_s6 }
 0xc89   :  { %v1626_v59 = vpop.xlane.xlu1 %1625 }
 0xc8b   :  { %v1623_v39 = vpop.xlane.xlu0 %1622 }
 0xc8c   :  { %5739 = vrcp.f32 %v1623_v39 }
 0xc8d   :  { %5741 = vrcp.f32 %v1626_v59 }
 0xc99   :  { %v5740_v27 = vpop.eup %5739 }
 0xc9a   :  { %v5742_v61 = vpop.eup %5741  ;;  %v1629_v47 = vmul.f32 %v5740_v27, %v5734_v19 }
 0xc9b   :  { %v1630_v56 = vmul.f32 %v5742_v61, %v5732_v34 }
 0xc9d   :  { %v1794_v33 = vpop.xlane.xlu0 %1793  ;;  %v1631_v0 = vpack.c.bf16 %v1630_v56, %v1629_v47  ;;  %v5846_v47 = vld [vmem:[#allocation3 + $0x18] sm:$0xff] }
 0xc9e   :  { %5743 = vrcp.f32 %v1794_v33  ;;  %v5845_v33 = vld [vmem:[#allocation3 + $0x8] sm:$0xff] }
 0xca1   :  { %v1633_v48 = vpop.permute.xlu0 %1632  ;;  %v1797_v49 = vpop.xlane.xlu1 %1796 }
 0xca2   :  { %5745 = vrcp.f32 %v1797_v49  ;;  %5311 = vmatpush3.bf16.msra.mxu1 %v1633_v48 }
 0xca3   :  { %5329 = vmatprep.subr.bf16.mxu1 %v5547_v5 }
 0xca5   :  { %v1009_v41 = vpop.permute.xlu0 %1008  ;;  %5313 = vmatmul.mubr.msk.bf16.vlgmr.msra.gmra.mxu1 %vm601_vm1, %v1631_v0  ;;  %v1804_v50 = vpop.permute.xlu1 %1803  ;;  %v5555_v0 = vld [vmem:[#allocation14 + $0x70] ss:$8 sps:$4 sm:$0xff]  }
 0xca6   :  { %5324 = vmatpush3.bf16.msra.mxu0 %v1804_v50  ;;  %5330 = vmatpush3.bf16.msra.mxu1 %v5547_v5  ;;  %v5566_v5 = vld [vmem:[#allocation14 + $0x44] ss:$8 sps:$4 sm:$0xff]  }
 0xca7   :  { %5331 = vmatprep.subr.bf16.mxu1 %v5548_v6 }
 0xca9   :  { %v1511_v2 = vpop.permute.xlu0 %1510  ;;  %v837_v51 = vpop.permute.xlu1 %836 }
 0xcaa   :  { %1516 = vst.msk [vmem:[#allocation2 + $0x10] sm:$0xff] %vm842_vm3, %v1511_v2  ;;  %843 = vst.msk [vmem:[#allocation2] sm:$0xff] %vm842_vm3, %v837_v51  ;;  %5332 = vmatpush3.bf16.msra.mxu1 %v5548_v6  ;;  %v5564_v6 = vld [vmem:[#allocation14 + $0x40] ss:$8 sps:$4 sm:$0xff]  }
 0xcab   :  { %1015 = vst.msk [vmem:[#allocation2] sm:$0xff] %vm1014_vm4, %v1009_v41  ;;  %v5744_v26 = vpop.eup %5743  ;;  %5333 = vmatprep.subr.bf16.mxu1 %v5549_v7  ;;  %v5557_v41 = vld [vmem:[#allocation14 + $0x74] ss:$8 sps:$4 sm:$0xff]  }
 0xcac   :  { %v1800_v55 = vmul.f32 %v5744_v26, %v5736_v15  ;;  %2170 = vmatprep.subr.bf16.mxu0 %v5557_v41  ;;  %v5585_v41 = vld [vmem:[#allocation15 + $0x60] sm:$0xff]  }
 0xcad   :  { %v1181_v52 = vpop.permute.xlu0 %1180  ;;  %v839_v53 = vpop.permute.xlu1 %838 }
 0xcae   :  { %1187 = vst.msk [vmem:[#allocation2] sm:$0xff] %vm1186_vm5, %v1181_v52  ;;  %5334 = vmatpush3.bf16.msra.mxu1 %v5549_v7  ;;  %v5567_v7 = vld [vmem:[#allocation14 + $0x30] ss:$8 sps:$4 sm:$0xff]  }
 0xcaf   :  { %844 = vst.msk [vmem:[#allocation2 + $0x8] sm:$0xff] %vm842_vm3, %v839_v53  ;;  %v5746_v54 = vpop.eup %5745  ;;  %5335 = vmatprep.subr.bf16.mxu1 %v5550_v8 }
 0xcb0   :  { %v1801_v57 = vmul.f32 %v5746_v54, %v5738_v42  ;;  %v5844_v42 = vld [vmem:[#allocation3] sm:$0xff] }
 0xcb1   :  { %v1011_v58 = vpop.permute.xlu1 %1010 }
 0xcb2   :  { %1016 = vst.msk [vmem:[#allocation2 + $0x8] sm:$0xff] %vm1014_vm4, %v1011_v58  ;;  %v1802_v60 = vpack.c.bf16 %v1801_v57, %v1800_v55  ;;  %5336 = vmatpush3.bf16.msra.mxu1 %v5550_v8  ;;  %v5569_v8 = vld [vmem:[#allocation14 + $0x34] ss:$8 sps:$4 sm:$0xff]  }
 0xcb3   :  { %5337 = vmatprep.subr.bf16.mxu1 %v5551_v9 }
 0xcb4   :  { %5326 = vmatmul.mubr.msk.bf16.vlgmr.msra.gmra.mxu0 %vm601_vm1, %v1802_v60 }
 0xcb5   :  { %v1513_v62 = vpop.permute.xlu1 %1512  ;;  %2202 = vmatprep.mubr.bf16.mxu0 %v6055_v29  ;;  %v1860_v1 = vld [vmem:[#allocation2] sm:$0xff]  ;;  %2171 = vmatpush1.bf16.msra.mxu0 %v5555_v0  ;;  %v5584_v0 = vld [vmem:[#allocation15 + $0x28] sm:$0xff]  }
 0xcb6   :  { %1517 = vst.msk [vmem:[#allocation2 + $0x18] sm:$0xff] %vm842_vm3, %v1513_v62  ;;  %5338 = vmatpush3.bf16.msra.mxu1 %v5551_v9  ;;  %v5572_v9 = vld [vmem:[#allocation14 + $0x24] ss:$8 sps:$4 sm:$0xff]  }
 0xcb7   :  { %5339 = vmatprep.subr.bf16.mxu1 %v5552_v12 }
 0xcb9   :  { %v1183_v63 = vpop.permute.xlu1 %1182 }
 0xcba   :  { %1188 = vst.msk [vmem:[#allocation2 + $0x8] sm:$0xff] %vm1186_vm5, %v1183_v63  ;;  %5340 = vmatpush3.bf16.msra.mxu1 %v5552_v12  ;;  %v5560_v63 = vld [vmem:[#allocation14 + $0x64] ss:$8 sps:$4 sm:$0xff]   ;;  %v5573_v12 = vld [vmem:[#allocation14 + $0x10] ss:$8 sps:$4 sm:$0xff]  }
 0xcbb   :  { %5341 = vmatprep.subr.bf16.mxu1 %v5553_v18  ;;  %2172 = vmatprep.subr.bf16.mxu0 %v5560_v63 }
 0xcbe   :  { %5342 = vmatpush3.bf16.msra.mxu1 %v5553_v18 }
 0xcbf   :  { %5343 = vmatprep.subr.bf16.mxu1 %v5554_v21 }
 0xcc1   :  { %v1861_v3 = vld [vmem:[#allocation2 + $0x8] sm:$0xff] }
 0xcc2   :  { %v1864_v4 = vpack.c.bf16 %v1861_v3, %v1860_v1  ;;  %5344 = vmatpush3.bf16.msra.mxu1 %v5554_v21  ;;  %v5558_v1 = vld [vmem:[#allocation14 + $0x60] ss:$8 sps:$4 sm:$0xff]   ;;  %v5563_v3 = vld [vmem:[#allocation14 + $0x54] ss:$8 sps:$4 sm:$0xff]  }
 0xcc3   :  { %2173 = vmatpush1.bf16.msra.mxu0 %v5558_v1 }
 0xcc4   :  { %5345 = vmatprep.mubr.bf16.mxu1 %v1864_v4  ;;  %v5561_v4 = vld [vmem:[#allocation14 + $0x50] ss:$8 sps:$4 sm:$0xff]   ;;  %2174 = vmatprep.subr.bf16.mxu0 %v5563_v3 }
 0xcc7   :  { %2175 = vmatpush1.bf16.msra.mxu0 %v5561_v4 }
 0xcc8   :  { %2176 = vmatprep.subr.bf16.mxu0 %v5566_v5 }
 0xccb   :  { %2177 = vmatpush1.bf16.msra.mxu0 %v5564_v6 }
 0xccc   :  { %2178 = vmatprep.subr.bf16.mxu0 %v5569_v8 }
 0xccf   :  { %2179 = vmatpush1.bf16.msra.mxu0 %v5567_v7 }
 0xcd0   :  { %2180 = vmatprep.subr.bf16.mxu0 %v5572_v9 }
 0xd65   :  { %v1672_v10 = vpop.f32.mrf.mxu1 }
 0xd66   :  { %1681 = vrot.lane.b32.xlu0 %v1672_v10, %s6051_s1  ;;  %v5570_v10 = vld [vmem:[#allocation14 + $0x20] ss:$8 sps:$4 sm:$0xff]  }
 0xd67   :  { %v5314_v11 = vpop.f32.mrf.mxu1  ;;  %2181 = vmatpush1.bf16.msra.mxu0 %v5570_v10 }
 0xd68   :  { %v5575_v11 = vld [vmem:[#allocation14 + $0x14] ss:$8 sps:$4 sm:$0xff]  }
 0xd69   :  { %v1675_v13 = vpop.f32.mrf.mxu1  ;;  %2182 = vmatprep.subr.bf16.mxu0 %v5575_v11 }
 0xd6a   :  { %1683 = vrot.lane.b32.xlu1 %v1675_v13, %s6051_s1  ;;  %v5578_v13 = vld [vmem:[#allocation14 + $0x4] ss:$8 sps:$4 sm:$0xff]  }
 0xd6b   :  { %v5315_v17 = vpop.f32.mrf.mxu1  ;;  %2183 = vmatpush1.bf16.msra.mxu0 %v5573_v12 }
 0xd6c   :  { %v5576_v17 = vld [vmem:[#allocation14] ss:$8 sps:$4 sm:$0xff]   ;;  %2184 = vmatprep.subr.bf16.mxu0 %v5578_v13 }
 0xd6f   :  { %2185 = vmatpush1.bf16.msra.mxu0 %v5576_v17  ;;  %v2078_v17 = vld [vmem:[%s6927_s10] sm:$0x3] }
 0xd74   :  { %v1843_v24 = vpop.f32.mrf.mxu0 }
 0xd75   :  { %1852 = vrot.lane.b32.xlu0 %v1843_v24, %s6057_s6 }
 0xd76   :  { %v5327_v31 = vpop.f32.mrf.mxu0 }
 0xd78   :  { %v1846_v32 = vpop.f32.mrf.mxu0 }
 0xd79   :  { %1854 = vrot.lane.b32.xlu1 %v1846_v32, %s6057_s6 }
 0xd7a   :  { %v5328_v25 = vpop.f32.mrf.mxu0 }
 0xdd8   :  { %v1682_v45 = vpop.permute.xlu0 %1681 }
 0xdd9   :  { %1687 = vst.msk [vmem:[#allocation2 + $0x10] sm:$0xff] %vm1014_vm4, %v1682_v45 }
 0xddc   :  { %v1684_v34 = vpop.permute.xlu1 %1683 }
 0xddd   :  { %1688 = vst.msk [vmem:[#allocation2 + $0x18] sm:$0xff] %vm1014_vm4, %v1684_v34 }
 0xde7   :  { %v1853_v44 = vpop.permute.xlu0 %1852 }
 0xde8   :  { %1858 = vst.msk [vmem:[#allocation2 + $0x10] sm:$0xff] %vm1186_vm5, %v1853_v44 }
 0xdeb   :  { %v1855_v19 = vpop.permute.xlu1 %1854 }
 0xdec   :  { %1859 = vst.msk [vmem:[#allocation2 + $0x18] sm:$0xff] %vm1186_vm5, %v1855_v19 }
 0xdef   :  { %v1862_v36 = vld [vmem:[#allocation2 + $0x10] sm:$0xff] }
 0xdf3   :  { %v1863_v23 = vld [vmem:[#allocation2 + $0x18] sm:$0xff] }
 0xdf4   :  { %v1865_v43 = vpack.c.bf16 %v1863_v23, %v1862_v36 }
 0xdf6   :  { %5346 = vmatmul.mubr.bf16.vlgmr.msra.gmra.mxu1 %v1865_v43  ;;  %v4861_v43 = vld [vmem:[%s6924_s7] ss:$0 sm:$0xff] }
 0xeb6   :  { %v5347_v35 = vpop.f32.mrf.mxu1 }
 0xeb7   :  { %v1981_v40 = vadd.f32 %v5843_v38, %v5347_v35 }
 0xeb8   :  { %v1964_v15 = vpop.f32.mrf.mxu1 }
 0xeb9   :  { %v6494_v22 = vadd.f32 %v4860_v37, %v1981_v40  ;;  %v1979_v46 = vadd.f32 %v5844_v42, %v1964_v15  ;;  %v4862_v40 = vld [vmem:[%s6925_s8] ss:$0 sm:$0xff] }
 0xeba   :  { %v5348_v39 = vpop.f32.mrf.mxu1 }
 0xebb   :  { %v6496_v59 = vadd.f32 %v4860_v37, %v1979_v46  ;;  %v1982_v48 = vadd.f32 %v5846_v47, %v5348_v39  ;;  %v5582_v47 = vld [vmem:[#allocation15 + $0x30] sm:$0xff]  }
 0xebc   :  { %v1967_v27 = vpop.f32.mrf.mxu1 }
 0xebd   :  { %v1980_v61 = vadd.f32 %v5845_v33, %v1967_v27  ;;  %1996 = vadd.xlane.f32.xlu0 %v6496_v59  ;;  %v6502_v56 = vadd.f32 %v4860_v37, %v1982_v48  ;;  %v5579_v27 = vld [vmem:[#allocation15 + $0x78] sm:$0xff]   ;;  %v5583_v48 = vld [vmem:[#allocation15 + $0x68] sm:$0xff]  }
 0xebe   :  { %v5580_v33 = vld [vmem:[#allocation15 + $0x38] sm:$0xff]   ;;  %5081 = vmatprep.subr.bf16.mxu1 %v5579_v27 }
 0xebf   :  { %v6499_v49 = vadd.f32 %v4860_v37, %v1980_v61  ;;  %v5581_v61 = vld [vmem:[#allocation15 + $0x70] sm:$0xff]   ;;  %5082 = vmatpush3.bf16.msra.mxu1 %v5580_v33 }
 0xec0   :  { %5083 = vmatprep.subr.bf16.mxu1 %v5581_v61 }
 0xec1   :  { %1998 = vadd.xlane.f32.xlu1 %v6499_v49 }
 0xec3   :  { %5084 = vmatpush3.bf16.msra.mxu1 %v5582_v47 }
 0xec4   :  { %5085 = vmatprep.subr.bf16.mxu1 %v5583_v48 }
 0xec5   :  { %2002 = vadd.xlane.f32.xlu1 %v6502_v56 }
 0xec7   :  { %5086 = vmatpush3.bf16.msra.mxu1 %v5584_v0 }
 0xec8   :  { %5087 = vmatprep.subr.bf16.mxu1 %v5585_v41 }
 0xf46   :  { %v1997_v50 = vpop.xlane.xlu0 %1996 }
 0xf47   :  { %v2004_v2 = vmul.f32 0.0078125, %v1997_v50  ;;  %v5586_v50 = vld [vmem:[#allocation15 + $0x20] sm:$0xff]  }
 0xf48   :  { %5088 = vmatpush3.bf16.msra.mxu1 %v5586_v50 }
 0xf49   :  { %v2008_v51 = vsub.f32 %v6496_v59, %v2004_v2  ;;  %v5587_v2 = vld [vmem:[#allocation15 + $0x58] sm:$0xff]  }
 0xf4a   :  { %v1999_v26 = vpop.xlane.xlu1 %1998  ;;  %5089 = vmatprep.subr.bf16.mxu1 %v5587_v2 }
 0xf4b   :  { %v2005_v52 = vmul.f32 0.0078125, %v1999_v26  ;;  %v2012_v53 = vmul.f32 %v2008_v51, %v2008_v51  ;;  %v5589_v26 = vld [vmem:[#allocation15 + $0x50] sm:$0xff]  }
 0xf4d   :  { %2016 = vadd.xlane.f32.xlu0 %v2012_v53  ;;  %v2009_v54 = vsub.f32 %v6499_v49, %v2005_v52  ;;  %v5590_v52 = vld [vmem:[#allocation15 + $0x10] sm:$0xff]   ;;  %v5591_v53 = vld [vmem:[#allocation15 + $0x48] sm:$0xff]  }
 0xf4e   :  { %v2003_v55 = vpop.xlane.xlu1 %2002 }
 0xf4f   :  { %v2007_v57 = vmul.f32 0.0078125, %v2003_v55  ;;  %v2013_v58 = vmul.f32 %v2009_v54, %v2009_v54  ;;  %v5593_v55 = vld [vmem:[#allocation15 + $0x40] sm:$0xff]  }
 0xf51   :  { %2018 = vadd.xlane.f32.xlu0 %v2013_v58  ;;  %v6508_v60 = vsub.f32 %v6502_v56, %v2007_v57  ;;  %v5594_v57 = vld [vmem:[#allocation15] sm:$0xff]  }
 0xf53   :  { %v2015_v62 = vmul.f32 %v6508_v60, %v6508_v60 }
 0xf55   :  { %2000 = vadd.xlane.f32.xlu0 %v6494_v22  ;;  %2022 = vadd.xlane.f32.xlu1 %v2015_v62 }
 0xfd6   :  { %v2017_v18 = vpop.xlane.xlu0 %2016 }
 0xfd7   :  { %v2024_v21 = vmul.f32 0.0078125, %v2017_v18 }
 0xfd9   :  { %v2028_v24 = vadd.f32 1e-05, %v2024_v21  ;;  %v2087_v21 = vrot.slane %v2078_v17, %v6216_v20 }
 0xfda   :  { %v2019_v31 = vpop.xlane.xlu0 %2018 }
 0xfdb   :  { %5747 = vrsqrt.f32 %v2028_v24  ;;  %v2025_v32 = vmul.f32 0.0078125, %v2019_v31  ;;  %v2083_v24 = vrot.slane %v2078_v17, %v6204_v16 }
 0xfdd   :  { %v2029_v25 = vadd.f32 1e-05, %v2025_v32 }
 0xfde   :  { %v2001_v45 = vpop.xlane.xlu0 %2000  ;;  %v2023_v58 = vpop.xlane.xlu1 %2022 }
 0xfdf   :  { %5749 = vrsqrt.f32 %v2029_v25  ;;  %v2006_v34 = vmul.f32 0.0078125, %v2001_v45  ;;  %v2027_v62 = vmul.f32 0.0078125, %v2023_v58 }
 0xfe1   :  { %v2010_v44 = vsub.f32 %v6494_v22, %v2006_v34  ;;  %v2031_v63 = vadd.f32 1e-05, %v2027_v62 }
 0xfe3   :  { %v2014_v19 = vmul.f32 %v2010_v44, %v2010_v44  ;;  %5751 = vrsqrt.f32 %v2031_v63 }
 0xfe5   :  { %2020 = vadd.xlane.f32.xlu0 %v2014_v19 }
 0xfe8   :  { %v5748_v36 = vpop.eup %5747 }
 0xfe9   :  { %v2036_v23 = vmul.f32 %v5748_v36, %v2008_v51  ;;  %v5588_v51 = vld [vmem:[#allocation15 + $0x18] sm:$0xff]  }
 0xfea   :  { %5090 = vmatpush3.bf16.msra.mxu1 %v5588_v51 }
 0xfeb   :  { %v2046_v38 = vmul.f32 %v4861_v43, %v2036_v23  ;;  %5091 = vmatprep.subr.bf16.mxu1 %v5589_v26 }
 0xfec   :  { %v5750_v35 = vpop.eup %5749 }
 0xfed   :  { %v2037_v37 = vmul.f32 %v5750_v35, %v2009_v54  ;;  %v2056_v42 = vadd.f32 %v4862_v40, %v2046_v38  ;;  %v5592_v54 = vld [vmem:[#allocation15 + $0x8] sm:$0xff]  }
 0xfee   :  { %5092 = vmatpush3.bf16.msra.mxu1 %v5590_v52 }
 0xfef   :  { %v2047_v15 = vmul.f32 %v4861_v43, %v2037_v37  ;;  %5093 = vmatprep.subr.bf16.mxu1 %v5591_v53  ;;  %v4895_v53 = vld [vmem:[%s6929_s12] ss:$0 sm:$0xff] }
 0xff0   :  { %v5752_v5 = vpop.eup %5751 }
 0xff1   :  { %v2057_v46 = vadd.f32 %v4862_v40, %v2047_v15  ;;  %v2039_v6 = vmul.f32 %v5752_v5, %v6508_v60 }
 0xff2   :  { %5094 = vmatpush3.bf16.msra.mxu1 %v5592_v54 }
 0xff3   :  { %v2060_v39 = vpack.c.bf16 %v2057_v46, %v2056_v42  ;;  %5095 = vmatprep.subr.bf16.mxu1 %v5593_v55  ;;  %v2049_v9 = vmul.f32 %v4861_v43, %v2039_v6 }
 0xff5   :  { %2203 = vmatmul.mubr.bf16.vlgmr.msra.gmra.mxu0 %v2060_v39  ;;  %v2059_v12 = vadd.f32 %v4862_v40, %v2049_v9 }
 0xff6   :  { %2212 = vmatprep.mubr.bf16.mxu0 %v6055_v29  ;;  %5096 = vmatpush3.bf16.msra.mxu1 %v5594_v57 }
0x106e   :  { %v2021_v1 = vpop.xlane.xlu0 %2020 }
0x106f   :  { %v2026_v3 = vmul.f32 0.0078125, %v2021_v1  ;;  %v5595_v1 = vld [vmem:[#allocation9 + $0x168] ss:$12 sps:$4 sm:$0xff]  }
0x1071   :  { %v2030_v4 = vadd.f32 1e-05, %v2026_v3  ;;  %v5597_v3 = vld [vmem:[#allocation9 + $0x16c] ss:$12 sps:$4 sm:$0xff]  }
0x1072   :  { %2676 = vmatprep.subr.bf16.mxu0 %v5597_v3 }
0x1073   :  { %5753 = vrsqrt.f32 %v2030_v4  ;;  %2677 = vmatpush1.bf16.msra.mxu0 %v5595_v1  ;;  %v4897_v1 = vld [vmem:[#allocation8 + $0x1] ss:$0 sm:$0xff] }
0x1080   :  { %v5754_v7 = vpop.eup %5753 }
0x1081   :  { %v2038_v8 = vmul.f32 %v5754_v7, %v2010_v44 }
0x1083   :  { %v2048_v10 = vmul.f32 %v4861_v43, %v2038_v8 }
0x1085   :  { %v2058_v11 = vadd.f32 %v4862_v40, %v2048_v10 }
0x1087   :  { %v2061_v13 = vpack.c.bf16 %v2059_v12, %v2058_v11 }
0x1089   :  { %2213 = vmatmul.mubr.bf16.gmra.mxu0 %v2061_v13 }
0x108a   :  { %2708 = vmatprep.mubr.bf16.mxu0 %v6055_v29 }
0x10b5   :  { %v2204_v18 = vpop.f32.mrf.mxu0 }
0x10b6   :  { %v2205_v45 = vadd.f32 %v2204_v18, %v2083_v24 }
0x10b7   :  { %v2206_v60 = vpop.f32.mrf.mxu0 }
0x10b8   :  { %v2207_v32 = vadd.f32 %v2206_v60, %v2087_v21  ;;  %v2223_v43 = vmax.f32 %v2205_v45, 0.0  ;;  %v5601_v45 = vld [vmem:[#allocation9 + $0x138] ss:$12 sps:$4 sm:$0xff]  }
0x10b9   :  { %v2208_v31 = vpop.f32.mrf.mxu0 }
0x10ba   :  { %v2209_v25 = vadd.f32 %v2208_v31, %v2083_v24  ;;  %v2224_v36 = vmax.f32 %v2207_v32, 0.0  ;;  %v5598_v32 = vld [vmem:[#allocation9 + $0x150] ss:$12 sps:$4 sm:$0xff]  }
0x10bb   :  { %v2210_v34 = vpop.f32.mrf.mxu0 }
0x10bc   :  { %v2211_v44 = vadd.f32 %v2210_v34, %v2087_v21  ;;  %v2225_v19 = vmax.f32 %v2209_v25, 0.0  ;;  %v5603_v25 = vld [vmem:[#allocation9 + $0x13c] ss:$12 sps:$4 sm:$0xff]   ;;  %v5606_v34 = vld [vmem:[#allocation9 + $0x124] ss:$12 sps:$4 sm:$0xff]  }
0x10be   :  { %v2226_v23 = vmax.f32 %v2211_v44, 0.0  ;;  %v2231_v37 = vpack.c.bf16 %v2225_v19, %v2223_v43  ;;  %v5604_v44 = vld [vmem:[#allocation9 + $0x120] ss:$12 sps:$4 sm:$0xff]   ;;  %v5607_v19 = vld [vmem:[#allocation9 + $0x108] ss:$12 sps:$4 sm:$0xff]  }
0x10bf   :  { %v5615_v43 = vld [vmem:[#allocation9 + $0xdc] ss:$12 sps:$4 sm:$0xff]  }
0x10c0   :  { %v2232_v35 = vpack.c.bf16 %v2226_v23, %v2224_v36  ;;  %v5612_v36 = vld [vmem:[#allocation9 + $0xf4] ss:$12 sps:$4 sm:$0xff]   ;;  %v5610_v23 = vld [vmem:[#allocation9 + $0xf0] ss:$12 sps:$4 sm:$0xff]  }
0x10c2   :  { %2395 = vmatprep.mubr.bf16.mxu1 %v2232_v35  ;;  %v5613_v35 = vld [vmem:[#allocation9 + $0xd8] ss:$12 sps:$4 sm:$0xff]  }
0x10c3   :  { %2396 = vmatmul.mubr.bf16.vlgmr.msra.gmra.mxu1 %v2231_v37  ;;  %v5618_v37 = vld [vmem:[#allocation9 + $0xc4] ss:$12 sps:$4 sm:$0xff]  }
0x1149   :  { %v2214_v38 = vpop.f32.mrf.mxu0 }
0x114a   :  { %v2215_v39 = vadd.f32 %v2214_v38, %v2083_v24  ;;  %v5616_v38 = vld [vmem:[#allocation9 + $0xc0] ss:$12 sps:$4 sm:$0xff]  }
0x114b   :  { %v2216_v40 = vpop.f32.mrf.mxu0 }
0x114c   :  { %v2217_v42 = vadd.f32 %v2216_v40, %v2087_v21  ;;  %v2227_v0 = vmax.f32 %v2215_v39, 0.0  ;;  %v5619_v40 = vld [vmem:[#allocation9 + $0x170] ss:$12 sps:$4 sm:$0xff]  }
0x114d   :  { %v2218_v15 = vpop.f32.mrf.mxu0  ;;  %5349 = vmatprep.subr.bf16.mxu1 %v5619_v40 }
0x114e   :  { %v2219_v46 = vadd.f32 %v2218_v15, %v2083_v24  ;;  %v2228_v47 = vmax.f32 %v2217_v42, 0.0  ;;  %5350 = vmatpush3.bf16.msra.mxu1 %v5619_v40 }
0x114f   :  { %v2220_v27 = vpop.f32.mrf.mxu0 }
0x1150   :  { %v2221_v33 = vadd.f32 %v2220_v27, %v2087_v21  ;;  %v2229_v61 = vmax.f32 %v2219_v46, 0.0 }
0x1152   :  { %v2230_v48 = vmax.f32 %v2221_v33, 0.0  ;;  %v2233_v50 = vpack.c.bf16 %v2229_v61, %v2227_v0 }
0x1154   :  { %v2234_v41 = vpack.c.bf16 %v2230_v48, %v2228_v47 }
0x1156   :  { %2403 = vmatprep.mubr.bf16.mxu1 %v2234_v41 }
0x1157   :  { %2404 = vmatmul.mubr.bf16.gmra.mxu1 %v2233_v50 }
0x1183   :  { %v5097_v2 = vpop.f32.mrf.mxu1 }
0x1185   :  { %v5098_v51 = vpop.f32.mrf.mxu1 }
0x1186   :  { %v5099_v26 = vadd.f32 %v5098_v51, %v5097_v2 }
0x1187   :  { %v5100_v52 = vpop.f32.mrf.mxu1 }
0x1188   :  { %v2412_v54 = vadd.f32 %v5099_v26, %v6496_v59 }
0x1189   :  { %v5101_v55 = vpop.f32.mrf.mxu1 }
0x118a   :  { %v5102_v57 = vadd.f32 %v5101_v55, %v5100_v52  ;;  %v6532_v58 = vadd.f32 %v4895_v53, %v2412_v54  ;;  %v5620_v55 = vld [vmem:[#allocation9 + $0x158] ss:$12 sps:$4 sm:$0xff]  }
0x118b   :  { %5351 = vmatprep.subr.bf16.mxu1 %v5620_v55 }
0x118c   :  { %v2413_v62 = vadd.f32 %v5102_v57, %v6499_v49  ;;  %2431 = vadd.xlane.f32.xlu0 %v6532_v58  ;;  %5352 = vmatpush3.bf16.msra.mxu1 %v5620_v55 }
0x118e   :  { %v6536_v63 = vadd.f32 %v4895_v53, %v2413_v62 }
0x1190   :  { %2433 = vadd.xlane.f32.xlu1 %v6536_v63 }
0x1215   :  { %v2432_v4 = vpop.xlane.xlu0 %2431 }
0x1216   :  { %v2439_v5 = vmul.f32 0.0078125, %v2432_v4  ;;  %v5621_v4 = vld [vmem:[#allocation9 + $0x140] ss:$12 sps:$4 sm:$0xff]  }
0x1217   :  { %v5103_v6 = vpop.f32.mrf.mxu1  ;;  %5353 = vmatprep.subr.bf16.mxu1 %v5621_v4 }
0x1218   :  { %v6540_v59 = vsub.f32 %v6532_v58, %v2439_v5  ;;  %5354 = vmatpush3.bf16.msra.mxu1 %v5621_v4 }
0x1219   :  { %v5104_v7 = vpop.f32.mrf.mxu1  ;;  %v2434_v8 = vpop.xlane.xlu1 %2433 }
0x121a   :  { %v5105_v9 = vadd.f32 %v5104_v7, %v5103_v6  ;;  %v2440_v49 = vmul.f32 0.0078125, %v2434_v8  ;;  %v2447_v10 = vmul.f32 %v6540_v59, %v6540_v59  ;;  %v5622_v8 = vld [vmem:[#allocation9 + $0x128] ss:$12 sps:$4 sm:$0xff]  }
0x121b   :  { %v5106_v11 = vpop.f32.mrf.mxu1  ;;  %5355 = vmatprep.subr.bf16.mxu1 %v5622_v8 }
0x121c   :  { %v2414_v12 = vadd.f32 %v5105_v9, %v6494_v22  ;;  %v6546_v13 = vsub.f32 %v6536_v63, %v2440_v49  ;;  %2451 = vadd.xlane.f32.xlu0 %v2447_v10  ;;  %v5600_v22 = vld [vmem:[#allocation9 + $0x154] ss:$12 sps:$4 sm:$0xff]   ;;  %v5623_v9 = vld [vmem:[#allocation9 + $0x110] ss:$12 sps:$4 sm:$0xff]   ;;  %5356 = vmatpush3.bf16.msra.mxu1 %v5622_v8 }
0x121d   :  { %v5107_v17 = vpop.f32.mrf.mxu1  ;;  %2678 = vmatprep.subr.bf16.mxu0 %v5600_v22  ;;  %5357 = vmatprep.subr.bf16.mxu1 %v5623_v9  ;;  %v5625_v49 = vld [vmem:[#allocation9 + $0xe0] ss:$12 sps:$4 sm:$0xff]   ;;  %v5626_v10 = vld [vmem:[#allocation9 + $0xc8] ss:$12 sps:$4 sm:$0xff]  }
0x121e   :  { %v5108_v18 = vadd.f32 %v5107_v17, %v5106_v11  ;;  %v6548_v21 = vadd.f32 %v4895_v53, %v2414_v12  ;;  %v2448_v24 = vmul.f32 %v6546_v13, %v6546_v13  ;;  %2679 = vmatpush1.bf16.msra.mxu0 %v5598_v32 }
0x121f   :  { %2680 = vmatprep.subr.bf16.mxu0 %v5603_v25 }
0x1220   :  { %v2415_v60 = vadd.f32 %v5108_v18, %v6502_v56  ;;  %2435 = vadd.xlane.f32.xlu0 %v6548_v21  ;;  %2453 = vadd.xlane.f32.xlu1 %v2448_v24  ;;  %v5609_v56 = vld [vmem:[#allocation9 + $0x10c] ss:$12 sps:$4 sm:$0xff]  }
0x1221   :  { %5358 = vmatpush3.bf16.msra.mxu1 %v5623_v9 }
0x1222   :  { %v6554_v31 = vadd.f32 %v4895_v53, %v2415_v60  ;;  %2681 = vmatpush1.bf16.msra.mxu0 %v5601_v45  ;;  %v4896_v53 = vld [vmem:[#allocation6 + $0x1] ss:$0 sm:$0xff] }
0x1223   :  { %2682 = vmatprep.subr.bf16.mxu0 %v5606_v34 }
0x1224   :  { %2437 = vadd.xlane.f32.xlu1 %v6554_v31 }
0x1226   :  { %2683 = vmatpush1.bf16.msra.mxu0 %v5604_v44 }
0x1227   :  { %2684 = vmatprep.subr.bf16.mxu0 %v5609_v56 }
0x122a   :  { %2685 = vmatpush1.bf16.msra.mxu0 %v5607_v19 }
0x122b   :  { %2686 = vmatprep.subr.bf16.mxu0 %v5612_v36  ;;  %v4898_v36 = vld [vmem:[%s6921_s4 + $0x3] sm:$0x7] }
0x122c   :  { %v6574_v40 = vrot.slane %v4898_v36, %v6216_v20 }
0x122e   :  { %2687 = vmatpush1.bf16.msra.mxu0 %v5610_v23  ;;  %v6566_v23 = vrot.slane %v4898_v36, %v6204_v16 }
0x122f   :  { %2688 = vmatprep.subr.bf16.mxu0 %v5615_v43 }
0x1232   :  { %2689 = vmatpush1.bf16.msra.mxu0 %v5613_v35 }
0x1233   :  { %2690 = vmatprep.subr.bf16.mxu0 %v5618_v37 }
0x1236   :  { %2691 = vmatpush1.bf16.msra.mxu0 %v5616_v38 }
0x12a5   :  { %v2452_v15 = vpop.xlane.xlu0 %2451 }
0x12a6   :  { %v2459_v42 = vmul.f32 0.0078125, %v2452_v15 }
0x12a8   :  { %v2463_v46 = vadd.f32 1e-05, %v2459_v42 }
0x12a9   :  { %v2436_v39 = vpop.xlane.xlu0 %2435  ;;  %v2454_v27 = vpop.xlane.xlu1 %2453 }
0x12aa   :  { %5755 = vrsqrt.f32 %v2463_v46  ;;  %v2441_v33 = vmul.f32 0.0078125, %v2436_v39  ;;  %v2460_v61 = vmul.f32 0.0078125, %v2454_v27  ;;  %v2544_v27 = vrot.slane %v4898_v36, %v278_v30 }
0x12ac   :  { %v2445_v47 = vsub.f32 %v6548_v21, %v2441_v33  ;;  %v2464_v48 = vadd.f32 1e-05, %v2460_v61 }
0x12ad   :  { %v2438_v0 = vpop.xlane.xlu1 %2437 }
0x12ae   :  { %5757 = vrsqrt.f32 %v2464_v48  ;;  %v2442_v41 = vmul.f32 0.0078125, %v2438_v0  ;;  %v2449_v50 = vmul.f32 %v2445_v47, %v2445_v47 }
0x12b0   :  { %v2446_v2 = vsub.f32 %v6554_v31, %v2442_v41  ;;  %2455 = vadd.xlane.f32.xlu0 %v2449_v50 }
0x12b2   :  { %v2450_v51 = vmul.f32 %v2446_v2, %v2446_v2 }
0x12b4   :  { %2457 = vadd.xlane.f32.xlu1 %v2450_v51 }
0x12b7   :  { %v5756_v26 = vpop.eup %5755 }
0x12b8   :  { %v2471_v52 = vmul.f32 %v5756_v26, %v6540_v59  ;;  %v5624_v59 = vld [vmem:[#allocation9 + $0xf8] ss:$12 sps:$4 sm:$0xff]  }
0x12b9   :  { %5359 = vmatprep.subr.bf16.mxu1 %v5624_v59 }
0x12ba   :  { %v2481_v62 = vmul.f32 %v4896_v53, %v2471_v52  ;;  %5360 = vmatpush3.bf16.msra.mxu1 %v5624_v59 }
0x12bb   :  { %v5758_v54 = vpop.eup %5757  ;;  %5361 = vmatprep.subr.bf16.mxu1 %v5625_v49 }
0x12bc   :  { %v2472_v57 = vmul.f32 %v5758_v54, %v6546_v13  ;;  %v2491_v5 = vadd.f32 %v4897_v1, %v2481_v62 }
0x12be   :  { %v2482_v3 = vmul.f32 %v4896_v53, %v2472_v57  ;;  %5362 = vmatpush3.bf16.msra.mxu1 %v5625_v49 }
0x12bf   :  { %5363 = vmatprep.subr.bf16.mxu1 %v5626_v10 }
0x12c0   :  { %v2492_v6 = vadd.f32 %v4897_v1, %v2482_v3 }
0x12c2   :  { %v2495_v7 = vpack.c.bf16 %v2492_v6, %v2491_v5  ;;  %5364 = vmatpush3.bf16.msra.mxu1 %v5626_v10 }
0x12c4   :  { %2709 = vmatmul.mubr.bf16.vlgmr.msra.gmra.mxu0 %v2495_v7  ;;  %5365 = vmatprep.mubr.bf16.mxu1 %v2495_v7 }
0x12c5   :  { %2718 = vmatprep.mubr.bf16.mxu0 %v6055_v29 }
0x1339   :  { %v2456_v11 = vpop.xlane.xlu0 %2455 }
0x133a   :  { %v2461_v12 = vmul.f32 0.0078125, %v2456_v11 }
0x133c   :  { %v2465_v13 = vadd.f32 1e-05, %v2461_v12 }
0x133d   :  { %v2458_v17 = vpop.xlane.xlu1 %2457 }
0x133e   :  { %5759 = vrsqrt.f32 %v2465_v13  ;;  %v2462_v18 = vmul.f32 0.0078125, %v2458_v17 }
0x1340   :  { %v2466_v24 = vadd.f32 1e-05, %v2462_v18 }
0x1342   :  { %5761 = vrsqrt.f32 %v2466_v24 }
0x134b   :  { %v5760_v60 = vpop.eup %5759 }
0x134c   :  { %v2473_v22 = vmul.f32 %v5760_v60, %v2445_v47 }
0x134e   :  { %v2483_v45 = vmul.f32 %v4896_v53, %v2473_v22 }
0x134f   :  { %v5762_v32 = vpop.eup %5761 }
0x1350   :  { %v2474_v25 = vmul.f32 %v5762_v32, %v2446_v2  ;;  %v2493_v44 = vadd.f32 %v4897_v1, %v2483_v45 }
0x1352   :  { %v2484_v34 = vmul.f32 %v4896_v53, %v2474_v25 }
0x1354   :  { %v2494_v56 = vadd.f32 %v4897_v1, %v2484_v34 }
0x1356   :  { %v2496_v19 = vpack.c.bf16 %v2494_v56, %v2493_v44 }
0x1358   :  { %2719 = vmatmul.mubr.bf16.gmra.mxu0 %v2496_v19  ;;  %5366 = vmatmul.mubr.bf16.vlgmr.msra.gmra.mxu1 %v2496_v19 }
0x1384   :  { %v2710_v43 = vpop.f32.mrf.mxu0 }
0x1385   :  { %v6569_v35 = vadd.f32 %v2710_v43, %v6566_v23 }
0x1386   :  { %v2712_v37 = vpop.f32.mrf.mxu0 }
0x1387   :  { %5373 = vmatprep.mubr.msk.f32.mxu0 %vm513_vm0, %v6569_v35  ;;  %v6580_v46 = vadd.f32 %v2712_v37, %v6574_v40 }
0x1388   :  { %v2714_v38 = vpop.f32.mrf.mxu0 }
0x1389   :  { %v6591_v39 = vadd.f32 %v2714_v38, %v6566_v23 }
0x138a   :  { %v2716_v15 = vpop.f32.mrf.mxu0 }
0x138b   :  { %v6577_v42 = vadd.f32 %v2716_v15, %v6574_v40 }
0x138d   :  { %5369 = vmatprep.subr.msk.mxu0 %vm513_vm0, %v6577_v42 }
0x138e   :  { %5370 = vmatpush3.xpose.msk.msra.mxu0 %vm513_vm0, %v6577_v42 }
0x138f   :  { %5371 = vmatprep.subr.msk.mxu0 %vm513_vm0, %v6580_v46 }
0x1392   :  { %5372 = vmatpush3.xpose.msk.msra.mxu0 %vm513_vm0, %v6580_v46 }
0x1393   :  { %5376 = vmatprep.subr.bf16.mxu0 %v6056_v28 }
0x1395   :  { %5374 = vmatmul.mubr.msk.f32.vlgmr.msra.gmra.mxu0 %vm513_vm0, %v6591_v39 }
0x1396   :  { %5378 = vmatprep.mubr.msk.bf16.mxu0 %vm6058_vm2, %v6056_v28 }
0x1418   :  { %v5367_v33 = vpop.f32.mrf.mxu1  ;;  %v6605_v52 = vpop.f32.mrf.mxu0 }
0x1419   :  { %v2772_v61 = vadd.f32 %v5367_v33, %v2544_v27 }
0x141a   :  { %v2763_v47 = vpop.f32.mrf.mxu1  ;;  %v6607_v53 = vpop.f32.mrf.mxu0 }
0x141b   :  { %v2764_v50 = vadd.f32 %v2763_v47, %v2544_v27 }
0x141c   :  { %v5368_v48 = vpop.f32.mrf.mxu1  ;;  %v6609_v14 = vpop.f32.mrf.mxu0 }
0x141d   :  { %v2775_v0 = vadd.f32 %v5368_v48, %v2544_v27 }
0x141e   :  { %v2766_v41 = vpop.f32.mrf.mxu1  ;;  %v6611_v30 = vpop.f32.mrf.mxu0 }
0x141f   :  { %v6600_v2 = vpack.c.bf16 %v2775_v0, %v2772_v61  ;;  %v2767_v51 = vadd.f32 %v2766_v41, %v2544_v27 }
0x1421   :  { %v6602_v26 = vpack.c.bf16 %v2767_v51, %v2764_v50 }
0x1423   :  { %5377 = vmatpush3.bf16.msra.mxu0 %v6602_v26 }
0x1455   :  { %v5375_v54 = vpop.f32.mrf.mxu0 }
0x1456   :  { %v2868_v55 = vsel %vm601_vm1, %v5375_v54, -inf }
0x1457   :  { %2869 = vmax.xlane.f32.xlu1 %v2868_v55  ;;  %v2856_v57 = vpop.f32.mrf.mxu0 }
0x1458   :  { %v2865_v62 = vsel %vm601_vm1, %v2856_v57, -inf }
0x1459   :  { %2866 = vmax.xlane.f32.xlu0 %v2865_v62 }
0x14e0   :  { %v2870_v1 = vpop.xlane.xlu1 %2869 }
0x14e1   :  { %v2872_v3 = vsub.f32 %v5375_v54, %v2870_v1 }
0x14e2   :  { %v2867_v4 = vpop.xlane.xlu0 %2866 }
0x14e3   :  { %v2875_v5 = vmul.f32 1.442695, %v2872_v3  ;;  %v2871_v6 = vsub.f32 %v2856_v57, %v2867_v4 }
0x14e5   :  { %5763 = vpow2.f32 %v2875_v5  ;;  %v2873_v7 = vmul.f32 1.442695, %v2871_v6 }
0x14e7   :  { %5765 = vpow2.f32 %v2873_v7 }
0x14f2   :  { %v5764_v8 = vpop.eup %5763 }
0x14f3   :  { %v2880_v9 = vsel %vm601_vm1, %v5764_v8, 0.0 }
0x14f4   :  { %v5766_v59 = vpop.eup %5765  ;;  %2881 = vadd.xlane.f32.xlu1 %v2880_v9 }
0x14f5   :  { %v2877_v49 = vsel %vm601_vm1, %v5766_v59, 0.0 }
0x14f6   :  { %2878 = vadd.xlane.f32.xlu0 %v2877_v49 }
0x1505   :  { %2939 = vrot.lane.b32.xlu1 %v6580_v46, %s6057_s6 }
0x1509   :  { %2935 = vrot.lane.b32.xlu1 %v6569_v35, %s6057_s6 }
0x150c   :  { %2941 = vrot.lane.b32.xlu0 %v6577_v42, %s6057_s6 }
0x150d   :  { %2937 = vrot.lane.b32.xlu1 %v6591_v39, %s6057_s6 }
0x157d   :  { %v2882_v10 = vpop.xlane.xlu1 %2881 }
0x157e   :  { %5767 = vrcp.f32 %v2882_v10 }
0x157f   :  { %v2879_v11 = vpop.xlane.xlu0 %2878 }
0x1580   :  { %5769 = vrcp.f32 %v2879_v11 }
0x1581   :  { %v2940_v17 = vpop.permute.xlu1 %2939 }
0x1583   :  { %v2942_v12 = vpop.permute.xlu0 %2941 }
0x1584   :  { %5382 = vmatprep.subr.msk.mxu0 %vm513_vm0, %v2942_v12 }
0x1585   :  { %v2936_v32 = vpop.permute.xlu1 %2935 }
0x1589   :  { %v2938_v25 = vpop.permute.xlu1 %2937 }
0x158b   :  { %v5768_v13 = vpop.eup %5767 }
0x158c   :  { %v2886_v60 = vmul.f32 %v5768_v13, %v5764_v8 }
0x158d   :  { %v5770_v18 = vpop.eup %5769 }
0x158e   :  { %v2885_v24 = vmul.f32 %v5770_v18, %v5766_v59 }
0x1590   :  { %v2887_v22 = vpack.c.bf16 %v2886_v60, %v2885_v24 }
0x1592   :  { %5379 = vmatmul.mubr.msk.bf16.vlgmr.msra.gmra.mxu0 %vm601_vm1, %v2887_v22 }
0x1593   :  { %5383 = vmatpush3.xpose.msk.msra.mxu0 %vm513_vm0, %v2942_v12  ;;  %5386 = vmatprep.mubr.msk.f32.mxu0 %vm513_vm0, %v2936_v32 }
0x1594   :  { %5384 = vmatprep.subr.msk.mxu0 %vm513_vm0, %v2940_v17 }
0x1597   :  { %5385 = vmatpush3.xpose.msk.msra.mxu0 %vm513_vm0, %v2940_v17 }
0x1598   :  { %5389 = vmatprep.subr.bf16.mxu0 %v6056_v28 }
0x159a   :  { %5387 = vmatmul.mubr.msk.f32.vlgmr.msra.gmra.mxu0 %vm513_vm0, %v2938_v25 }
0x159b   :  { %5391 = vmatprep.mubr.msk.bf16.mxu0 %vm6058_vm2, %v6056_v28 }
0x1652   :  { %v2926_v45 = vpop.f32.mrf.mxu0 }
0x1653   :  { %2933 = vst.msk [vmem:[#allocation2] sm:$0xff] %vm513_vm0, %v2926_v45 }
0x1654   :  { %v5380_v34 = vpop.f32.mrf.mxu0 }
0x1656   :  { %v2929_v44 = vpop.f32.mrf.mxu0 }
0x1657   :  { %2934 = vst.msk [vmem:[#allocation2 + $0x8] sm:$0xff] %vm513_vm0, %v2929_v44 }
0x1658   :  { %v5381_v56 = vpop.f32.mrf.mxu0 }
0x165a   :  { %v5388_v19 = vpop.f32.mrf.mxu0 }
0x165b   :  { %v3029_v36 = vsel %vm601_vm1, %v5388_v19, -inf }
0x165c   :  { %3030 = vmax.xlane.f32.xlu1 %v3029_v36  ;;  %v3017_v43 = vpop.f32.mrf.mxu0 }
0x165d   :  { %v3026_v37 = vsel %vm601_vm1, %v3017_v43, -inf }
0x165e   :  { %3027 = vmax.xlane.f32.xlu0 %v3026_v37 }
0x166d   :  { %3113 = vrot.lane.b32.xlu1 %v6577_v42, %s6051_s1 }
0x1671   :  { %3284 = vrot.lane.b32.xlu1 %v6577_v42, %s6059_s17 }
0x1674   :  { %3050 = vrot.lane.b32.xlu0 %v6602_v26, %s6057_s6 }
0x1675   :  { %3111 = vrot.lane.b32.xlu1 %v6580_v46, %s6051_s1 }
0x1679   :  { %3107 = vrot.lane.b32.xlu1 %v6569_v35, %s6051_s1 }
0x167d   :  { %3278 = vrot.lane.b32.xlu1 %v6569_v35, %s6059_s17 }
0x16e5   :  { %v3031_v38 = vpop.xlane.xlu1 %3030 }
0x16e6   :  { %v3033_v15 = vsub.f32 %v5388_v19, %v3031_v38 }
0x16e7   :  { %v3028_v27 = vpop.xlane.xlu0 %3027 }
0x16e8   :  { %v3036_v33 = vmul.f32 1.442695, %v3033_v15  ;;  %v3032_v61 = vsub.f32 %v3017_v43, %v3028_v27 }
0x16e9   :  { %v3114_v47 = vpop.permute.xlu1 %3113 }
0x16ea   :  { %5771 = vpow2.f32 %v3036_v33  ;;  %v3034_v42 = vmul.f32 1.442695, %v3032_v61  ;;  %5395 = vmatprep.subr.msk.mxu1 %vm513_vm0, %v3114_v47  ;;  %v6692_v61 = vadd.f32 %v6611_v30, %v6574_v40 }
0x16eb   :  { %5396 = vmatpush3.xpose.msk.msra.mxu1 %vm513_vm0, %v3114_v47  ;;  %v3051_v48 = vpop.permute.xlu0 %3050 }
0x16ec   :  { %5773 = vpow2.f32 %v3034_v42  ;;  %5390 = vmatpush3.bf16.msra.mxu0 %v3051_v48 }
0x16ed   :  { %v3285_v0 = vpop.permute.xlu1 %3284 }
0x16ee   :  { %5408 = vmatprep.subr.msk.mxu0 %vm513_vm0, %v3285_v0 }
0x16f1   :  { %v3112_v41 = vpop.permute.xlu1 %3111 }
0x16f2   :  { %5397 = vmatprep.subr.msk.mxu1 %vm513_vm0, %v3112_v41 }
0x16f3   :  { %5398 = vmatpush3.xpose.msk.msra.mxu1 %vm513_vm0, %v3112_v41  ;;  %v6701_v41 = vadd.f32 %v6609_v14, %v6566_v23 }
0x16f4   :  { %5402 = vmatprep.subr.bf16.mxu1 %v6056_v28 }
0x16f5   :  { %v3108_v35 = vpop.permute.xlu1 %3107 }
0x16f6   :  { %5399 = vmatprep.mubr.msk.f32.mxu1 %vm513_vm0, %v3108_v35 }
0x16f7   :  { %v5772_v50 = vpop.eup %5771 }
0x16f8   :  { %v3041_v51 = vsel %vm601_vm1, %v5772_v50, 0.0 }
0x16f9   :  { %v5774_v54 = vpop.eup %5773  ;;  %3042 = vadd.xlane.f32.xlu0 %v3041_v51  ;;  %v3279_v8 = vpop.permute.xlu1 %3278 }
0x16fa   :  { %v3038_v55 = vsel %vm601_vm1, %v5774_v54, 0.0 }
0x16fd   :  { %3039 = vadd.xlane.f32.xlu0 %v3038_v55 }
0x1713   :  { %3282 = vrot.lane.b32.xlu0 %v6580_v46, %s6059_s17 }
0x1717   :  { %3109 = vrot.lane.b32.xlu0 %v6591_v39, %s6051_s1 }
0x171b   :  { %3280 = vrot.lane.b32.xlu0 %v6591_v39, %s6059_s17 }
0x1782   :  { %v3043_v57 = vpop.xlane.xlu0 %3042 }
0x1783   :  { %5775 = vrcp.f32 %v3043_v57 }
0x1786   :  { %v3040_v62 = vpop.xlane.xlu0 %3039 }
0x1787   :  { %5777 = vrcp.f32 %v3040_v62 }
0x178a   :  { %v3283_v1 = vpop.permute.xlu0 %3282 }
0x178e   :  { %v3110_v3 = vpop.permute.xlu0 %3109 }
0x178f   :  { %5400 = vmatmul.mubr.msk.f32.vlgmr.msra.gmra.mxu1 %vm513_vm0, %v3110_v3 }
0x1790   :  { %5404 = vmatprep.mubr.msk.bf16.mxu1 %vm6058_vm2, %v6056_v28  ;;  %v5776_v4 = vpop.eup %5775 }
0x1791   :  { %v3047_v6 = vmul.f32 %v5776_v4, %v5772_v50  ;;  %v6708_v50 = vadd.f32 %v6607_v53, %v6574_v40 }
0x1792   :  { %v3281_v39 = vpop.permute.xlu0 %3280 }
0x1794   :  { %v5778_v5 = vpop.eup %5777 }
0x1795   :  { %v3046_v46 = vmul.f32 %v5778_v5, %v5774_v54 }
0x1797   :  { %v3048_v7 = vpack.c.bf16 %v3047_v6, %v3046_v46 }
0x1799   :  { %5392 = vmatmul.mubr.msk.bf16.vlgmr.msra.gmra.mxu0 %vm601_vm1, %v3048_v7 }
0x179a   :  { %5409 = vmatpush3.xpose.msk.msra.mxu0 %vm513_vm0, %v3285_v0  ;;  %5412 = vmatprep.mubr.msk.f32.mxu0 %vm513_vm0, %v3279_v8 }
0x179b   :  { %5410 = vmatprep.subr.msk.mxu0 %vm513_vm0, %v3283_v1 }
0x179e   :  { %5411 = vmatpush3.xpose.msk.msra.mxu0 %vm513_vm0, %v3283_v1 }
0x179f   :  { %5415 = vmatprep.subr.bf16.mxu0 %v6056_v28 }
0x17a1   :  { %5413 = vmatmul.mubr.msk.f32.vlgmr.msra.gmra.mxu0 %vm513_vm0, %v3281_v39 }
0x17a2   :  { %5417 = vmatprep.mubr.msk.bf16.mxu0 %vm6058_vm2, %v6056_v28 }
0x184f   :  { %v5401_v9 = vpop.f32.mrf.mxu1 }
0x1850   :  { %v3201_v59 = vsel %vm601_vm1, %v5401_v9, -inf }
0x1851   :  { %3202 = vmax.xlane.f32.xlu0 %v3201_v59  ;;  %v3189_v49 = vpop.f32.mrf.mxu1 }
0x1852   :  { %v3198_v10 = vsel %vm601_vm1, %v3189_v49, -inf }
0x1853   :  { %3199 = vmax.xlane.f32.xlu1 %v3198_v10 }
0x1859   :  { %v6680_v11 = vpop.f32.mrf.mxu0 }
0x185b   :  { %v5393_v12 = vpop.f32.mrf.mxu0 }
0x185d   :  { %v6682_v13 = vpop.f32.mrf.mxu0 }
0x185f   :  { %v5394_v17 = vpop.f32.mrf.mxu0 }
0x1861   :  { %v5414_v18 = vpop.f32.mrf.mxu0 }
0x1862   :  { %v3372_v22 = vsel %vm601_vm1, %v5414_v18, -inf }
0x1863   :  { %v3360_v24 = vpop.f32.mrf.mxu0 }
0x1864   :  { %v3369_v60 = vsel %vm601_vm1, %v3360_v24, -inf }
0x1865   :  { %3370 = vmax.xlane.f32.xlu0 %v3369_v60 }
0x1869   :  { %3373 = vmax.xlane.f32.xlu0 %v3372_v22 }
0x18da   :  { %v3203_v32 = vpop.xlane.xlu0 %3202 }
0x18db   :  { %v3205_v25 = vsub.f32 %v5401_v9, %v3203_v32 }
0x18dc   :  { %v3200_v45 = vpop.xlane.xlu1 %3199 }
0x18dd   :  { %v3208_v34 = vmul.f32 1.442695, %v3205_v25  ;;  %v3204_v44 = vsub.f32 %v3189_v49, %v3200_v45 }
0x18df   :  { %5779 = vpow2.f32 %v3208_v34  ;;  %v3206_v56 = vmul.f32 1.442695, %v3204_v44 }
0x18e1   :  { %5781 = vpow2.f32 %v3206_v56 }
0x18ec   :  { %v5780_v19 = vpop.eup %5779 }
0x18ed   :  { %v3213_v36 = vsel %vm601_vm1, %v5780_v19, 0.0 }
0x18ee   :  { %v5782_v43 = vpop.eup %5781  ;;  %3214 = vadd.xlane.f32.xlu0 %v3213_v36  ;;  %v3371_v37 = vpop.xlane.xlu0 %3370 }
0x18ef   :  { %v3210_v38 = vsel %vm601_vm1, %v5782_v43, 0.0  ;;  %v3375_v48 = vsub.f32 %v3360_v24, %v3371_v37 }
0x18f0   :  { %3211 = vadd.xlane.f32.xlu1 %v3210_v38 }
0x18f1   :  { %v3377_v0 = vmul.f32 1.442695, %v3375_v48 }
0x18f2   :  { %v3374_v15 = vpop.xlane.xlu0 %3373 }
0x18f3   :  { %v3376_v27 = vsub.f32 %v5414_v18, %v3374_v15 }
0x18f5   :  { %v3379_v33 = vmul.f32 1.442695, %v3376_v27 }
0x18f7   :  { %5783 = vpow2.f32 %v3379_v33 }
0x18f8   :  { %5785 = vpow2.f32 %v3377_v0 }
0x1901   :  { %3221 = vrot.lane.b32.xlu1 %v6602_v26, %s6051_s1 }
0x1904   :  { %v5784_v47 = vpop.eup %5783 }
0x1905   :  { %3612 = vrot.lane.b32.xlu1 %v6692_v61, %s6057_s6  ;;  %v3384_v42 = vsel %vm601_vm1, %v5784_v47, 0.0  ;;  %v5786_v30 = vpop.eup %5785 }
0x1906   :  { %3385 = vadd.xlane.f32.xlu0 %v3384_v42  ;;  %v3381_v35 = vsel %vm601_vm1, %v5786_v30, 0.0 }
0x191c   :  { %3392 = vrot.lane.b32.xlu0 %v6602_v26, %s6059_s17  ;;  %v6714_v26 = vadd.f32 %v6605_v52, %v6566_v23 }
0x1920   :  { %3608 = vrot.lane.b32.xlu0 %v6701_v41, %s6057_s6 }
0x1929   :  { %3382 = vadd.xlane.f32.xlu1 %v3381_v35 }
0x193a   :  { %3610 = vrot.lane.b32.xlu1 %v6708_v50, %s6057_s6 }
0x193e   :  { %3606 = vrot.lane.b32.xlu1 %v6714_v26, %s6057_s6 }
0x1977   :  { %v3215_v14 = vpop.xlane.xlu0 %3214 }
0x1978   :  { %5787 = vrcp.f32 %v3215_v14 }
0x1979   :  { %v3212_v51 = vpop.xlane.xlu1 %3211 }
0x197a   :  { %5789 = vrcp.f32 %v3212_v51 }
0x197d   :  { %v3222_v54 = vpop.permute.xlu1 %3221 }
0x197e   :  { %5403 = vmatpush3.bf16.msra.mxu1 %v3222_v54 }
0x197f   :  { %5421 = vmatprep.subr.msk.mxu1 %vm513_vm0, %v6692_v61 }
0x1981   :  { %v3613_v1 = vpop.permute.xlu1 %3612 }
0x1985   :  { %v5788_v40 = vpop.eup %5787 }
0x1986   :  { %v3219_v57 = vmul.f32 %v5788_v40, %v5780_v19 }
0x1987   :  { %v5790_v53 = vpop.eup %5789 }
0x1988   :  { %v3218_v55 = vmul.f32 %v5790_v53, %v5782_v43 }
0x198a   :  { %v3220_v62 = vpack.c.bf16 %v3219_v57, %v3218_v55 }
0x198c   :  { %5405 = vmatmul.mubr.msk.bf16.vlgmr.msra.gmra.mxu1 %vm601_vm1, %v3220_v62 }
0x198d   :  { %5422 = vmatpush3.xpose.msk.msra.mxu1 %vm513_vm0, %v6692_v61  ;;  %5425 = vmatprep.mubr.msk.f32.mxu1 %vm513_vm0, %v6714_v26 }
0x198e   :  { %5423 = vmatprep.subr.msk.mxu1 %vm513_vm0, %v6708_v50 }
0x198f   :  { %v3386_v23 = vpop.xlane.xlu0 %3385 }
0x1990   :  { %5791 = vrcp.f32 %v3386_v23 }
0x1991   :  { %5424 = vmatpush3.xpose.msk.msra.mxu1 %vm513_vm0, %v6708_v50 }
0x1992   :  { %5428 = vmatprep.subr.bf16.mxu1 %v6056_v28 }
0x1993   :  { %v3393_v52 = vpop.permute.xlu0 %3392 }
0x1994   :  { %5416 = vmatpush3.bf16.msra.mxu0 %v3393_v52  ;;  %5426 = vmatmul.mubr.msk.f32.vlgmr.msra.gmra.mxu1 %vm513_vm0, %v6701_v41 }
0x1995   :  { %5429 = vmatpush3.bf16.msra.mxu1 %v6600_v2  ;;  %5434 = vmatprep.subr.msk.mxu0 %vm513_vm0, %v3613_v1 }
0x1996   :  { %5430 = vmatprep.mubr.msk.bf16.mxu1 %vm6058_vm2, %v6056_v28 }
0x1997   :  { %v3609_v9 = vpop.permute.xlu0 %3608 }
0x199d   :  { %v5792_v4 = vpop.eup %5791 }
0x199e   :  { %v3390_v7 = vmul.f32 %v5792_v4, %v5784_v47 }
0x19b2   :  { %v3383_v3 = vpop.xlane.xlu1 %3382 }
0x19b3   :  { %5793 = vrcp.f32 %v3383_v3 }
0x19b6   :  { %v3611_v5 = vpop.permute.xlu1 %3610 }
0x19ba   :  { %v3607_v39 = vpop.permute.xlu1 %3606 }
0x19c0   :  { %v5794_v46 = vpop.eup %5793 }
0x19c1   :  { %v3389_v6 = vmul.f32 %v5794_v46, %v5786_v30 }
0x19c3   :  { %v3391_v8 = vpack.c.bf16 %v3390_v7, %v3389_v6 }
0x19c5   :  { %5418 = vmatmul.mubr.msk.bf16.vlgmr.msra.gmra.mxu0 %vm601_vm1, %v3391_v8 }
0x19c6   :  { %5435 = vmatpush3.xpose.msk.msra.mxu0 %vm513_vm0, %v3613_v1  ;;  %5438 = vmatprep.mubr.msk.f32.mxu0 %vm513_vm0, %v3607_v39 }
0x19c7   :  { %5436 = vmatprep.subr.msk.mxu0 %vm513_vm0, %v3611_v5 }
0x19ca   :  { %5437 = vmatpush3.xpose.msk.msra.mxu0 %vm513_vm0, %v3611_v5 }
0x19cb   :  { %5441 = vmatprep.subr.bf16.mxu0 %v6056_v28 }
0x19cd   :  { %5439 = vmatmul.mubr.msk.f32.vlgmr.msra.gmra.mxu0 %vm513_vm0, %v3609_v9 }
0x19ce   :  { %5443 = vmatprep.mubr.msk.bf16.mxu0 %vm6058_vm2, %v6056_v28 }
0x1a4c   :  { %v6745_v59 = vpop.f32.mrf.mxu1 }
0x1a4e   :  { %v5406_v49 = vpop.f32.mrf.mxu1 }
0x1a50   :  { %v6747_v10 = vpop.f32.mrf.mxu1 }
0x1a52   :  { %v5407_v12 = vpop.f32.mrf.mxu1 }
0x1a54   :  { %v5427_v17 = vpop.f32.mrf.mxu1 }
0x1a55   :  { %v3539_v18 = vsel %vm601_vm1, %v5427_v17, -inf }
0x1a56   :  { %3540 = vmax.xlane.f32.xlu0 %v3539_v18  ;;  %v3527_v24 = vpop.f32.mrf.mxu1 }
0x1a57   :  { %v3536_v60 = vsel %vm601_vm1, %v3527_v24, -inf }
0x1a58   :  { %3537 = vmax.xlane.f32.xlu1 %v3536_v60 }
0x1a85   :  { %v6751_v22 = vpop.f32.mrf.mxu0 }
0x1a87   :  { %v5419_v32 = vpop.f32.mrf.mxu0 }
0x1a89   :  { %v6753_v25 = vpop.f32.mrf.mxu0 }
0x1a8b   :  { %v5420_v45 = vpop.f32.mrf.mxu0 }
0x1a8d   :  { %v5440_v34 = vpop.f32.mrf.mxu0 }
0x1a8e   :  { %v3700_v19 = vsel %vm601_vm1, %v5440_v34, -inf }
0x1a8f   :  { %v3688_v44 = vpop.f32.mrf.mxu0 }
0x1a90   :  { %v3697_v56 = vsel %vm601_vm1, %v3688_v44, -inf }
0x1a91   :  { %3698 = vmax.xlane.f32.xlu0 %v3697_v56 }
0x1a95   :  { %3701 = vmax.xlane.f32.xlu0 %v3700_v19 }
0x1adf   :  { %v3541_v36 = vpop.xlane.xlu0 %3540 }
0x1ae0   :  { %v3543_v43 = vsub.f32 %v5427_v17, %v3541_v36 }
0x1ae1   :  { %v3538_v37 = vpop.xlane.xlu1 %3537 }
0x1ae2   :  { %v3546_v38 = vmul.f32 1.442695, %v3543_v43  ;;  %v3542_v15 = vsub.f32 %v3527_v24, %v3538_v37 }
0x1ae4   :  { %5795 = vpow2.f32 %v3546_v38  ;;  %v3544_v27 = vmul.f32 1.442695, %v3542_v15 }
0x1ae6   :  { %5797 = vpow2.f32 %v3544_v27 }
0x1af1   :  { %v5796_v33 = vpop.eup %5795 }
0x1af2   :  { %v3551_v47 = vsel %vm601_vm1, %v5796_v33, 0.0 }
0x1af3   :  { %v5798_v42 = vpop.eup %5797  ;;  %3552 = vadd.xlane.f32.xlu0 %v3551_v47 }
0x1af4   :  { %v3548_v48 = vsel %vm601_vm1, %v5798_v42, 0.0 }
0x1af5   :  { %3549 = vadd.xlane.f32.xlu1 %v3548_v48 }
0x1b06   :  { %3721 = vrot.lane.b32.xlu1 %v6600_v2, %s6057_s6 }
0x1b0a   :  { %3955 = vrot.lane.b32.xlu1 %v6692_v61, %s6059_s17 }
0x1b0e   :  { %3782 = vrot.lane.b32.xlu1 %v6708_v50, %s6051_s1 }
0x1b12   :  { %3953 = vrot.lane.b32.xlu1 %v6708_v50, %s6059_s17 }
0x1b1a   :  { %v3699_v0 = vpop.xlane.xlu0 %3698 }
0x1b1b   :  { %v3703_v30 = vsub.f32 %v3688_v44, %v3699_v0 }
0x1b1d   :  { %v3705_v51 = vmul.f32 1.442695, %v3703_v30 }
0x1b1e   :  { %v3702_v35 = vpop.xlane.xlu0 %3701 }
0x1b1f   :  { %v3704_v14 = vsub.f32 %v5440_v34, %v3702_v35 }
0x1b21   :  { %v3707_v54 = vmul.f32 1.442695, %v3704_v14 }
0x1b23   :  { %5799 = vpow2.f32 %v3707_v54 }
0x1b24   :  { %5801 = vpow2.f32 %v3705_v51 }
0x1b30   :  { %v5800_v40 = vpop.eup %5799 }
0x1b31   :  { %v3712_v53 = vsel %vm601_vm1, %v5800_v40, 0.0  ;;  %v5802_v55 = vpop.eup %5801 }
0x1b32   :  { %3713 = vadd.xlane.f32.xlu0 %v3712_v53  ;;  %v3709_v57 = vsel %vm601_vm1, %v5802_v55, 0.0 }
0x1b36   :  { %3710 = vadd.xlane.f32.xlu1 %v3709_v57 }
0x1b47   :  { %3780 = vrot.lane.b32.xlu1 %v6701_v41, %s6051_s1 }
0x1b48   :  { %3784 = vrot.lane.b32.xlu0 %v6692_v61, %s6051_s1 }
0x1b4b   :  { %3951 = vrot.lane.b32.xlu1 %v6701_v41, %s6059_s17 }
0x1b4c   :  { %3778 = vrot.lane.b32.xlu0 %v6714_v26, %s6051_s1 }
0x1b50   :  { %3949 = vrot.lane.b32.xlu0 %v6714_v26, %s6059_s17 }
0x1b7c   :  { %v3553_v50 = vpop.xlane.xlu0 %3552 }
0x1b7d   :  { %5803 = vrcp.f32 %v3553_v50 }
0x1b7e   :  { %v3550_v62 = vpop.xlane.xlu1 %3549 }
0x1b7f   :  { %5805 = vrcp.f32 %v3550_v62 }
0x1b82   :  { %v3722_v23 = vpop.permute.xlu1 %3721 }
0x1b83   :  { %5442 = vmatpush3.bf16.msra.mxu0 %v3722_v23 }
0x1b86   :  { %v3956_v52 = vpop.permute.xlu1 %3955 }
0x1b87   :  { %5460 = vmatprep.subr.msk.mxu0 %vm513_vm0, %v3956_v52 }
0x1b8a   :  { %v5804_v1 = vpop.eup %5803  ;;  %v3783_v5 = vpop.permute.xlu1 %3782 }
0x1b8b   :  { %v3557_v4 = vmul.f32 %v5804_v1, %v5796_v33 }
0x1b8c   :  { %v5806_v61 = vpop.eup %5805 }
0x1b8d   :  { %v3556_v3 = vmul.f32 %v5806_v61, %v5798_v42 }
0x1b8e   :  { %v3954_v46 = vpop.permute.xlu1 %3953 }
0x1b8f   :  { %v3558_v41 = vpack.c.bf16 %v3557_v4, %v3556_v3 }
0x1b91   :  { %5431 = vmatmul.mubr.msk.bf16.vlgmr.msra.gmra.mxu1 %vm601_vm1, %v3558_v41 }
0x1bbb   :  { %v3714_v6 = vpop.xlane.xlu0 %3713 }
0x1bbc   :  { %5807 = vrcp.f32 %v3714_v6 }
0x1bbf   :  { %v3785_v26 = vpop.permute.xlu0 %3784  ;;  %v3711_v7 = vpop.xlane.xlu1 %3710 }
0x1bc0   :  { %5809 = vrcp.f32 %v3711_v7  ;;  %5447 = vmatprep.subr.msk.mxu1 %vm513_vm0, %v3785_v26 }
0x1bc1   :  { %5448 = vmatpush3.xpose.msk.msra.mxu1 %vm513_vm0, %v3785_v26 }
0x1bc2   :  { %5449 = vmatprep.subr.msk.mxu1 %vm513_vm0, %v3783_v5 }
0x1bc3   :  { %v3779_v8 = vpop.permute.xlu0 %3778  ;;  %v3781_v39 = vpop.permute.xlu1 %3780 }
0x1bc4   :  { %5451 = vmatprep.mubr.msk.f32.mxu1 %vm513_vm0, %v3779_v8 }
0x1bc5   :  { %5450 = vmatpush3.xpose.msk.msra.mxu1 %vm513_vm0, %v3783_v5 }
0x1bc6   :  { %5454 = vmatprep.subr.bf16.mxu1 %v6056_v28 }
0x1bc7   :  { %v3950_v24 = vpop.permute.xlu0 %3949  ;;  %v3952_v60 = vpop.permute.xlu1 %3951 }
0x1bc8   :  { %5452 = vmatmul.mubr.msk.f32.vlgmr.msra.gmra.mxu1 %vm513_vm0, %v3781_v39 }
0x1bc9   :  { %5456 = vmatprep.mubr.msk.bf16.mxu1 %vm6058_vm2, %v6056_v28  ;;  %v5808_v9 = vpop.eup %5807 }
0x1bca   :  { %v3718_v17 = vmul.f32 %v5808_v9, %v5800_v40 }
0x1bcd   :  { %v5810_v49 = vpop.eup %5809 }
0x1bce   :  { %v3717_v12 = vmul.f32 %v5810_v49, %v5802_v55 }
0x1bd0   :  { %v3719_v18 = vpack.c.bf16 %v3718_v17, %v3717_v12 }
0x1bd2   :  { %5444 = vmatmul.mubr.msk.bf16.vlgmr.msra.gmra.mxu0 %vm601_vm1, %v3719_v18 }
0x1bd3   :  { %5461 = vmatpush3.xpose.msk.msra.mxu0 %vm513_vm0, %v3956_v52  ;;  %5464 = vmatprep.mubr.msk.f32.mxu0 %vm513_vm0, %v3950_v24 }
0x1bd4   :  { %5462 = vmatprep.subr.msk.mxu0 %vm513_vm0, %v3954_v46 }
0x1bd7   :  { %5463 = vmatpush3.xpose.msk.msra.mxu0 %vm513_vm0, %v3954_v46 }
0x1bd8   :  { %5467 = vmatprep.subr.bf16.mxu0 %v6056_v28 }
0x1bda   :  { %5465 = vmatmul.mubr.msk.f32.vlgmr.msra.gmra.mxu0 %vm513_vm0, %v3952_v60 }
0x1bdb   :  { %5469 = vmatprep.mubr.msk.bf16.mxu0 %vm6058_vm2, %v6056_v28 }
0x1c51   :  { %v3597_v32 = vpop.f32.mrf.mxu1 }
0x1c52   :  { %3604 = vst.msk [vmem:[#allocation2 + $0x10] sm:$0xff] %vm513_vm0, %v3597_v32 }
0x1c53   :  { %v5432_v45 = vpop.f32.mrf.mxu1 }
0x1c55   :  { %v3600_v34 = vpop.f32.mrf.mxu1 }
0x1c56   :  { %3605 = vst.msk [vmem:[#allocation2 + $0x18] sm:$0xff] %vm513_vm0, %v3600_v34 }
0x1c57   :  { %v5433_v44 = vpop.f32.mrf.mxu1 }
0x1c88   :  { %v5453_v56 = vpop.f32.mrf.mxu1 }
0x1c89   :  { %v3872_v19 = vsel %vm601_vm1, %v5453_v56, -inf }
0x1c8a   :  { %3873 = vmax.xlane.f32.xlu1 %v3872_v19  ;;  %v3860_v36 = vpop.f32.mrf.mxu1 }
0x1c8b   :  { %v3869_v43 = vsel %vm601_vm1, %v3860_v36, -inf }
0x1c8c   :  { %3870 = vmax.xlane.f32.xlu0 %v3869_v43  ;;  %v5628_v43 = vld [vmem:[#allocation11 + $0x70] sm:$0xff]  }
0x1c92   :  { %v3761_v37 = vpop.f32.mrf.mxu0 }
0x1c94   :  { %v5445_v38 = vpop.f32.mrf.mxu0 }
0x1c95   :  { %v5630_v38 = vld [vmem:[#allocation11 + $0x60] sm:$0xff]  }
0x1c96   :  { %v3764_v15 = vpop.f32.mrf.mxu0 }
0x1c98   :  { %v5446_v28 = vpop.f32.mrf.mxu0 }
0x1c9a   :  { %v5466_v27 = vpop.f32.mrf.mxu0 }
0x1c9b   :  { %v4043_v42 = vsel %vm601_vm1, %v5466_v27, -inf }
0x1c9c   :  { %v4031_v33 = vpop.f32.mrf.mxu0 }
0x1c9d   :  { %v4040_v47 = vsel %vm601_vm1, %v4031_v33, -inf }
0x1c9e   :  { %4041 = vmax.xlane.f32.xlu0 %v4040_v47 }
0x1ca2   :  { %4044 = vmax.xlane.f32.xlu0 %v4043_v42 }
0x1d13   :  { %v3874_v48 = vpop.xlane.xlu1 %3873 }
0x1d14   :  { %v3876_v0 = vsub.f32 %v5453_v56, %v3874_v48  ;;  %v5633_v48 = vld [vmem:[#allocation11 + $0x48] sm:$0xff]  }
0x1d15   :  { %v3871_v30 = vpop.xlane.xlu0 %3870 }
0x1d16   :  { %v3879_v35 = vmul.f32 1.442695, %v3876_v0  ;;  %v3875_v14 = vsub.f32 %v3860_v36, %v3871_v30  ;;  %v5627_v36 = vld [vmem:[#allocation11 + $0x78] sm:$0xff]   ;;  %v5634_v0 = vld [vmem:[#allocation11 + $0x40] sm:$0xff]  }
0x1d18   :  { %5811 = vpow2.f32 %v3879_v35  ;;  %v3877_v51 = vmul.f32 1.442695, %v3875_v14 }
0x1d1a   :  { %5813 = vpow2.f32 %v3877_v51 }
0x1d25   :  { %v5812_v54 = vpop.eup %5811 }
0x1d26   :  { %v3884_v40 = vsel %vm601_vm1, %v5812_v54, 0.0 }
0x1d27   :  { %v5814_v53 = vpop.eup %5813  ;;  %v4042_v55 = vpop.xlane.xlu0 %4041  ;;  %3885 = vadd.xlane.f32.xlu1 %v3884_v40 }
0x1d28   :  { %v4046_v57 = vsub.f32 %v4031_v33, %v4042_v55  ;;  %v3881_v50 = vsel %vm601_vm1, %v5814_v53, 0.0  ;;  %v5632_v33 = vld [vmem:[#allocation11 + $0x50] sm:$0xff]  }
0x1d29   :  { %3882 = vadd.xlane.f32.xlu0 %v3881_v50 }
0x1d2a   :  { %v4048_v62 = vmul.f32 1.442695, %v4046_v57 }
0x1d2b   :  { %v4045_v23 = vpop.xlane.xlu0 %4044 }
0x1d2c   :  { %5815 = vpow2.f32 %v4048_v62  ;;  %v4047_v52 = vsub.f32 %v5466_v27, %v4045_v23 }
0x1d2e   :  { %v4050_v1 = vmul.f32 1.442695, %v4047_v52 }
0x1d30   :  { %5817 = vpow2.f32 %v4050_v1 }
0x1d39   :  { %v5816_v61 = vpop.eup %5815 }
0x1d3a   :  { %v4052_v3 = vsel %vm601_vm1, %v5816_v61, 0.0 }
0x1d3b   :  { %4053 = vadd.xlane.f32.xlu0 %v4052_v3 }
0x1d3d   :  { %v5818_v4 = vpop.eup %5817 }
0x1d3e   :  { %v4055_v41 = vsel %vm601_vm1, %v5818_v4, 0.0 }
0x1d3f   :  { %4056 = vadd.xlane.f32.xlu1 %v4055_v41 }
0x1d50   :  { %4063 = vrot.lane.b32.xlu1 %v6600_v2, %s6059_s17 }
0x1d51   :  { %3892 = vrot.lane.b32.xlu0 %v6600_v2, %s6051_s1 }
0x1d54   :  { %3099 = vrot.lane.b32.xlu1 %v6680_v11, %s6059_s17 }
0x1d55   :  { %3270 = vrot.lane.b32.xlu0 %v6745_v59, %s6051_s1 }
0x1d58   :  { %3101 = vrot.lane.b32.xlu1 %v6682_v13, %s6059_s17 }
0x1d59   :  { %3770 = vrot.lane.b32.xlu0 %v3761_v37, %s6059_s17  ;;  %v5629_v37 = vld [vmem:[#allocation11 + $0x68] sm:$0xff]  }
0x1d5c   :  { %3272 = vrot.lane.b32.xlu1 %v6747_v10, %s6051_s1 }
0x1d5d   :  { %3441 = vrot.lane.b32.xlu0 %v6751_v22, %s6057_s6 }
0x1d60   :  { %3772 = vrot.lane.b32.xlu1 %v3764_v15, %s6059_s17  ;;  %v5631_v15 = vld [vmem:[#allocation11 + $0x58] sm:$0xff]  }
0x1d64   :  { %3443 = vrot.lane.b32.xlu1 %v6753_v25, %s6057_s6 }
0x1db0   :  { %v3886_v11 = vpop.xlane.xlu1 %3885 }
0x1db2   :  { %v3883_v2 = vpop.xlane.xlu0 %3882 }
0x1db3   :  { %5819 = vrcp.f32 %v3883_v2 }
0x1db4   :  { %5821 = vrcp.f32 %v3886_v11 }
0x1dc0   :  { %v5820_v59 = vpop.eup %5819 }
0x1dc1   :  { %v5822_v13 = vpop.eup %5821  ;;  %v3889_v46 = vmul.f32 %v5820_v59, %v5814_v53 }
0x1dc2   :  { %v3890_v10 = vmul.f32 %v5822_v13, %v5812_v54 }
0x1dc4   :  { %v4054_v5 = vpop.xlane.xlu0 %4053  ;;  %v3891_v22 = vpack.c.bf16 %v3890_v10, %v3889_v46  ;;  %v5637_v46 = vld [vmem:[#allocation14 + $0xf4] ss:$8 sps:$4 sm:$0xff]  }
0x1dc5   :  { %5823 = vrcp.f32 %v4054_v5 }
0x1dc8   :  { %v3893_v6 = vpop.permute.xlu0 %3892  ;;  %v4057_v26 = vpop.xlane.xlu1 %4056 }
0x1dc9   :  { %5825 = vrcp.f32 %v4057_v26  ;;  %5455 = vmatpush3.bf16.msra.mxu1 %v3893_v6 }
0x1dca   :  { %5473 = vmatprep.subr.bf16.mxu1 %v5627_v36 }
0x1dcc   :  { %v3271_v7 = vpop.permute.xlu0 %3270  ;;  %5457 = vmatmul.mubr.msk.bf16.vlgmr.msra.gmra.mxu1 %vm601_vm1, %v3891_v22  ;;  %v4064_v8 = vpop.permute.xlu1 %4063 }
0x1dcd   :  { %5468 = vmatpush3.bf16.msra.mxu0 %v4064_v8  ;;  %5474 = vmatpush3.bf16.msra.mxu1 %v5627_v36  ;;  %v5649_v36 = vld [vmem:[#allocation14 + $0xb4] ss:$8 sps:$4 sm:$0xff]  }
0x1dce   :  { %5475 = vmatprep.subr.bf16.mxu1 %v5628_v43  ;;  %4436 = vmatprep.subr.bf16.mxu0 %v5637_v46 }
0x1dd0   :  { %v3771_v25 = vpop.permute.xlu0 %3770  ;;  %v3100_v39 = vpop.permute.xlu1 %3099 }
0x1dd1   :  { %3776 = vst.msk [vmem:[#allocation2 + $0x10] sm:$0xff] %vm842_vm3, %v3771_v25  ;;  %3105 = vst.msk [vmem:[#allocation2] sm:$0xff] %vm842_vm3, %v3100_v39  ;;  %5476 = vmatpush3.bf16.msra.mxu1 %v5628_v43  ;;  %v5652_v43 = vld [vmem:[#allocation14 + $0xa4] ss:$8 sps:$4 sm:$0xff]  }
0x1dd2   :  { %3276 = vst.msk [vmem:[#allocation2] sm:$0xff] %vm1014_vm4, %v3271_v7  ;;  %v5824_v9 = vpop.eup %5823  ;;  %5477 = vmatprep.subr.bf16.mxu1 %v5629_v37 }
0x1dd3   :  { %v4060_v18 = vmul.f32 %v5824_v9, %v5816_v61  ;;  %v4971_v61 = vld [vmem:[#allocation12 + $0x1] ss:$0 sm:$0xff] }
0x1dd4   :  { %v3442_v49 = vpop.permute.xlu0 %3441  ;;  %v3102_v12 = vpop.permute.xlu1 %3101 }
0x1dd5   :  { %3447 = vst.msk [vmem:[#allocation2] sm:$0xff] %vm1186_vm5, %v3442_v49  ;;  %5478 = vmatpush3.bf16.msra.mxu1 %v5629_v37  ;;  %v5650_v37 = vld [vmem:[#allocation14 + $0xa0] ss:$8 sps:$4 sm:$0xff]  }
0x1dd6   :  { %3106 = vst.msk [vmem:[#allocation2 + $0x8] sm:$0xff] %vm842_vm3, %v3102_v12  ;;  %v5826_v17 = vpop.eup %5825  ;;  %5479 = vmatprep.subr.bf16.mxu1 %v5630_v38 }
0x1dd7   :  { %v4061_v24 = vmul.f32 %v5826_v17, %v5818_v4 }
0x1dd8   :  { %v3273_v60 = vpop.permute.xlu1 %3272 }
0x1dd9   :  { %3277 = vst.msk [vmem:[#allocation2 + $0x8] sm:$0xff] %vm1014_vm4, %v3273_v60  ;;  %v4062_v32 = vpack.c.bf16 %v4061_v24, %v4060_v18  ;;  %5480 = vmatpush3.bf16.msra.mxu1 %v5630_v38  ;;  %v5640_v60 = vld [vmem:[#allocation14 + $0xe4] ss:$8 sps:$4 sm:$0xff]   ;;  %v5655_v38 = vld [vmem:[#allocation14 + $0x94] ss:$8 sps:$4 sm:$0xff]  }
0x1dda   :  { %5481 = vmatprep.subr.bf16.mxu1 %v5631_v15 }
0x1ddb   :  { %5470 = vmatmul.mubr.msk.bf16.vlgmr.msra.gmra.mxu0 %vm601_vm1, %v4062_v32  ;;  %v5638_v32 = vld [vmem:[#allocation14 + $0xe0] ss:$8 sps:$4 sm:$0xff]  }
0x1ddc   :  { %v3773_v45 = vpop.permute.xlu1 %3772  ;;  %4468 = vmatprep.mubr.bf16.mxu0 %v6055_v29  ;;  %v4120_v44 = vld [vmem:[#allocation2] sm:$0xff] }
0x1ddd   :  { %3777 = vst.msk [vmem:[#allocation2 + $0x18] sm:$0xff] %vm842_vm3, %v3773_v45  ;;  %5482 = vmatpush3.bf16.msra.mxu1 %v5631_v15  ;;  %v5643_v45 = vld [vmem:[#allocation14 + $0xd4] ss:$8 sps:$4 sm:$0xff]   ;;  %v5653_v15 = vld [vmem:[#allocation14 + $0x90] ss:$8 sps:$4 sm:$0xff]  }
0x1dde   :  { %5483 = vmatprep.subr.bf16.mxu1 %v5632_v33 }
0x1de0   :  { %v3444_v34 = vpop.permute.xlu1 %3443 }
0x1de1   :  { %3448 = vst.msk [vmem:[#allocation2 + $0x8] sm:$0xff] %vm1186_vm5, %v3444_v34  ;;  %5484 = vmatpush3.bf16.msra.mxu1 %v5632_v33  ;;  %v5641_v34 = vld [vmem:[#allocation14 + $0xd0] ss:$8 sps:$4 sm:$0xff]  }
0x1de2   :  { %5485 = vmatprep.subr.bf16.mxu1 %v5633_v48  ;;  %v5659_v33 = vld [vmem:[#allocation15 + $0xf8] sm:$0xff]  }
0x1de5   :  { %5486 = vmatpush3.bf16.msra.mxu1 %v5633_v48  ;;  %v5662_v48 = vld [vmem:[#allocation15 + $0xb0] sm:$0xff]  }
0x1de6   :  { %5487 = vmatprep.subr.bf16.mxu1 %v5634_v0 }
0x1de8   :  { %v4121_v56 = vld [vmem:[#allocation2 + $0x8] sm:$0xff] }
0x1de9   :  { %v4124_v19 = vpack.c.bf16 %v4121_v56, %v4120_v44  ;;  %5488 = vmatpush3.bf16.msra.mxu1 %v5634_v0  ;;  %v5646_v44 = vld [vmem:[#allocation14 + $0xc4] ss:$8 sps:$4 sm:$0xff]   ;;  %v5644_v56 = vld [vmem:[#allocation14 + $0xc0] ss:$8 sps:$4 sm:$0xff]  }
0x1dea   :  { %5177 = vmatprep.subr.bf16.mxu1 %v5659_v33  ;;  %v5663_v0 = vld [vmem:[#allocation15 + $0xe8] sm:$0xff]  }
0x1deb   :  { %5489 = vmatprep.mubr.bf16.mxu1 %v4124_v19  ;;  %v5647_v19 = vld [vmem:[#allocation14 + $0xb0] ss:$8 sps:$4 sm:$0xff]  }
0x1e8c   :  { %v3932_v28 = vpop.f32.mrf.mxu1 }
0x1e8d   :  { %3941 = vrot.lane.b32.xlu0 %v3932_v28, %s6051_s1  ;;  %v5658_v28 = vld [vmem:[#allocation14 + $0x84] ss:$8 sps:$4 sm:$0xff]  }
0x1e8e   :  { %v5458_v27 = vpop.f32.mrf.mxu1 }
0x1e8f   :  { %v5656_v27 = vld [vmem:[#allocation14 + $0x80] ss:$8 sps:$4 sm:$0xff]  }
0x1e90   :  { %v3935_v47 = vpop.f32.mrf.mxu1 }
0x1e91   :  { %3943 = vrot.lane.b32.xlu1 %v3935_v47, %s6051_s1  ;;  %v5660_v47 = vld [vmem:[#allocation15 + $0xb8] sm:$0xff]  }
0x1e92   :  { %v5459_v42 = vpop.f32.mrf.mxu1 }
0x1e93   :  { %v5661_v42 = vld [vmem:[#allocation15 + $0xf0] sm:$0xff]  }
0x1e9b   :  { %v4103_v30 = vpop.f32.mrf.mxu0 }
0x1e9c   :  { %4112 = vrot.lane.b32.xlu0 %v4103_v30, %s6057_s6  ;;  %v5664_v30 = vld [vmem:[#allocation15 + $0xa8] sm:$0xff]  }
0x1e9d   :  { %v5471_v35 = vpop.f32.mrf.mxu0 }
0x1e9e   :  { %v5665_v35 = vld [vmem:[#allocation15 + $0xe0] sm:$0xff]  }
0x1e9f   :  { %v4106_v14 = vpop.f32.mrf.mxu0 }
0x1ea0   :  { %4114 = vrot.lane.b32.xlu1 %v4106_v14, %s6057_s6  ;;  %v5666_v14 = vld [vmem:[#allocation15 + $0xa0] sm:$0xff]  }
0x1ea1   :  { %v5472_v51 = vpop.f32.mrf.mxu0 }
0x1ea2   :  { %v5667_v51 = vld [vmem:[#allocation15 + $0xd8] sm:$0xff]  }
0x1eff   :  { %v3942_v54 = vpop.permute.xlu0 %3941 }
0x1f00   :  { %3947 = vst.msk [vmem:[#allocation2 + $0x10] sm:$0xff] %vm1014_vm4, %v3942_v54  ;;  %v5668_v54 = vld [vmem:[#allocation15 + $0x98] sm:$0xff]  }
0x1f03   :  { %v3944_v40 = vpop.permute.xlu1 %3943 }
0x1f04   :  { %3948 = vst.msk [vmem:[#allocation2 + $0x18] sm:$0xff] %vm1014_vm4, %v3944_v40 }
0x1f0e   :  { %v4113_v53 = vpop.permute.xlu0 %4112 }
0x1f0f   :  { %4118 = vst.msk [vmem:[#allocation2 + $0x10] sm:$0xff] %vm1186_vm5, %v4113_v53 }
0x1f12   :  { %v4115_v55 = vpop.permute.xlu1 %4114 }
0x1f13   :  { %4119 = vst.msk [vmem:[#allocation2 + $0x18] sm:$0xff] %vm1186_vm5, %v4115_v55 }
0x1f16   :  { %v4122_v57 = vld [vmem:[#allocation2 + $0x10] sm:$0xff] }
0x1f1a   :  { %v4123_v50 = vld [vmem:[#allocation2 + $0x18] sm:$0xff] }
0x1f1b   :  { %v4125_v62 = vpack.c.bf16 %v4123_v50, %v4122_v57 }
0x1f1d   :  { %5490 = vmatmul.mubr.bf16.vlgmr.msra.gmra.mxu1 %v4125_v62 }
0x1f1e   :  { %5178 = vmatpush3.bf16.msra.mxu1 %v5660_v47 }
0x1f1f   :  { %5179 = vmatprep.subr.bf16.mxu1 %v5661_v42 }
0x1f22   :  { %5180 = vmatpush3.bf16.msra.mxu1 %v5662_v48 }
0x1f23   :  { %5181 = vmatprep.subr.bf16.mxu1 %v5663_v0 }
0x1f26   :  { %5182 = vmatpush3.bf16.msra.mxu1 %v5664_v30 }
0x1f27   :  { %5183 = vmatprep.subr.bf16.mxu1 %v5665_v35 }
0x1f2a   :  { %5184 = vmatpush3.bf16.msra.mxu1 %v5666_v14 }
0x1f2b   :  { %5185 = vmatprep.subr.bf16.mxu1 %v5667_v51 }
0x1f2e   :  { %5186 = vmatpush3.bf16.msra.mxu1 %v5668_v54 }
0x1fdd   :  { %v5491_v23 = vpop.f32.mrf.mxu1 }
0x1fde   :  { %v4242_v4 = vadd.f32 %v5491_v23, %v6548_v21  ;;  %v5635_v21 = vld [vmem:[#allocation14 + $0xf0] ss:$8 sps:$4 sm:$0xff]  }
0x1fdf   :  { %v4225_v52 = vpop.f32.mrf.mxu1  ;;  %4437 = vmatpush1.bf16.msra.mxu0 %v5635_v21 }
0x1fe0   :  { %v4240_v1 = vadd.f32 %v4225_v52, %v6532_v58  ;;  %v6852_v59 = vadd.f32 %v4971_v61, %v4242_v4  ;;  %4438 = vmatprep.subr.bf16.mxu0 %v5640_v60 }
0x1fe1   :  { %v5492_v3 = vpop.f32.mrf.mxu1 }
0x1fe2   :  { %v6848_v41 = vadd.f32 %v4971_v61, %v4240_v1  ;;  %v4243_v5 = vadd.f32 %v5492_v3, %v6554_v31 }
0x1fe3   :  { %v4228_v2 = vpop.f32.mrf.mxu1  ;;  %4439 = vmatpush1.bf16.msra.mxu0 %v5638_v32  ;;  %v5669_v32 = vld [vmem:[#allocation15 + $0xd0] sm:$0xff]  }
0x1fe4   :  { %v4241_v11 = vadd.f32 %v4228_v2, %v6536_v63  ;;  %4260 = vadd.xlane.f32.xlu0 %v6848_v41  ;;  %v6859_v58 = vadd.f32 %v4971_v61, %v4243_v5  ;;  %4440 = vmatprep.subr.bf16.mxu0 %v5643_v45  ;;  %v4974_v5 = vld [vmem:[%s6924_s7 + $0x1] ss:$0 sm:$0xff]  ;;  %v5670_v45 = vld [vmem:[#allocation15 + $0x90] sm:$0xff]  }
0x1fe5   :  { %5187 = vmatprep.subr.bf16.mxu1 %v5669_v32 }
0x1fe6   :  { %v6855_v13 = vadd.f32 %v4971_v61, %v4241_v11  ;;  %5188 = vmatpush3.bf16.msra.mxu1 %v5670_v45 }
0x1fe7   :  { %4441 = vmatpush1.bf16.msra.mxu0 %v5641_v34  ;;  %v5671_v34 = vld [vmem:[#allocation15 + $0xc8] sm:$0xff]  }
0x1fe8   :  { %4264 = vadd.xlane.f32.xlu0 %v6852_v59  ;;  %4262 = vadd.xlane.f32.xlu1 %v6855_v13 }
0x1fe9   :  { %4442 = vmatprep.subr.bf16.mxu0 %v5646_v44  ;;  %5189 = vmatprep.subr.bf16.mxu1 %v5671_v34  ;;  %v5673_v44 = vld [vmem:[#allocation15 + $0xc0] sm:$0xff]  }
0x1feb   :  { %4443 = vmatpush1.bf16.msra.mxu0 %v5644_v56 }
0x1fec   :  { %4266 = vadd.xlane.f32.xlu0 %v6859_v58  ;;  %4444 = vmatprep.subr.bf16.mxu0 %v5649_v36 }
0x1fef   :  { %4445 = vmatpush1.bf16.msra.mxu0 %v5647_v19 }
0x1ff0   :  { %4446 = vmatprep.subr.bf16.mxu0 %v5652_v43 }
0x1ff3   :  { %4447 = vmatpush1.bf16.msra.mxu0 %v5650_v37 }
0x1ff4   :  { %4448 = vmatprep.subr.bf16.mxu0 %v5655_v38 }
0x1ff7   :  { %4449 = vmatpush1.bf16.msra.mxu0 %v5653_v15 }
0x1ff8   :  { %4450 = vmatprep.subr.bf16.mxu0 %v5658_v28 }
0x1ffb   :  { %4451 = vmatpush1.bf16.msra.mxu0 %v5656_v27 }
0x206d   :  { %v4261_v63 = vpop.xlane.xlu0 %4260 }
0x206e   :  { %v4268_v6 = vmul.f32 0.0078125, %v4261_v63 }
0x2070   :  { %v6863_v26 = vsub.f32 %v6848_v41, %v4268_v6 }
0x2071   :  { %v4265_v31 = vpop.xlane.xlu0 %4264  ;;  %v4263_v10 = vpop.xlane.xlu1 %4262 }
0x2072   :  { %v4270_v22 = vmul.f32 0.0078125, %v4265_v31  ;;  %v4269_v7 = vmul.f32 0.0078125, %v4263_v10  ;;  %v4276_v8 = vmul.f32 %v6863_v26, %v6863_v26  ;;  %v4975_v31 = vld [vmem:[%s6925_s8 + $0x1] ss:$0 sm:$0xff] }
0x2074   :  { %v6868_v25 = vsub.f32 %v6852_v59, %v4270_v22  ;;  %v6871_v39 = vsub.f32 %v6855_v13, %v4269_v7  ;;  %4280 = vadd.xlane.f32.xlu0 %v4276_v8 }
0x2075   :  { %v4267_v9 = vpop.xlane.xlu0 %4266 }
0x2076   :  { %v4271_v49 = vmul.f32 0.0078125, %v4267_v9  ;;  %v4278_v12 = vmul.f32 %v6868_v25, %v6868_v25  ;;  %v4277_v17 = vmul.f32 %v6871_v39, %v6871_v39 }
0x2078   :  { %v6878_v18 = vsub.f32 %v6859_v58, %v4271_v49  ;;  %4284 = vadd.xlane.f32.xlu0 %v4278_v12  ;;  %4282 = vadd.xlane.f32.xlu1 %v4277_v17 }
0x207a   :  { %v4279_v24 = vmul.f32 %v6878_v18, %v6878_v18 }
0x207c   :  { %4286 = vadd.xlane.f32.xlu1 %v4279_v24 }
0x20fd   :  { %v4281_v40 = vpop.xlane.xlu0 %4280 }
0x20fe   :  { %v4288_v53 = vmul.f32 0.0078125, %v4281_v40 }
0x2100   :  { %v4292_v55 = vadd.f32 1e-05, %v4288_v53 }
0x2101   :  { %v4285_v57 = vpop.xlane.xlu0 %4284  ;;  %v4283_v50 = vpop.xlane.xlu1 %4282 }
0x2102   :  { %5827 = vrsqrt.f32 %v4292_v55  ;;  %v4290_v62 = vmul.f32 0.0078125, %v4285_v57  ;;  %v4289_v23 = vmul.f32 0.0078125, %v4283_v50 }
0x2104   :  { %v4293_v52 = vadd.f32 1e-05, %v4289_v23  ;;  %v4294_v1 = vadd.f32 1e-05, %v4290_v62 }
0x2105   :  { %v4287_v61 = vpop.xlane.xlu1 %4286 }
0x2106   :  { %v4291_v3 = vmul.f32 0.0078125, %v4287_v61  ;;  %5829 = vrsqrt.f32 %v4293_v52 }
0x2107   :  { %5831 = vrsqrt.f32 %v4294_v1 }
0x2108   :  { %v4295_v4 = vadd.f32 1e-05, %v4291_v3 }
0x210a   :  { %5833 = vrsqrt.f32 %v4295_v4 }
0x210f   :  { %v5828_v2 = vpop.eup %5827 }
0x2110   :  { %v4300_v11 = vmul.f32 %v5828_v2, %v6863_v26 }
0x2112   :  { %v4310_v63 = vmul.f32 %v4974_v5, %v4300_v11  ;;  %v5010_v11 = vld [vmem:[%s6929_s12 + $0x1] ss:$0 sm:$0xff] }
0x2113   :  { %v5830_v21 = vpop.eup %5829 }
0x2114   :  { %v4301_v46 = vmul.f32 %v5830_v21, %v6871_v39  ;;  %v5832_v6 = vpop.eup %5831  ;;  %v4320_v8 = vadd.f32 %v4975_v31, %v4310_v63 }
0x2115   :  { %v4302_v26 = vmul.f32 %v5832_v6, %v6868_v25  ;;  %v5674_v25 = vld [vmem:[#allocation15 + $0x80] sm:$0xff]  }
0x2116   :  { %v4311_v22 = vmul.f32 %v4974_v5, %v4301_v46 }
0x2117   :  { %v5834_v10 = vpop.eup %5833  ;;  %v4312_v17 = vmul.f32 %v4974_v5, %v4302_v26 }
0x2118   :  { %v4303_v7 = vmul.f32 %v5834_v10, %v6878_v18  ;;  %v4321_v9 = vadd.f32 %v4975_v31, %v4311_v22  ;;  %v5672_v18 = vld [vmem:[#allocation15 + $0x88] sm:$0xff]  }
0x2119   :  { %v4322_v24 = vadd.f32 %v4975_v31, %v4312_v17  ;;  %5190 = vmatpush3.bf16.msra.mxu1 %v5672_v18 }
0x211a   :  { %v4324_v49 = vpack.c.bf16 %v4321_v9, %v4320_v8  ;;  %v4313_v12 = vmul.f32 %v4974_v5, %v4303_v7  ;;  %5191 = vmatprep.subr.bf16.mxu1 %v5673_v44 }
0x211c   :  { %4469 = vmatmul.mubr.bf16.vlgmr.msra.gmra.mxu0 %v4324_v49  ;;  %v4323_v39 = vadd.f32 %v4975_v31, %v4313_v12 }
0x211d   :  { %4478 = vmatprep.mubr.bf16.mxu0 %v6055_v29  ;;  %5192 = vmatpush3.bf16.msra.mxu1 %v5674_v25  ;;  %v4976_v29 = vld [vmem:[%s6927_s10 + $0x2] sm:$0x3] }
0x211e   :  { %v4325_v60 = vpack.c.bf16 %v4323_v39, %v4322_v24  ;;  %v4353_v19 = vrot.slane %v4976_v29, %v6216_v20  ;;  %v4349_v36 = vrot.slane %v4976_v29, %v6204_v16 }
0x2124   :  { %4479 = vmatmul.mubr.bf16.gmra.mxu0 %v4325_v60 }
0x21dc   :  { %v4470_v56 = vpop.f32.mrf.mxu0 }
0x21dd   :  { %v4471_v28 = vadd.f32 %v4470_v56, %v4349_v36 }
0x21de   :  { %v4472_v43 = vpop.f32.mrf.mxu0 }
0x21df   :  { %v4473_v38 = vadd.f32 %v4472_v43, %v4353_v19  ;;  %v4489_v30 = vmax.f32 %v4471_v28, 0.0 }
0x21e0   :  { %v4474_v37 = vpop.f32.mrf.mxu0 }
0x21e1   :  { %v4475_v15 = vadd.f32 %v4474_v37, %v4349_v36  ;;  %v4490_v48 = vmax.f32 %v4473_v38, 0.0 }
0x21e2   :  { %v4476_v27 = vpop.f32.mrf.mxu0 }
0x21e3   :  { %v4477_v33 = vadd.f32 %v4476_v27, %v4353_v19  ;;  %v4491_v47 = vmax.f32 %v4475_v15, 0.0 }
0x21e4   :  { %v4480_v42 = vpop.f32.mrf.mxu0 }
0x21e5   :  { %v4492_v0 = vmax.f32 %v4477_v33, 0.0  ;;  %v4497_v51 = vpack.c.bf16 %v4491_v47, %v4489_v30  ;;  %v4481_v16 = vadd.f32 %v4480_v42, %v4349_v36 }
0x21e6   :  { %v4482_v35 = vpop.f32.mrf.mxu0 }
0x21e7   :  { %v4498_v14 = vpack.c.bf16 %v4492_v0, %v4490_v48  ;;  %v4483_v40 = vadd.f32 %v4482_v35, %v4353_v19  ;;  %v4493_v23 = vmax.f32 %v4481_v16, 0.0 }
0x21e8   :  { %v4484_v54 = vpop.f32.mrf.mxu0 }
0x21e9   :  { %v4485_v20 = vadd.f32 %v4484_v54, %v4349_v36  ;;  %4662 = vmatprep.mubr.bf16.mxu1 %v4498_v14  ;;  %v4494_v50 = vmax.f32 %v4483_v40, 0.0  ;;  %v5011_v14 = vld [vmem:[%s6930_s13] ss:$0 sm:$0xff]  ;;  %s6060_s13 = smov [#allocation17]  }
0x21ea   :  { %v4486_v53 = vpop.f32.mrf.mxu0  ;;  %4663 = vmatmul.mubr.bf16.vlgmr.msra.gmra.mxu1 %v4497_v51  ;;  %v5012_v54 = vld [vmem:[%s6931_s14] ss:$0 sm:$0xff]  ;;  %s4770_s9 = sshll.u32 %s6060_s13, 4  ;;  %s4771_s9 = int_to_ptr.vmem [resolvable:$true] %s4770_s9 }
0x21eb   :  { %v4487_v55 = vadd.f32 %v4486_v53, %v4353_v19  ;;  %v4495_v57 = vmax.f32 %v4485_v20, 0.0  ;;  %s6007_s14 = scalar_lea.vmem %s4771_s9, 512  ;;  %p6012_p13 = scmp.lt.s32.totalorder %s4771_s9, %s4771_s9 }
0x21ec   :  { %p6008_p12 = scmp.ne.s32.totalorder %s4771_s9, %s6007_s14  ;;  %p6013_p0 = scmp.lt.s32.totalorder %s6007_s14, %s6007_s14 }
0x21ed   :  { %v4496_v62 = vmax.f32 %v4487_v55, 0.0  ;;  %v4499_v1 = vpack.c.bf16 %v4495_v57, %v4493_v23 }
0x21ee   :  { %p6014_p1 = por %p6013_p0, %p6012_p13 }
0x21ef   :  { %v4500_v52 = vpack.c.bf16 %v4496_v62, %v4494_v50 }
0x21f0   :  { %p6015_p2 = pnand %p6014_p1, %p6008_p12 }
0x21f1   :  { %4670 = vmatprep.mubr.bf16.mxu1 %v4500_v52 }
0x21f2   :  { %4671 = vmatmul.mubr.bf16.gmra.mxu1 %v4499_v1 }
0x22aa   :  { %v5193_v61 = vpop.f32.mrf.mxu1 }
0x22ac   :  { %v5194_v3 = vpop.f32.mrf.mxu1 }
0x22ad   :  { %v5195_v4 = vadd.f32 %v5194_v3, %v5193_v61 }
0x22ae   :  { %v5196_v2 = vpop.f32.mrf.mxu1 }
0x22af   :  { %v4679_v5 = vadd.f32 %v5195_v4, %v6848_v41 }
0x22b0   :  { %v5197_v21 = vpop.f32.mrf.mxu1 }
0x22b1   :  { %v5198_v46 = vadd.f32 %v5197_v21, %v5196_v2  ;;  %v4691_v63 = vadd.f32 %v5010_v11, %v4679_v5 }
0x22b2   :  { %v5199_v6 = vpop.f32.mrf.mxu1 }
0x22b3   :  { %v4680_v31 = vadd.f32 %v5198_v46, %v6855_v13  ;;  %4697 = vadd.xlane.f32.xlu0 %v4691_v63 }
0x22b4   :  { %v5200_v10 = vpop.f32.mrf.mxu1 }
0x22b5   :  { %v5201_v22 = vadd.f32 %v5200_v10, %v5199_v6  ;;  %v4692_v7 = vadd.f32 %v5010_v11, %v4680_v31 }
0x22b6   :  { %v5202_v8 = vpop.f32.mrf.mxu1 }
0x22b7   :  { %v4681_v9 = vadd.f32 %v5201_v22, %v6852_v59  ;;  %4699 = vadd.xlane.f32.xlu1 %v4692_v7 }
0x22b8   :  { %v5203_v26 = vpop.f32.mrf.mxu1 }
0x22b9   :  { %v5204_v49 = vadd.f32 %v5203_v26, %v5202_v8  ;;  %v4693_v12 = vadd.f32 %v5010_v11, %v4681_v9 }
0x22bb   :  { %v4682_v17 = vadd.f32 %v5204_v49, %v6859_v58  ;;  %4701 = vadd.xlane.f32.xlu0 %v4693_v12 }
0x22bd   :  { %v4694_v41 = vadd.f32 %v5010_v11, %v4682_v17 }
0x22bf   :  { %4703 = vadd.xlane.f32.xlu1 %v4694_v41 }
0x233c   :  { %v4698_v39 = vpop.xlane.xlu0 %4697 }
0x233d   :  { %v4705_v24 = vmul.f32 0.0078125, %v4698_v39 }
0x233f   :  { %v4709_v60 = vsub.f32 %v4691_v63, %v4705_v24 }
0x2340   :  { %v4700_v13 = vpop.xlane.xlu1 %4699 }
0x2341   :  { %v4706_v32 = vmul.f32 0.0078125, %v4700_v13  ;;  %v4713_v45 = vmul.f32 %v4709_v60, %v4709_v60 }
0x2343   :  { %v4710_v34 = vsub.f32 %v4692_v7, %v4706_v32  ;;  %4717 = vadd.xlane.f32.xlu0 %v4713_v45 }
0x2344   :  { %v4702_v18 = vpop.xlane.xlu0 %4701 }
0x2345   :  { %v4707_v44 = vmul.f32 0.0078125, %v4702_v18  ;;  %v4714_v59 = vmul.f32 %v4710_v34, %v4710_v34 }
0x2347   :  { %v4711_v25 = vsub.f32 %v4693_v12, %v4707_v44  ;;  %4719 = vadd.xlane.f32.xlu1 %v4714_v59 }
0x2348   :  { %v4704_v29 = vpop.xlane.xlu1 %4703 }
0x2349   :  { %v4708_v56 = vmul.f32 0.0078125, %v4704_v29  ;;  %v4715_v19 = vmul.f32 %v4711_v25, %v4711_v25 }
0x234b   :  { %v4712_v58 = vsub.f32 %v4694_v41, %v4708_v56  ;;  %4721 = vadd.xlane.f32.xlu0 %v4715_v19 }
0x234d   :  { %v4716_v36 = vmul.f32 %v4712_v58, %v4712_v58 }
0x234f   :  { %4723 = vadd.xlane.f32.xlu1 %v4716_v36 }
0x23cc   :  { %v4718_v43 = vpop.xlane.xlu0 %4717 }
0x23cd   :  { %v4725_v37 = vmul.f32 0.0078125, %v4718_v43 }
0x23cf   :  { %v4729_v38 = vadd.f32 1e-05, %v4725_v37 }
0x23d0   :  { %v4720_v15 = vpop.xlane.xlu1 %4719 }
0x23d1   :  { %5835 = vrsqrt.f32 %v4729_v38  ;;  %v4726_v28 = vmul.f32 0.0078125, %v4720_v15 }
0x23d3   :  { %v4730_v27 = vadd.f32 1e-05, %v4726_v28 }
0x23d4   :  { %v4722_v33 = vpop.xlane.xlu0 %4721 }
0x23d5   :  { %5837 = vrsqrt.f32 %v4730_v27  ;;  %v4727_v47 = vmul.f32 0.0078125, %v4722_v33 }
0x23d7   :  { %v4731_v42 = vadd.f32 1e-05, %v4727_v47 }
0x23d8   :  { %v4724_v48 = vpop.xlane.xlu1 %4723 }
0x23d9   :  { %5839 = vrsqrt.f32 %v4731_v42  ;;  %v4728_v0 = vmul.f32 0.0078125, %v4724_v48 }
0x23db   :  { %v4732_v30 = vadd.f32 1e-05, %v4728_v0 }
0x23dd   :  { %5841 = vrsqrt.f32 %v4732_v30 }
0x23de   :  { %v5836_v35 = vpop.eup %5835 }
0x23df   :  { %v4737_v51 = vmul.f32 %v5836_v35, %v4709_v60 }
0x23e1   :  { %v4747_v40 = vmul.f32 %v5011_v14, %v4737_v51 }
0x23e2   :  { %v5838_v20 = vpop.eup %5837 }
0x23e3   :  { %v4738_v16 = vmul.f32 %v5838_v20, %v4710_v34  ;;  %v4757_v53 = vadd.f32 %v5012_v54, %v4747_v40 }
0x23e5   :  { %v4748_v55 = vmul.f32 %v5011_v14, %v4738_v16  ;;  %4761 = vst [vmem:[#allocation17] sm:$0xff] %v4757_v53 }
0x23e6   :  { %v5840_v57 = vpop.eup %5839 }
0x23e7   :  { %v4739_v50 = vmul.f32 %v5840_v57, %v4711_v25  ;;  %v4758_v62 = vadd.f32 %v5012_v54, %v4748_v55 }
0x23e9   :  { %v4749_v23 = vmul.f32 %v5011_v14, %v4739_v50  ;;  %4762 = vst [vmem:[#allocation17 + $0x8] sm:$0xff] %v4758_v62 }
0x23ea   :  { %v5842_v52 = vpop.eup %5841 }
0x23eb   :  { %v4740_v1 = vmul.f32 %v5842_v52, %v4712_v58  ;;  %v4759_v61 = vadd.f32 %v5012_v54, %v4749_v23 }
0x23ed   :  { %v4750_v3 = vmul.f32 %v5011_v14, %v4740_v1  ;;  %4763 = vst [vmem:[#allocation17 + $0x10] sm:$0xff] %v4759_v61 }
0x23ef   :  { %v4760_v4 = vadd.f32 %v5012_v54, %v4750_v3 }
0x23f1   :  { %4764 = vst [vmem:[#allocation17 + $0x18] sm:$0xff] %v4760_v4 }
0x23f2   :  { %6018 = shalt.err (!%p6015_p2)
}
0x23f3   :  { %4776 = dma.vmem_to_hbm [thread:$0]  %s4771_s9, 512, %s6932_s15, [#allocation5], %s6047_s25, %s6047_s25, %s6048_s26  }
0x23f4   :  { %6037 = dma.done.wait [#allocation5], 512  }
0x23f5   :  { %6038 = vsyncadd [#allocation5], 4294966784 }
0x23f6   :  { %4780 = vsyncpa [#allocation4], 1 }
0x23f7   :  { %4781 = vsyncpa [#allocation7], 1 }
0x23f8   :  { %4782 = vsyncpa [#allocation10], 1 }
0x23f9   :  { %4783 = vsyncpa [#allocation13], 1 }
0x23fa   :  { %4784 = vsyncpa [#allocation16], 1 }
0x23fb   :  { %4785 = vsyncpa [#allocation5], 1 }

</bundles_post_ra>
